<compile_context>
chip_gen: v7x
topology: tpu7x:2x2x1
jax: 0.10.0
libtpu: 0.0.40
codegen_flags: <defaults>
</compile_context>

<pallas_src>
import functools
import math

import jax
import jax.numpy as jnp
from jax import lax
from jax.experimental import pallas as pl
from jax.experimental.pallas import tpu as pltpu


# ----------------------------------------------------------------------------
# helpers
# ----------------------------------------------------------------------------
def _round_up(n, m):
    return ((n + m - 1) // m) * m


def _full_spec(a):
    nd = a.ndim
    return pl.BlockSpec(a.shape, lambda i, _nd=nd: (0,) * _nd)


def _nbytes(*arrs):
    return sum(math.prod(a.shape) * jnp.dtype(a.dtype).itemsize for a in arrs)


def _vmem_capacity_bytes():
    try:
        return int(pltpu.get_tpu_info().vmem_capacity_bytes)
    except Exception:
        return 64 * 1024 * 1024     # conservative fallback (v7x physical VMEM)


def _word_per_row_bytes(T, D, H):
    """Per-batch-row VMEM footprint of the fused BiGRU+attention kernel."""
    return (2 * T * D * 2            # input block (bf16), double-buffered
            + 2 * T * 4              # attention-mask block (int32), double-buffered
            + 2 * 4                  # length block
            + 2 * 2 * H * 4          # output block, double-buffered
            + T * 6 * H * 4          # gxf + gxb scratch (f32)
            + T * 2 * H * 4          # sf + sb scratch (f32)
            + T * 2 * H * 4          # attention u / exp temporaries (slack)
            + 64)


def _sent_per_row_bytes(R, H, HP, TP):
    return (_word_per_row_bytes(R, 2 * H, H)
            + 2 * R * HP * 4         # polarity+type head output block
            + 2 * TP * 4)            # town head output block


def _tile_and_limit(n_rows, per_row_bytes, weight_bytes):
    """Row tile (multiple of 8, capped by the VMEM budget) and vmem_limit_bytes."""
    cap_bytes = _vmem_capacity_bytes()
    tile_cap = 256 if cap_bytes >= (100 << 20) else 128   # bigger tiles on v5e/v6e
    budget = int(0.35 * cap_bytes)
    tn = min(tile_cap, _round_up(max(n_rows, 1), 8))
    while tn > 8 and tn * per_row_bytes > budget:
        tn -= 8
    est = tn * per_row_bytes + 2 * weight_bytes + (2 << 20)
    limit = max(32 << 20, min(int(1.5 * est) + (4 << 20), int(0.9 * cap_bytes)))
    return tn, int(limit)


# ----------------------------------------------------------------------------
# weight preparation
# ----------------------------------------------------------------------------
def _fuse_gru_dir(rnn, sfx):
    """Fuse one GRU direction. Gate column order: [r, z, n], each H wide.

    Returns:
      wi3  : (D, 3H) bf16   input -> gates
      wh3  : (H, 3H) bf16   hidden -> gates
      gb3  : (1, 3H) f32    b_i (+ b_h for r/z, folded into the input projection)
      bhn3 : (1, 3H) f32    b_h of the n gate only (stays inside the recurrence)
    """
    wi, wh = rnn["wi_" + sfx], rnn["wh_" + sfx]
    bi, bh = rnn["bi_" + sfx], rnn["bh_" + sfx]
    wi3 = jnp.concatenate([wi[0], wi[1], wi[2]], axis=-1).astype(jnp.bfloat16)
    wh3 = jnp.concatenate([wh[0], wh[1], wh[2]], axis=-1).astype(jnp.bfloat16)
    gb3 = jnp.concatenate([bi[0] + bh[0], bi[1] + bh[1], bi[2]], axis=-1)
    bhn3 = jnp.concatenate(
        [jnp.zeros_like(bh[0]), jnp.zeros_like(bh[1]), bh[2]], axis=-1)
    return wi3, wh3, gb3, bhn3


def _attn_weights(attn, H):
    wa = attn["w"]                                  # (2H, 2H)
    wa_f = wa[:H].astype(jnp.bfloat16)              # fwd-half rows
    wa_b = wa[H:].astype(jnp.bfloat16)              # bwd-half rows
    ba = attn["b"]                                  # (1, 2H) f32
    ctx = attn["ctx"].reshape(1, 1, 2 * H)          # (1, 1, 2H) f32
    return wa_f, wa_b, ba, ctx


# ----------------------------------------------------------------------------
# fused BiGRU + attention core (runs inside the kernels)
# ----------------------------------------------------------------------------
def _bigru_attn_core(len_ref, amask_ref, x_ref,
                     wi_f_ref, wi_b_ref, gb_f_ref, gb_b_ref,
                     wh_f_ref, wh_b_ref, bhn_f_ref, bhn_b_ref,
                     wa_f_ref, wa_b_ref, ba_ref, ctx_ref,
                     gxf_ref, gxb_ref, sf_ref, sb_ref):
    """Bidirectional GRU (packed-sequence semantics) + masked attention.

    Returns (sf_flat_bf16, sb_flat_bf16, attn_f, attn_b); the per-timestep GRU
    outputs only live in the VMEM scratch buffers sf/sb.
    """
    T, N, D = x_ref.shape
    H3 = wi_f_ref.shape[1]
    H = H3 // 3
    H2 = 2 * H
    f32 = jnp.float32
    bf16 = jnp.bfloat16

    # ---- input projection for the whole sequence: one MXU pass per direction ----
    x = x_ref[...].reshape(T * N, D)                                   # bf16
    gxf = jnp.dot(x, wi_f_ref[...], preferred_element_type=f32) + gb_f_ref[...]
    gxb = jnp.dot(x, wi_b_ref[...], preferred_element_type=f32) + gb_b_ref[...]
    gxf_ref[...] = gxf.reshape(T, N, H3)
    gxb_ref[...] = gxb.reshape(T, N, H3)

    # hoisted loop invariants (JAX does not CSE broadcasts inside the loop)
    lengths = len_ref[...]                                             # (N, 1) int32
    bhn_f = jnp.broadcast_to(bhn_f_ref[...], (N, H3))
    bhn_b = jnp.broadcast_to(bhn_b_ref[...], (N, H3))
    wh_f = wh_f_ref[...]                                               # (H, 3H) bf16
    wh_b = wh_b_ref[...]

    # ---- recurrence: fwd (time t=i) and bwd (time T-1-i) share one step ----
    def step(i, carry):
        h_f, h_b = carry                                               # (N, H) f32
        tb = T - 1 - i
        g_f = gxf_ref[i]                                               # (N, 3H)
        g_b = gxb_ref[tb]
        hh_f = jnp.dot(h_f.astype(bf16), wh_f,
                       preferred_element_type=f32) + bhn_f
        hh_b = jnp.dot(h_b.astype(bf16), wh_b,
                       preferred_element_type=f32) + bhn_b
        r_f = jax.nn.sigmoid(g_f[:, :H] + hh_f[:, :H])
        z_f = jax.nn.sigmoid(g_f[:, H:H2] + hh_f[:, H:H2])
        n_f = jnp.tanh(g_f[:, H2:] + r_f * hh_f[:, H2:])
        r_b = jax.nn.sigmoid(g_b[:, :H] + hh_b[:, :H])
        z_b = jax.nn.sigmoid(g_b[:, H:H2] + hh_b[:, H:H2])
        n_b = jnp.tanh(g_b[:, H2:] + r_b * hh_b[:, H2:])
        hf_new = (1.0 - z_f) * n_f + z_f * h_f
        hb_new = (1.0 - z_b) * n_b + z_b * h_b
        # pack_padded_sequence semantics: freeze h and zero outputs past length
        m_f = i < lengths                                              # (N, 1) bool
        m_b = tb < lengths
        h_f = jnp.where(m_f, hf_new, h_f)
        h_b = jnp.where(m_b, hb_new, h_b)
        sf_ref[i] = jnp.where(m_f, h_f, 0.0)
        sb_ref[tb] = jnp.where(m_b, h_b, 0.0)
        return h_f, h_b

    h0 = jnp.zeros((N, H), f32)
    unroll = True if T <= 16 else 8
    _ = lax.fori_loop(0, T, step, (h0, h0), unroll=unroll)

    # ---- batched attention over all N rows (no (T, N, 2H) concat temp) ----
    sf = sf_ref[...]                                                   # (T, N, H) f32
    sb = sb_ref[...]
    sfb = sf.reshape(T * N, H).astype(bf16)
    sbb = sb.reshape(T * N, H).astype(bf16)
    u = jnp.tanh(jnp.dot(sfb, wa_f_ref[...], preferred_element_type=f32)
                 + jnp.dot(sbb, wa_b_ref[...], preferred_element_type=f32)
                 + ba_ref[...])                                        # (T*N, 2H)
    u3 = u.reshape(T, N, H2)
    s = jnp.sum(u3 * ctx_ref[...], axis=-1, keepdims=True)             # (T, N, 1)
    s = jnp.where(amask_ref[...] != 0, s, -1.0e9)                      # masked_fill
    m = jnp.max(s, axis=0, keepdims=True)
    e = jnp.exp(s - m)
    denom = jnp.sum(e, axis=0, keepdims=True)
    a = e * pl.reciprocal(denom, approx=True)                          # softmax over T
    attn_f = jnp.sum(a * sf, axis=0)                                   # (N, H)
    attn_b = jnp.sum(a * sb, axis=0)                                   # (N, H)
    return sfb, sbb, attn_f, attn_b


# ----------------------------------------------------------------------------
# kernels
# ----------------------------------------------------------------------------
def _word_kernel(len_ref, amask_ref, x_ref,
                 wi_f_ref, wi_b_ref, gb_f_ref, gb_b_ref,
                 wh_f_ref, wh_b_ref, bhn_f_ref, bhn_b_ref,
                 wa_f_ref, wa_b_ref, ba_ref, ctx_ref,
                 out_ref,
                 gxf_ref, gxb_ref, sf_ref, sb_ref):
    _, _, attn_f, attn_b = _bigru_attn_core(
        len_ref, amask_ref, x_ref,
        wi_f_ref, wi_b_ref, gb_f_ref, gb_b_ref,
        wh_f_ref, wh_b_ref, bhn_f_ref, bhn_b_ref,
        wa_f_ref, wa_b_ref, ba_ref, ctx_ref,
        gxf_ref, gxb_ref, sf_ref, sb_ref)
    out_ref[...] = jnp.concatenate([attn_f, attn_b], axis=-1)


def _sent_kernel(len_ref, amask_ref, x_ref,
                 wi_f_ref, wi_b_ref, gb_f_ref, gb_b_ref,
                 wh_f_ref, wh_b_ref, bhn_f_ref, bhn_b_ref,
                 wa_f_ref, wa_b_ref, ba_ref, ctx_ref,
                 wpt_f_ref, wpt_b_ref, bpt_ref,
                 wtn_f_ref, wtn_b_ref, btn_ref,
                 pt_ref, town_ref,
                 gxf_ref, gxb_ref, sf_ref, sb_ref):
    sfb, sbb, attn_f, attn_b = _bigru_attn_core(
        len_ref, amask_ref, x_ref,
        wi_f_ref, wi_b_ref, gb_f_ref, gb_b_ref,
        wh_f_ref, wh_b_ref, bhn_f_ref, bhn_b_ref,
        wa_f_ref, wa_b_ref, ba_ref, ctx_ref,
        gxf_ref, gxb_ref, sf_ref, sb_ref)
    R, N, _ = x_ref.shape
    f32 = jnp.float32
    bf16 = jnp.bfloat16
    # fused polarity+type heads on every (review, batch) row of sent_output
    pt = (jnp.dot(sfb, wpt_f_ref[...], preferred_element_type=f32)
          + jnp.dot(sbb, wpt_b_ref[...], preferred_element_type=f32)
          + bpt_ref[...])
    pt_ref[...] = pt.reshape(R, N, pt.shape[-1])
    # town head on the attention-pooled representation
    town_ref[...] = (
        jnp.dot(attn_f.astype(bf16), wtn_f_ref[...], preferred_element_type=f32)
        + jnp.dot(attn_b.astype(bf16), wtn_b_ref[...], preferred_element_type=f32)
        + btn_ref[...])


# ----------------------------------------------------------------------------
# pallas_call wrappers
# ----------------------------------------------------------------------------
def _word_level(len_col, amask, x, weights, H, tn, vmem_limit):
    """x: (T, Np, D) bf16 time-major; returns attention-pooled (Np, 2H) f32."""
    T, Np, D = x.shape
    H2, H3 = 2 * H, 3 * H
    grid = (Np // tn,)
    in_specs = ([pl.BlockSpec((tn, 1), lambda i: (i, 0)),
                 pl.BlockSpec((T, tn, 1), lambda i: (0, i, 0)),
                 pl.BlockSpec((T, tn, D), lambda i: (0, i, 0))]
                + [_full_spec(w) for w in weights])
    return pl.pallas_call(
        _word_kernel,
        grid=grid,
        out_shape=jax.ShapeDtypeStruct((Np, H2), jnp.float32),
        in_specs=in_specs,
        out_specs=pl.BlockSpec((tn, H2), lambda i: (i, 0)),
        scratch_shapes=[
            pltpu.VMEM((T, tn, H3), jnp.float32),
            pltpu.VMEM((T, tn, H3), jnp.float32),
            pltpu.VMEM((T, tn, H), jnp.float32),
            pltpu.VMEM((T, tn, H), jnp.float32),
        ],
        compiler_params=pltpu.CompilerParams(
            dimension_semantics=("parallel",),
            vmem_limit_bytes=vmem_limit),
    )(len_col, amask, x, *weights)


def _sent_level(len_col, amask, x, weights, heads, H, tb, vmem_limit):
    """x: (R, Bp, 2H) bf16 review-major; returns ((R, Bp, HP), (Bp, TP)) logits."""
    R, Bp, H2 = x.shape
    H3 = 3 * H
    HP = heads[2].shape[-1]
    TP = heads[5].shape[-1]
    grid = (Bp // tb,)
    in_specs = ([pl.BlockSpec((tb, 1), lambda i: (i, 0)),
                 pl.BlockSpec((R, tb, 1), lambda i: (0, i, 0)),
                 pl.BlockSpec((R, tb, H2), lambda i: (0, i, 0))]
                + [_full_spec(w) for w in weights]
                + [_full_spec(w) for w in heads])
    return pl.pallas_call(
        _sent_kernel,
        grid=grid,
        out_shape=(jax.ShapeDtypeStruct((R, Bp, HP), jnp.float32),
                   jax.ShapeDtypeStruct((Bp, TP), jnp.float32)),
        in_specs=in_specs,
        out_specs=(pl.BlockSpec((R, tb, HP), lambda i: (0, i, 0)),
                   pl.BlockSpec((tb, TP), lambda i: (i, 0))),
        scratch_shapes=[
            pltpu.VMEM((R, tb, H3), jnp.float32),
            pltpu.VMEM((R, tb, H3), jnp.float32),
            pltpu.VMEM((R, tb, H), jnp.float32),
            pltpu.VMEM((R, tb, H), jnp.float32),
        ],
        compiler_params=pltpu.CompilerParams(
            dimension_semantics=("parallel",),
            vmem_limit_bytes=vmem_limit),
    )(len_col, amask, x, *weights, *heads)


# ----------------------------------------------------------------------------
# model forward
# ----------------------------------------------------------------------------
def hierarchical_forward(params, input_ids, lengths, review_mask):
    B, R, Tk = input_ids.shape
    H = params["word_rnn"]["wh_f"].shape[-1]
    H2 = 2 * H
    E = params["embedding"].shape[-1]

    # ---------------- word level ----------------
    wiF, whF, gbF, bhnF = _fuse_gru_dir(params["word_rnn"], "f")
    wiB, whB, gbB, bhnB = _fuse_gru_dir(params["word_rnn"], "b")
    waF, waB, baW, ctxW = _attn_weights(params["word_attn"], H)
    w_weights = (wiF, wiB, gbF, gbB, whF, whB, bhnF, bhnB, waF, waB, baW, ctxW)

    N0 = B * R
    tn, vmem_w = _tile_and_limit(N0, _word_per_row_bytes(Tk, E, H),
                                 _nbytes(*w_weights))
    Np = _round_up(N0, tn)                         # pad batch-of-reviews to the tile

    flat_ids = input_ids.reshape(N0, Tk).astype(jnp.int32)
    flat_len = lengths.reshape(N0).astype(jnp.int32)
    ids_p = jnp.zeros((Np, Tk), jnp.int32).at[:N0].set(flat_ids)
    len_p = jnp.zeros((Np,), jnp.int32).at[:N0].set(flat_len)

    # Embedding lookup (gather stays in plain JAX), directly time-major, bf16.
    ids_t = ids_p.T                                                    # (Tk, Np)
    emb = jnp.take(params["embedding"].astype(jnp.bfloat16), ids_t, axis=0)
    amask_w = (ids_t != 0).astype(jnp.int32)[:, :, None]               # (Tk, Np, 1)
    len_col = len_p[:, None]                                           # (Np, 1)
    # TODO(synk): dropout_embed / dropout_head treated as inference-mode identity.

    review_repr = _word_level(len_col, amask_w, emb, w_weights, H, tn, vmem_w)
    valid = (flat_len > 0).astype(jnp.float32)[:, None]
    review_repr = review_repr[:N0] * valid                  # zero rows with len == 0

    # ---------------- sentence level ----------------
    wiFs, whFs, gbFs, bhnFs = _fuse_gru_dir(params["sent_rnn"], "f")
    wiBs, whBs, gbBs, bhnBs = _fuse_gru_dir(params["sent_rnn"], "b")
    waFs, waBs, baS, ctxS = _attn_weights(params["sent_attn"], H)
    s_weights = (wiFs, wiBs, gbFs, gbBs, whFs, whBs, bhnFs, bhnBs,
                 waFs, waBs, baS, ctxS)

    n_pol = params["polarity_fc"]["w"].shape[1]
    n_typ = params["type_fc"]["w"].shape[1]
    n_town = params["town_fc"]["w"].shape[1]
    n_pt = n_pol + n_typ
    HP = _round_up(n_pt, 128)                      # lane-dense head outputs
    TP = _round_up(n_town, 128)

    wpt = jnp.concatenate([params["polarity_fc"]["w"], params["type_fc"]["w"]], axis=1)
    bpt = jnp.concatenate([params["polarity_fc"]["b"], params["type_fc"]["b"]], axis=1)
    wpt = jnp.pad(wpt, ((0, 0), (0, HP - n_pt)))
    bpt = jnp.pad(bpt, ((0, 0), (0, HP - n_pt)))
    wtown = jnp.pad(params["town_fc"]["w"], ((0, 0), (0, TP - n_town)))
    btown = jnp.pad(params["town_fc"]["b"], ((0, 0), (0, TP - n_town)))
    s_heads = (wpt[:H].astype(jnp.bfloat16), wpt[H:].astype(jnp.bfloat16), bpt,
               wtown[:H].astype(jnp.bfloat16), wtown[H:].astype(jnp.bfloat16), btown)

    tb, vmem_s = _tile_and_limit(B, _sent_per_row_bytes(R, H, HP, TP),
                                 _nbytes(*s_weights, *s_heads))
    Bp = _round_up(B, tb)

    # review(=time)-major layout for the sentence GRU, padded batch, bf16 input.
    sent_x = review_repr.reshape(B, R, H2).transpose(1, 0, 2)          # (R, B, 2H)
    sent_x = jnp.zeros((R, Bp, H2), jnp.float32).at[:, :B].set(sent_x)
    sent_x = sent_x.astype(jnp.bfloat16)
    # reference does not pack the sentence GRU: every review slot is processed.
    len_s = jnp.where(jnp.arange(Bp) < B, R, 0).astype(jnp.int32)[:, None]   # (Bp, 1)
    amask_s = jnp.zeros((R, Bp), jnp.int32).at[:, :B].set(
        review_mask.astype(jnp.int32).T)[:, :, None]                         # (R, Bp, 1)

    pt, town = _sent_level(len_s, amask_s, sent_x, s_weights, s_heads, H, tb, vmem_s)

    pt = pt[:, :B, :n_pt].transpose(1, 0, 2)                 # (B, R, n_pol + n_typ)
    polarity_logits = pt[..., :n_pol]
    type_logits = pt[..., n_pol:]
    town_logits = town[:B, :n_town]
    return polarity_logits, town_logits, type_logits


# ----------------------------------------------------------------------------
# deterministic parameter init (matches PyTorch module structure)
# ----------------------------------------------------------------------------
def init_params(key, vocab_size, embed_dim, hidden_size,
                num_polarities=5, num_types=3, num_towns=40):
    ks = jax.random.split(key, 8)

    def nrm(k, shape, scale=0.1):
        return scale * jax.random.normal(k, shape, dtype=jnp.float32)

    emb = nrm(ks[0], (vocab_size, embed_dim))
    emb = emb.at[0].set(0.0)   # padding_idx=0

    def gru(k, in_dim, h):
        k1, k2, k3, k4, k5, k6, k7, k8 = jax.random.split(k, 8)
        # gate-stacked weights: index 0=r, 1=z, 2=n (PyTorch order); laid out for x @ W.
        return dict(
            wi_f=nrm(k1, (3, in_dim, h)), wh_f=nrm(k2, (3, h, h)),
            bi_f=nrm(k3, (3, 1, h)),      bh_f=nrm(k4, (3, 1, h)),
            wi_b=nrm(k5, (3, in_dim, h)), wh_b=nrm(k6, (3, h, h)),
            bi_b=nrm(k7, (3, 1, h)),      bh_b=nrm(k8, (3, 1, h)))

    def attn(k, d):
        k1, k2, k3 = jax.random.split(k, 3)
        return dict(w=nrm(k1, (d, d)), b=nrm(k2, (1, d)), ctx=nrm(k3, (d, 1)))

    def lin(k, d_in, d_out):
        k1, k2 = jax.random.split(k, 2)
        return dict(w=nrm(k1, (d_in, d_out)), b=nrm(k2, (1, d_out)))

    h2 = 2 * hidden_size
    return dict(
        embedding=emb,
        word_rnn=gru(ks[1], embed_dim, hidden_size),
        word_attn=attn(ks[2], h2),
        sent_rnn=gru(ks[3], h2, hidden_size),
        sent_attn=attn(ks[4], h2),
        polarity_fc=lin(ks[5], h2, num_polarities),
        type_fc=lin(ks[6], h2, num_types),
        town_fc=lin(ks[7], h2, num_towns),
    )


if __name__ == "__main__":
    key = jax.random.PRNGKey(0)
    vocab_size, embed_dim, hidden_size = 50, 32, 32
    B, R, Tk = 2, 4, 8

    pkey, ikey = jax.random.split(key)
    params = init_params(pkey, vocab_size, embed_dim, hidden_size)

    lengths = jnp.array([[8, 5, 3, 0],
                         [8, 8, 2, 6]], dtype=jnp.int32)
    ids = jax.random.randint(ikey, (B, R, Tk), 1, vocab_size, dtype=jnp.int32)
    pos = jnp.arange(Tk, dtype=jnp.int32)
    ids = jnp.where(pos[None, None, :] < lengths[:, :, None], ids, 0)   # 0-pad past length
    review_mask = (lengths > 0)

    fwd = jax.jit(functools.partial(hierarchical_forward, params))
    polarity_logits, town_logits, type_logits = fwd(ids, lengths, review_mask)
    jax.block_until_ready((polarity_logits, town_logits, type_logits))

    assert polarity_logits.shape == (B, R, 5)
    assert town_logits.shape == (B, 40)
    assert type_logits.shape == (B, R, 3)
    assert all(bool(jnp.isfinite(t).all()) for t in
               (polarity_logits, town_logits, type_logits))
    print("KERNEL_OK")
</pallas_src>

<mosaic_0001>
module attributes {stable_mosaic.version = 11 : i64} {
  func.func @_word_kernel(%arg0: i32, %arg1: memref<8x1xi32, #tpu.memory_space<vmem>>, %arg2: memref<8x8x1xi32, #tpu.memory_space<vmem>>, %arg3: memref<8x8x32xbf16, #tpu.memory_space<vmem>>, %arg4: memref<32x96xbf16, #tpu.memory_space<vmem>>, %arg5: memref<32x96xbf16, #tpu.memory_space<vmem>>, %arg6: memref<1x96xf32, #tpu.memory_space<vmem>>, %arg7: memref<1x96xf32, #tpu.memory_space<vmem>>, %arg8: memref<32x96xbf16, #tpu.memory_space<vmem>>, %arg9: memref<32x96xbf16, #tpu.memory_space<vmem>>, %arg10: memref<1x96xf32, #tpu.memory_space<vmem>>, %arg11: memref<1x96xf32, #tpu.memory_space<vmem>>, %arg12: memref<32x64xbf16, #tpu.memory_space<vmem>>, %arg13: memref<32x64xbf16, #tpu.memory_space<vmem>>, %arg14: memref<1x64xf32, #tpu.memory_space<vmem>>, %arg15: memref<1x1x64xf32, #tpu.memory_space<vmem>>, %arg16: memref<8x64xf32, #tpu.memory_space<vmem>>, %arg17: memref<8x8x96xf32, #tpu.memory_space<vmem>>, %arg18: memref<8x8x96xf32, #tpu.memory_space<vmem>>, %arg19: memref<8x8x32xf32, #tpu.memory_space<vmem>>, %arg20: memref<8x8x32xf32, #tpu.memory_space<vmem>>) attributes {dimension_semantics = [#tpu.dimension_semantics<parallel>], iteration_bounds = array<i64: 1>, scalar_prefetch = 0 : i64, scratch_operands = 4 : i64, tpu.core_type = #tpu.core_type<tc>, window_params = [{transform_indices = @transform_0, window_bounds = array<i64: 8, 1>}, {transform_indices = @transform_1, window_bounds = array<i64: 8, 8, 1>}, {transform_indices = @transform_2, window_bounds = array<i64: 8, 8, 32>}, {pipeline_mode = #tpu.pipeline_mode<synchronous>, transform_indices = @transform_3, window_bounds = array<i64: 32, 96>}, {pipeline_mode = #tpu.pipeline_mode<synchronous>, transform_indices = @transform_4, window_bounds = array<i64: 32, 96>}, {pipeline_mode = #tpu.pipeline_mode<synchronous>, transform_indices = @transform_5, window_bounds = array<i64: 1, 96>}, {pipeline_mode = #tpu.pipeline_mode<synchronous>, transform_indices = @transform_6, window_bounds = array<i64: 1, 96>}, {pipeline_mode = #tpu.pipeline_mode<synchronous>, transform_indices = @transform_7, window_bounds = array<i64: 32, 96>}, {pipeline_mode = #tpu.pipeline_mode<synchronous>, transform_indices = @transform_8, window_bounds = array<i64: 32, 96>}, {pipeline_mode = #tpu.pipeline_mode<synchronous>, transform_indices = @transform_9, window_bounds = array<i64: 1, 96>}, {pipeline_mode = #tpu.pipeline_mode<synchronous>, transform_indices = @transform_10, window_bounds = array<i64: 1, 96>}, {pipeline_mode = #tpu.pipeline_mode<synchronous>, transform_indices = @transform_11, window_bounds = array<i64: 32, 64>}, {pipeline_mode = #tpu.pipeline_mode<synchronous>, transform_indices = @transform_12, window_bounds = array<i64: 32, 64>}, {pipeline_mode = #tpu.pipeline_mode<synchronous>, transform_indices = @transform_13, window_bounds = array<i64: 1, 64>}, {pipeline_mode = #tpu.pipeline_mode<synchronous>, transform_indices = @transform_14, window_bounds = array<i64: 1, 1, 64>}, {transform_indices = @transform_15, window_bounds = array<i64: 8, 64>}]} {
    %c0 = arith.constant 0 : index
    %c0_0 = arith.constant 0 : index
    %c0_1 = arith.constant 0 : index
    %0 = vector.load %arg3[%c0, %c0_0, %c0_1] : memref<8x8x32xbf16, #tpu.memory_space<vmem>>, vector<8x8x32xbf16>
    %1 = vector.shape_cast %0 : vector<8x8x32xbf16> to vector<64x32xbf16>
    %c0_2 = arith.constant 0 : index
    %c0_3 = arith.constant 0 : index
    %2 = vector.load %arg4[%c0_2, %c0_3] : memref<32x96xbf16, #tpu.memory_space<vmem>>, vector<32x96xbf16>
    %cst = arith.constant dense<0.000000e+00> : vector<64x96xf32>
    %3 = tpu.matmul %1, %2, %cst {dimension_numbers = #tpu.dot_dimension_numbers<[1], [0], [0], [1], [0, 0, 1, 1], [], []>} : vector<64x32xbf16>, vector<32x96xbf16>, vector<64x96xf32> -> vector<64x96xf32>
    %c0_4 = arith.constant 0 : index
    %c0_5 = arith.constant 0 : index
    %4 = vector.load %arg6[%c0_4, %c0_5] : memref<1x96xf32, #tpu.memory_space<vmem>>, vector<1x96xf32>
    %5 = vector.broadcast %4 : vector<1x96xf32> to vector<64x96xf32>
    %6 = arith.addf %3, %5 : vector<64x96xf32>
    %c0_6 = arith.constant 0 : index
    %c0_7 = arith.constant 0 : index
    %7 = vector.load %arg5[%c0_6, %c0_7] : memref<32x96xbf16, #tpu.memory_space<vmem>>, vector<32x96xbf16>
    %cst_8 = arith.constant dense<0.000000e+00> : vector<64x96xf32>
    %8 = tpu.matmul %1, %7, %cst_8 {dimension_numbers = #tpu.dot_dimension_numbers<[1], [0], [0], [1], [0, 0, 1, 1], [], []>} : vector<64x32xbf16>, vector<32x96xbf16>, vector<64x96xf32> -> vector<64x96xf32>
    %c0_9 = arith.constant 0 : index
    %c0_10 = arith.constant 0 : index
    %9 = vector.load %arg7[%c0_9, %c0_10] : memref<1x96xf32, #tpu.memory_space<vmem>>, vector<1x96xf32>
    %10 = vector.broadcast %9 : vector<1x96xf32> to vector<64x96xf32>
    %11 = arith.addf %8, %10 : vector<64x96xf32>
    %12 = vector.shape_cast %6 : vector<64x96xf32> to vector<8x8x96xf32>
    %c0_11 = arith.constant 0 : index
    %c0_12 = arith.constant 0 : index
    %c0_13 = arith.constant 0 : index
    %13 = vector.load %arg17[%c0_11, %c0_12, %c0_13] : memref<8x8x96xf32, #tpu.memory_space<vmem>>, vector<8x8x96xf32>
    tpu.vector_store %arg17[%c0_11, %c0_12, %c0_13], %12 {strides = array<i32>} : memref<8x8x96xf32, #tpu.memory_space<vmem>>, vector<8x8x96xf32>,
    %14 = vector.shape_cast %11 : vector<64x96xf32> to vector<8x8x96xf32>
    %c0_14 = arith.constant 0 : index
    %c0_15 = arith.constant 0 : index
    %c0_16 = arith.constant 0 : index
    %15 = vector.load %arg18[%c0_14, %c0_15, %c0_16] : memref<8x8x96xf32, #tpu.memory_space<vmem>>, vector<8x8x96xf32>
    tpu.vector_store %arg18[%c0_14, %c0_15, %c0_16], %14 {strides = array<i32>} : memref<8x8x96xf32, #tpu.memory_space<vmem>>, vector<8x8x96xf32>,
    %c0_17 = arith.constant 0 : index
    %c0_18 = arith.constant 0 : index
    %16 = vector.load %arg1[%c0_17, %c0_18] : memref<8x1xi32, #tpu.memory_space<vmem>>, vector<8x1xi32>
    %c0_19 = arith.constant 0 : index
    %c0_20 = arith.constant 0 : index
    %17 = vector.load %arg10[%c0_19, %c0_20] : memref<1x96xf32, #tpu.memory_space<vmem>>, vector<1x96xf32>
    %18 = vector.shape_cast %17 : vector<1x96xf32> to vector<1x96xf32>
    %19 = vector.broadcast %18 : vector<1x96xf32> to vector<8x96xf32>
    %c0_21 = arith.constant 0 : index
    %c0_22 = arith.constant 0 : index
    %20 = vector.load %arg11[%c0_21, %c0_22] : memref<1x96xf32, #tpu.memory_space<vmem>>, vector<1x96xf32>
    %21 = vector.shape_cast %20 : vector<1x96xf32> to vector<1x96xf32>
    %22 = vector.broadcast %21 : vector<1x96xf32> to vector<8x96xf32>
    %c0_23 = arith.constant 0 : index
    %c0_24 = arith.constant 0 : index
    %23 = vector.load %arg8[%c0_23, %c0_24] : memref<32x96xbf16, #tpu.memory_space<vmem>>, vector<32x96xbf16>
    %c0_25 = arith.constant 0 : index
    %c0_26 = arith.constant 0 : index
    %24 = vector.load %arg9[%c0_25, %c0_26] : memref<32x96xbf16, #tpu.memory_space<vmem>>, vector<32x96xbf16>
    %cst_27 = arith.constant 0.000000e+00 : f32
    %25 = vector.broadcast %cst_27 : f32 to vector<8x32xf32>
    %c0_i32 = arith.constant 0 : i32
    %c7_i32 = arith.constant 7 : i32
    %26 = arith.subi %c7_i32, %c0_i32 : i32
    %27 = arith.index_cast %c0_i32 : i32 to index
    %c0_28 = arith.constant 0 : index
    %c0_29 = arith.constant 0 : index
    %28 = vector.load %arg17[%27, %c0_28, %c0_29] : memref<8x8x96xf32, #tpu.memory_space<vmem>>, vector<1x8x96xf32>
    %29 = vector.shape_cast %28 : vector<1x8x96xf32> to vector<8x96xf32>
    %30 = arith.index_cast %26 : i32 to index
    %c0_30 = arith.constant 0 : index
    %c0_31 = arith.constant 0 : index
    %31 = vector.load %arg18[%30, %c0_30, %c0_31] : memref<8x8x96xf32, #tpu.memory_space<vmem>>, vector<1x8x96xf32>
    %32 = vector.shape_cast %31 : vector<1x8x96xf32> to vector<8x96xf32>
    %33 = arith.truncf %25 : vector<8x32xf32> to vector<8x32xbf16>
    %cst_32 = arith.constant dense<0.000000e+00> : vector<8x96xf32>
    %34 = tpu.matmul %33, %23, %cst_32 {dimension_numbers = #tpu.dot_dimension_numbers<[1], [0], [0], [1], [0, 0, 1, 1], [], []>} : vector<8x32xbf16>, vector<32x96xbf16>, vector<8x96xf32> -> vector<8x96xf32>
    %35 = arith.addf %34, %19 : vector<8x96xf32>
    %36 = arith.truncf %25 : vector<8x32xf32> to vector<8x32xbf16>
    %cst_33 = arith.constant dense<0.000000e+00> : vector<8x96xf32>
    %37 = tpu.matmul %36, %24, %cst_33 {dimension_numbers = #tpu.dot_dimension_numbers<[1], [0], [0], [1], [0, 0, 1, 1], [], []>} : vector<8x32xbf16>, vector<32x96xbf16>, vector<8x96xf32> -> vector<8x96xf32>
    %38 = arith.addf %37, %22 : vector<8x96xf32>
    %39 = vector.extract_strided_slice %29 {offsets = [0, 0], sizes = [8, 32], strides = [1, 1]} : vector<8x96xf32> to vector<8x32xf32>
    %40 = vector.extract_strided_slice %35 {offsets = [0, 0], sizes = [8, 32], strides = [1, 1]} : vector<8x96xf32> to vector<8x32xf32>
    %41 = arith.addf %39, %40 : vector<8x32xf32>
    %42 = arith.negf %41 : vector<8x32xf32>
    %43 = math.exp %42 : vector<8x32xf32>
    %cst_34 = arith.constant 1.000000e+00 : f32
    %44 = vector.broadcast %cst_34 : f32 to vector<8x32xf32>
    %45 = arith.addf %44, %43 : vector<8x32xf32>
    %46 = arith.divf %44, %45 : vector<8x32xf32>
    %47 = vector.extract_strided_slice %29 {offsets = [0, 32], sizes = [8, 32], strides = [1, 1]} : vector<8x96xf32> to vector<8x32xf32>
    %48 = vector.extract_strided_slice %35 {offsets = [0, 32], sizes = [8, 32], strides = [1, 1]} : vector<8x96xf32> to vector<8x32xf32>
    %49 = arith.addf %47, %48 : vector<8x32xf32>
    %50 = arith.negf %49 : vector<8x32xf32>
    %51 = math.exp %50 : vector<8x32xf32>
    %cst_35 = arith.constant 1.000000e+00 : f32
    %52 = vector.broadcast %cst_35 : f32 to vector<8x32xf32>
    %53 = arith.addf %52, %51 : vector<8x32xf32>
    %54 = arith.divf %52, %53 : vector<8x32xf32>
    %55 = vector.extract_strided_slice %29 {offsets = [0, 64], sizes = [8, 32], strides = [1, 1]} : vector<8x96xf32> to vector<8x32xf32>
    %56 = vector.extract_strided_slice %35 {offsets = [0, 64], sizes = [8, 32], strides = [1, 1]} : vector<8x96xf32> to vector<8x32xf32>
    %57 = arith.mulf %46, %56 : vector<8x32xf32>
    %58 = arith.addf %55, %57 : vector<8x32xf32>
    %59 = math.tanh %58 : vector<8x32xf32>
    %60 = vector.extract_strided_slice %32 {offsets = [0, 0], sizes = [8, 32], strides = [1, 1]} : vector<8x96xf32> to vector<8x32xf32>
    %61 = vector.extract_strided_slice %38 {offsets = [0, 0], sizes = [8, 32], strides = [1, 1]} : vector<8x96xf32> to vector<8x32xf32>
    %62 = arith.addf %60, %61 : vector<8x32xf32>
    %63 = arith.negf %62 : vector<8x32xf32>
    %64 = math.exp %63 : vector<8x32xf32>
    %cst_36 = arith.constant 1.000000e+00 : f32
    %65 = vector.broadcast %cst_36 : f32 to vector<8x32xf32>
    %66 = arith.addf %65, %64 : vector<8x32xf32>
    %67 = arith.divf %65, %66 : vector<8x32xf32>
    %68 = vector.extract_strided_slice %32 {offsets = [0, 32], sizes = [8, 32], strides = [1, 1]} : vector<8x96xf32> to vector<8x32xf32>
    %69 = vector.extract_strided_slice %38 {offsets = [0, 32], sizes = [8, 32], strides = [1, 1]} : vector<8x96xf32> to vector<8x32xf32>
    %70 = arith.addf %68, %69 : vector<8x32xf32>
    %71 = arith.negf %70 : vector<8x32xf32>
    %72 = math.exp %71 : vector<8x32xf32>
    %cst_37 = arith.constant 1.000000e+00 : f32
    %73 = vector.broadcast %cst_37 : f32 to vector<8x32xf32>
    %74 = arith.addf %73, %72 : vector<8x32xf32>
    %75 = arith.divf %73, %74 : vector<8x32xf32>
    %76 = vector.extract_strided_slice %32 {offsets = [0, 64], sizes = [8, 32], strides = [1, 1]} : vector<8x96xf32> to vector<8x32xf32>
    %77 = vector.extract_strided_slice %38 {offsets = [0, 64], sizes = [8, 32], strides = [1, 1]} : vector<8x96xf32> to vector<8x32xf32>
    %78 = arith.mulf %67, %77 : vector<8x32xf32>
    %79 = arith.addf %76, %78 : vector<8x32xf32>
    %80 = math.tanh %79 : vector<8x32xf32>
    %cst_38 = arith.constant 1.000000e+00 : f32
    %81 = vector.broadcast %cst_38 : f32 to vector<8x32xf32>
    %82 = arith.subf %81, %54 : vector<8x32xf32>
    %83 = arith.mulf %82, %59 : vector<8x32xf32>
    %84 = arith.mulf %54, %25 : vector<8x32xf32>
    %85 = arith.addf %83, %84 : vector<8x32xf32>
    %cst_39 = arith.constant 1.000000e+00 : f32
    %86 = vector.broadcast %cst_39 : f32 to vector<8x32xf32>
    %87 = arith.subf %86, %75 : vector<8x32xf32>
    %88 = arith.mulf %87, %80 : vector<8x32xf32>
    %89 = arith.mulf %75, %25 : vector<8x32xf32>
    %90 = arith.addf %88, %89 : vector<8x32xf32>
    %91 = vector.broadcast %c0_i32 : i32 to vector<8x1xi32>
    %92 = arith.cmpi slt, %91, %16 : vector<8x1xi32>
    %93 = vector.broadcast %26 : i32 to vector<8x1xi32>
    %94 = arith.cmpi slt, %93, %16 : vector<8x1xi32>
    %95 = vector.shape_cast %92 : vector<8x1xi1> to vector<8x1xi1>
    %96 = vector.broadcast %95 : vector<8x1xi1> to vector<8x32xi1>
    %97 = arith.select %96, %85, %25 : vector<8x32xi1>, vector<8x32xf32>
    %98 = vector.shape_cast %94 : vector<8x1xi1> to vector<8x1xi1>
    %99 = vector.broadcast %98 : vector<8x1xi1> to vector<8x32xi1>
    %100 = arith.select %99, %90, %25 : vector<8x32xi1>, vector<8x32xf32>
    %cst_40 = arith.constant 0.000000e+00 : f32
    %101 = vector.shape_cast %92 : vector<8x1xi1> to vector<8x1xi1>
    %102 = vector.broadcast %101 : vector<8x1xi1> to vector<8x32xi1>
    %103 = vector.broadcast %cst_40 : f32 to vector<8x32xf32>
    %104 = arith.select %102, %97, %103 : vector<8x32xi1>, vector<8x32xf32>
    %105 = arith.index_cast %c0_i32 : i32 to index
    %c0_41 = arith.constant 0 : index
    %c0_42 = arith.constant 0 : index
    %106 = vector.load %arg19[%105, %c0_41, %c0_42] : memref<8x8x32xf32, #tpu.memory_space<vmem>>, vector<1x8x32xf32>
    %107 = vector.shape_cast %106 : vector<1x8x32xf32> to vector<8x32xf32>
    %108 = vector.shape_cast %104 : vector<8x32xf32> to vector<1x8x32xf32>
    tpu.vector_store %arg19[%105, %c0_41, %c0_42], %108 {strides = array<i32>} : memref<8x8x32xf32, #tpu.memory_space<vmem>>, vector<1x8x32xf32>,
    %cst_43 = arith.constant 0.000000e+00 : f32
    %109 = vector.shape_cast %94 : vector<8x1xi1> to vector<8x1xi1>
    %110 = vector.broadcast %109 : vector<8x1xi1> to vector<8x32xi1>
    %111 = vector.broadcast %cst_43 : f32 to vector<8x32xf32>
    %112 = arith.select %110, %100, %111 : vector<8x32xi1>, vector<8x32xf32>
    %113 = arith.index_cast %26 : i32 to index
    %c0_44 = arith.constant 0 : index
    %c0_45 = arith.constant 0 : index
    %114 = vector.load %arg20[%113, %c0_44, %c0_45] : memref<8x8x32xf32, #tpu.memory_space<vmem>>, vector<1x8x32xf32>
    %115 = vector.shape_cast %114 : vector<1x8x32xf32> to vector<8x32xf32>
    %116 = vector.shape_cast %112 : vector<8x32xf32> to vector<1x8x32xf32>
    tpu.vector_store %arg20[%113, %c0_44, %c0_45], %116 {strides = array<i32>} : memref<8x8x32xf32, #tpu.memory_space<vmem>>, vector<1x8x32xf32>,
    %c1_i32 = arith.constant 1 : i32
    %c7_i32_46 = arith.constant 7 : i32
    %117 = arith.subi %c7_i32_46, %c1_i32 : i32
    %118 = arith.index_cast %c1_i32 : i32 to index
    %c0_47 = arith.constant 0 : index
    %c0_48 = arith.constant 0 : index
    %119 = vector.load %arg17[%118, %c0_47, %c0_48] : memref<8x8x96xf32, #tpu.memory_space<vmem>>, vector<1x8x96xf32>
    %120 = vector.shape_cast %119 : vector<1x8x96xf32> to vector<8x96xf32>
    %121 = arith.index_cast %117 : i32 to index
    %c0_49 = arith.constant 0 : index
    %c0_50 = arith.constant 0 : index
    %122 = vector.load %arg18[%121, %c0_49, %c0_50] : memref<8x8x96xf32, #tpu.memory_space<vmem>>, vector<1x8x96xf32>
    %123 = vector.shape_cast %122 : vector<1x8x96xf32> to vector<8x96xf32>
    %124 = arith.truncf %97 : vector<8x32xf32> to vector<8x32xbf16>
    %cst_51 = arith.constant dense<0.000000e+00> : vector<8x96xf32>
    %125 = tpu.matmul %124, %23, %cst_51 {dimension_numbers = #tpu.dot_dimension_numbers<[1], [0], [0], [1], [0, 0, 1, 1], [], []>} : vector<8x32xbf16>, vector<32x96xbf16>, vector<8x96xf32> -> vector<8x96xf32>
    %126 = arith.addf %125, %19 : vector<8x96xf32>
    %127 = arith.truncf %100 : vector<8x32xf32> to vector<8x32xbf16>
    %cst_52 = arith.constant dense<0.000000e+00> : vector<8x96xf32>
    %128 = tpu.matmul %127, %24, %cst_52 {dimension_numbers = #tpu.dot_dimension_numbers<[1], [0], [0], [1], [0, 0, 1, 1], [], []>} : vector<8x32xbf16>, vector<32x96xbf16>, vector<8x96xf32> -> vector<8x96xf32>
    %129 = arith.addf %128, %22 : vector<8x96xf32>
    %130 = vector.extract_strided_slice %120 {offsets = [0, 0], sizes = [8, 32], strides = [1, 1]} : vector<8x96xf32> to vector<8x32xf32>
    %131 = vector.extract_strided_slice %126 {offsets = [0, 0], sizes = [8, 32], strides = [1, 1]} : vector<8x96xf32> to vector<8x32xf32>
    %132 = arith.addf %130, %131 : vector<8x32xf32>
    %133 = arith.negf %132 : vector<8x32xf32>
    %134 = math.exp %133 : vector<8x32xf32>
    %cst_53 = arith.constant 1.000000e+00 : f32
    %135 = vector.broadcast %cst_53 : f32 to vector<8x32xf32>
    %136 = arith.addf %135, %134 : vector<8x32xf32>
    %137 = arith.divf %135, %136 : vector<8x32xf32>
    %138 = vector.extract_strided_slice %120 {offsets = [0, 32], sizes = [8, 32], strides = [1, 1]} : vector<8x96xf32> to vector<8x32xf32>
    %139 = vector.extract_strided_slice %126 {offsets = [0, 32], sizes = [8, 32], strides = [1, 1]} : vector<8x96xf32> to vector<8x32xf32>
    %140 = arith.addf %138, %139 : vector<8x32xf32>
    %141 = arith.negf %140 : vector<8x32xf32>
    %142 = math.exp %141 : vector<8x32xf32>
    %cst_54 = arith.constant 1.000000e+00 : f32
    %143 = vector.broadcast %cst_54 : f32 to vector<8x32xf32>
    %144 = arith.addf %143, %142 : vector<8x32xf32>
    %145 = arith.divf %143, %144 : vector<8x32xf32>
    %146 = vector.extract_strided_slice %120 {offsets = [0, 64], sizes = [8, 32], strides = [1, 1]} : vector<8x96xf32> to vector<8x32xf32>
    %147 = vector.extract_strided_slice %126 {offsets = [0, 64], sizes = [8, 32], strides = [1, 1]} : vector<8x96xf32> to vector<8x32xf32>
    %148 = arith.mulf %137, %147 : vector<8x32xf32>
    %149 = arith.addf %146, %148 : vector<8x32xf32>
    %150 = math.tanh %149 : vector<8x32xf32>
    %151 = vector.extract_strided_slice %123 {offsets = [0, 0], sizes = [8, 32], strides = [1, 1]} : vector<8x96xf32> to vector<8x32xf32>
    %152 = vector.extract_strided_slice %129 {offsets = [0, 0], sizes = [8, 32], strides = [1, 1]} : vector<8x96xf32> to vector<8x32xf32>
    %153 = arith.addf %151, %152 : vector<8x32xf32>
    %154 = arith.negf %153 : vector<8x32xf32>
    %155 = math.exp %154 : vector<8x32xf32>
    %cst_55 = arith.constant 1.000000e+00 : f32
    %156 = vector.broadcast %cst_55 : f32 to vector<8x32xf32>
    %157 = arith.addf %156, %155 : vector<8x32xf32>
    %158 = arith.divf %156, %157 : vector<8x32xf32>
    %159 = vector.extract_strided_slice %123 {offsets = [0, 32], sizes = [8, 32], strides = [1, 1]} : vector<8x96xf32> to vector<8x32xf32>
    %160 = vector.extract_strided_slice %129 {offsets = [0, 32], sizes = [8, 32], strides = [1, 1]} : vector<8x96xf32> to vector<8x32xf32>
    %161 = arith.addf %159, %160 : vector<8x32xf32>
    %162 = arith.negf %161 : vector<8x32xf32>
    %163 = math.exp %162 : vector<8x32xf32>
    %cst_56 = arith.constant 1.000000e+00 : f32
    %164 = vector.broadcast %cst_56 : f32 to vector<8x32xf32>
    %165 = arith.addf %164, %163 : vector<8x32xf32>
    %166 = arith.divf %164, %165 : vector<8x32xf32>
    %167 = vector.extract_strided_slice %123 {offsets = [0, 64], sizes = [8, 32], strides = [1, 1]} : vector<8x96xf32> to vector<8x32xf32>
    %168 = vector.extract_strided_slice %129 {offsets = [0, 64], sizes = [8, 32], strides = [1, 1]} : vector<8x96xf32> to vector<8x32xf32>
    %169 = arith.mulf %158, %168 : vector<8x32xf32>
    %170 = arith.addf %167, %169 : vector<8x32xf32>
    %171 = math.tanh %170 : vector<8x32xf32>
    %cst_57 = arith.constant 1.000000e+00 : f32
    %172 = vector.broadcast %cst_57 : f32 to vector<8x32xf32>
    %173 = arith.subf %172, %145 : vector<8x32xf32>
    %174 = arith.mulf %173, %150 : vector<8x32xf32>
    %175 = arith.mulf %145, %97 : vector<8x32xf32>
    %176 = arith.addf %174, %175 : vector<8x32xf32>
    %cst_58 = arith.constant 1.000000e+00 : f32
    %177 = vector.broadcast %cst_58 : f32 to vector<8x32xf32>
    %178 = arith.subf %177, %166 : vector<8x32xf32>
    %179 = arith.mulf %178, %171 : vector<8x32xf32>
    %180 = arith.mulf %166, %100 : vector<8x32xf32>
    %181 = arith.addf %179, %180 : vector<8x32xf32>
    %182 = vector.broadcast %c1_i32 : i32 to vector<8x1xi32>
    %183 = arith.cmpi slt, %182, %16 : vector<8x1xi32>
    %184 = vector.broadcast %117 : i32 to vector<8x1xi32>
    %185 = arith.cmpi slt, %184, %16 : vector<8x1xi32>
    %186 = vector.shape_cast %183 : vector<8x1xi1> to vector<8x1xi1>
    %187 = vector.broadcast %186 : vector<8x1xi1> to vector<8x32xi1>
    %188 = arith.select %187, %176, %97 : vector<8x32xi1>, vector<8x32xf32>
    %189 = vector.shape_cast %185 : vector<8x1xi1> to vector<8x1xi1>
    %190 = vector.broadcast %189 : vector<8x1xi1> to vector<8x32xi1>
    %191 = arith.select %190, %181, %100 : vector<8x32xi1>, vector<8x32xf32>
    %cst_59 = arith.constant 0.000000e+00 : f32
    %192 = vector.shape_cast %183 : vector<8x1xi1> to vector<8x1xi1>
    %193 = vector.broadcast %192 : vector<8x1xi1> to vector<8x32xi1>
    %194 = vector.broadcast %cst_59 : f32 to vector<8x32xf32>
    %195 = arith.select %193, %188, %194 : vector<8x32xi1>, vector<8x32xf32>
    %196 = arith.index_cast %c1_i32 : i32 to index
    %c0_60 = arith.constant 0 : index
    %c0_61 = arith.constant 0 : index
    %197 = vector.load %arg19[%196, %c0_60, %c0_61] : memref<8x8x32xf32, #tpu.memory_space<vmem>>, vector<1x8x32xf32>
    %198 = vector.shape_cast %197 : vector<1x8x32xf32> to vector<8x32xf32>
    %199 = vector.shape_cast %195 : vector<8x32xf32> to vector<1x8x32xf32>
    tpu.vector_store %arg19[%196, %c0_60, %c0_61], %199 {strides = array<i32>} : memref<8x8x32xf32, #tpu.memory_space<vmem>>, vector<1x8x32xf32>,
    %cst_62 = arith.constant 0.000000e+00 : f32
    %200 = vector.shape_cast %185 : vector<8x1xi1> to vector<8x1xi1>
    %201 = vector.broadcast %200 : vector<8x1xi1> to vector<8x32xi1>
    %202 = vector.broadcast %cst_62 : f32 to vector<8x32xf32>
    %203 = arith.select %201, %191, %202 : vector<8x32xi1>, vector<8x32xf32>
    %204 = arith.index_cast %117 : i32 to index
    %c0_63 = arith.constant 0 : index
    %c0_64 = arith.constant 0 : index
    %205 = vector.load %arg20[%204, %c0_63, %c0_64] : memref<8x8x32xf32, #tpu.memory_space<vmem>>, vector<1x8x32xf32>
    %206 = vector.shape_cast %205 : vector<1x8x32xf32> to vector<8x32xf32>
    %207 = vector.shape_cast %203 : vector<8x32xf32> to vector<1x8x32xf32>
    tpu.vector_store %arg20[%204, %c0_63, %c0_64], %207 {strides = array<i32>} : memref<8x8x32xf32, #tpu.memory_space<vmem>>, vector<1x8x32xf32>,
    %c2_i32 = arith.constant 2 : i32
    %c7_i32_65 = arith.constant 7 : i32
    %208 = arith.subi %c7_i32_65, %c2_i32 : i32
    %209 = arith.index_cast %c2_i32 : i32 to index
    %c0_66 = arith.constant 0 : index
    %c0_67 = arith.constant 0 : index
    %210 = vector.load %arg17[%209, %c0_66, %c0_67] : memref<8x8x96xf32, #tpu.memory_space<vmem>>, vector<1x8x96xf32>
    %211 = vector.shape_cast %210 : vector<1x8x96xf32> to vector<8x96xf32>
    %212 = arith.index_cast %208 : i32 to index
    %c0_68 = arith.constant 0 : index
    %c0_69 = arith.constant 0 : index
    %213 = vector.load %arg18[%212, %c0_68, %c0_69] : memref<8x8x96xf32, #tpu.memory_space<vmem>>, vector<1x8x96xf32>
    %214 = vector.shape_cast %213 : vector<1x8x96xf32> to vector<8x96xf32>
    %215 = arith.truncf %188 : vector<8x32xf32> to vector<8x32xbf16>
    %cst_70 = arith.constant dense<0.000000e+00> : vector<8x96xf32>
    %216 = tpu.matmul %215, %23, %cst_70 {dimension_numbers = #tpu.dot_dimension_numbers<[1], [0], [0], [1], [0, 0, 1, 1], [], []>} : vector<8x32xbf16>, vector<32x96xbf16>, vector<8x96xf32> -> vector<8x96xf32>
    %217 = arith.addf %216, %19 : vector<8x96xf32>
    %218 = arith.truncf %191 : vector<8x32xf32> to vector<8x32xbf16>
    %cst_71 = arith.constant dense<0.000000e+00> : vector<8x96xf32>
    %219 = tpu.matmul %218, %24, %cst_71 {dimension_numbers = #tpu.dot_dimension_numbers<[1], [0], [0], [1], [0, 0, 1, 1], [], []>} : vector<8x32xbf16>, vector<32x96xbf16>, vector<8x96xf32> -> vector<8x96xf32>
    %220 = arith.addf %219, %22 : vector<8x96xf32>
    %221 = vector.extract_strided_slice %211 {offsets = [0, 0], sizes = [8, 32], strides = [1, 1]} : vector<8x96xf32> to vector<8x32xf32>
    %222 = vector.extract_strided_slice %217 {offsets = [0, 0], sizes = [8, 32], strides = [1, 1]} : vector<8x96xf32> to vector<8x32xf32>
    %223 = arith.addf %221, %222 : vector<8x32xf32>
    %224 = arith.negf %223 : vector<8x32xf32>
    %225 = math.exp %224 : vector<8x32xf32>
    %cst_72 = arith.constant 1.000000e+00 : f32
    %226 = vector.broadcast %cst_72 : f32 to vector<8x32xf32>
    %227 = arith.addf %226, %225 : vector<8x32xf32>
    %228 = arith.divf %226, %227 : vector<8x32xf32>
    %229 = vector.extract_strided_slice %211 {offsets = [0, 32], sizes = [8, 32], strides = [1, 1]} : vector<8x96xf32> to vector<8x32xf32>
    %230 = vector.extract_strided_slice %217 {offsets = [0, 32], sizes = [8, 32], strides = [1, 1]} : vector<8x96xf32> to vector<8x32xf32>
    %231 = arith.addf %229, %230 : vector<8x32xf32>
    %232 = arith.negf %231 : vector<8x32xf32>
    %233 = math.exp %232 : vector<8x32xf32>
    %cst_73 = arith.constant 1.000000e+00 : f32
    %234 = vector.broadcast %cst_73 : f32 to vector<8x32xf32>
    %235 = arith.addf %234, %233 : vector<8x32xf32>
    %236 = arith.divf %234, %235 : vector<8x32xf32>
    %237 = vector.extract_strided_slice %211 {offsets = [0, 64], sizes = [8, 32], strides = [1, 1]} : vector<8x96xf32> to vector<8x32xf32>
    %238 = vector.extract_strided_slice %217 {offsets = [0, 64], sizes = [8, 32], strides = [1, 1]} : vector<8x96xf32> to vector<8x32xf32>
    %239 = arith.mulf %228, %238 : vector<8x32xf32>
    %240 = arith.addf %237, %239 : vector<8x32xf32>
    %241 = math.tanh %240 : vector<8x32xf32>
    %242 = vector.extract_strided_slice %214 {offsets = [0, 0], sizes = [8, 32], strides = [1, 1]} : vector<8x96xf32> to vector<8x32xf32>
    %243 = vector.extract_strided_slice %220 {offsets = [0, 0], sizes = [8, 32], strides = [1, 1]} : vector<8x96xf32> to vector<8x32xf32>
    %244 = arith.addf %242, %243 : vector<8x32xf32>
    %245 = arith.negf %244 : vector<8x32xf32>
    %246 = math.exp %245 : vector<8x32xf32>
    %cst_74 = arith.constant 1.000000e+00 : f32
    %247 = vector.broadcast %cst_74 : f32 to vector<8x32xf32>
    %248 = arith.addf %247, %246 : vector<8x32xf32>
    %249 = arith.divf %247, %248 : vector<8x32xf32>
    %250 = vector.extract_strided_slice %214 {offsets = [0, 32], sizes = [8, 32], strides = [1, 1]} : vector<8x96xf32> to vector<8x32xf32>
    %251 = vector.extract_strided_slice %220 {offsets = [0, 32], sizes = [8, 32], strides = [1, 1]} : vector<8x96xf32> to vector<8x32xf32>
    %252 = arith.addf %250, %251 : vector<8x32xf32>
    %253 = arith.negf %252 : vector<8x32xf32>
    %254 = math.exp %253 : vector<8x32xf32>
    %cst_75 = arith.constant 1.000000e+00 : f32
    %255 = vector.broadcast %cst_75 : f32 to vector<8x32xf32>
    %256 = arith.addf %255, %254 : vector<8x32xf32>
    %257 = arith.divf %255, %256 : vector<8x32xf32>
    %258 = vector.extract_strided_slice %214 {offsets = [0, 64], sizes = [8, 32], strides = [1, 1]} : vector<8x96xf32> to vector<8x32xf32>
    %259 = vector.extract_strided_slice %220 {offsets = [0, 64], sizes = [8, 32], strides = [1, 1]} : vector<8x96xf32> to vector<8x32xf32>
    %260 = arith.mulf %249, %259 : vector<8x32xf32>
    %261 = arith.addf %258, %260 : vector<8x32xf32>
    %262 = math.tanh %261 : vector<8x32xf32>
    %cst_76 = arith.constant 1.000000e+00 : f32
    %263 = vector.broadcast %cst_76 : f32 to vector<8x32xf32>
    %264 = arith.subf %263, %236 : vector<8x32xf32>
    %265 = arith.mulf %264, %241 : vector<8x32xf32>
    %266 = arith.mulf %236, %188 : vector<8x32xf32>
    %267 = arith.addf %265, %266 : vector<8x32xf32>
    %cst_77 = arith.constant 1.000000e+00 : f32
    %268 = vector.broadcast %cst_77 : f32 to vector<8x32xf32>
    %269 = arith.subf %268, %257 : vector<8x32xf32>
    %270 = arith.mulf %269, %262 : vector<8x32xf32>
    %271 = arith.mulf %257, %191 : vector<8x32xf32>
    %272 = arith.addf %270, %271 : vector<8x32xf32>
    %273 = vector.broadcast %c2_i32 : i32 to vector<8x1xi32>
    %274 = arith.cmpi slt, %273, %16 : vector<8x1xi32>
    %275 = vector.broadcast %208 : i32 to vector<8x1xi32>
    %276 = arith.cmpi slt, %275, %16 : vector<8x1xi32>
    %277 = vector.shape_cast %274 : vector<8x1xi1> to vector<8x1xi1>
    %278 = vector.broadcast %277 : vector<8x1xi1> to vector<8x32xi1>
    %279 = arith.select %278, %267, %188 : vector<8x32xi1>, vector<8x32xf32>
    %280 = vector.shape_cast %276 : vector<8x1xi1> to vector<8x1xi1>
    %281 = vector.broadcast %280 : vector<8x1xi1> to vector<8x32xi1>
    %282 = arith.select %281, %272, %191 : vector<8x32xi1>, vector<8x32xf32>
    %cst_78 = arith.constant 0.000000e+00 : f32
    %283 = vector.shape_cast %274 : vector<8x1xi1> to vector<8x1xi1>
    %284 = vector.broadcast %283 : vector<8x1xi1> to vector<8x32xi1>
    %285 = vector.broadcast %cst_78 : f32 to vector<8x32xf32>
    %286 = arith.select %284, %279, %285 : vector<8x32xi1>, vector<8x32xf32>
    %287 = arith.index_cast %c2_i32 : i32 to index
    %c0_79 = arith.constant 0 : index
    %c0_80 = arith.constant 0 : index
    %288 = vector.load %arg19[%287, %c0_79, %c0_80] : memref<8x8x32xf32, #tpu.memory_space<vmem>>, vector<1x8x32xf32>
    %289 = vector.shape_cast %288 : vector<1x8x32xf32> to vector<8x32xf32>
    %290 = vector.shape_cast %286 : vector<8x32xf32> to vector<1x8x32xf32>
    tpu.vector_store %arg19[%287, %c0_79, %c0_80], %290 {strides = array<i32>} : memref<8x8x32xf32, #tpu.memory_space<vmem>>, vector<1x8x32xf32>,
    %cst_81 = arith.constant 0.000000e+00 : f32
    %291 = vector.shape_cast %276 : vector<8x1xi1> to vector<8x1xi1>
    %292 = vector.broadcast %291 : vector<8x1xi1> to vector<8x32xi1>
    %293 = vector.broadcast %cst_81 : f32 to vector<8x32xf32>
    %294 = arith.select %292, %282, %293 : vector<8x32xi1>, vector<8x32xf32>
    %295 = arith.index_cast %208 : i32 to index
    %c0_82 = arith.constant 0 : index
    %c0_83 = arith.constant 0 : index
    %296 = vector.load %arg20[%295, %c0_82, %c0_83] : memref<8x8x32xf32, #tpu.memory_space<vmem>>, vector<1x8x32xf32>
    %297 = vector.shape_cast %296 : vector<1x8x32xf32> to vector<8x32xf32>
    %298 = vector.shape_cast %294 : vector<8x32xf32> to vector<1x8x32xf32>
    tpu.vector_store %arg20[%295, %c0_82, %c0_83], %298 {strides = array<i32>} : memref<8x8x32xf32, #tpu.memory_space<vmem>>, vector<1x8x32xf32>,
    %c3_i32 = arith.constant 3 : i32
    %c7_i32_84 = arith.constant 7 : i32
    %299 = arith.subi %c7_i32_84, %c3_i32 : i32
    %300 = arith.index_cast %c3_i32 : i32 to index
    %c0_85 = arith.constant 0 : index
    %c0_86 = arith.constant 0 : index
    %301 = vector.load %arg17[%300, %c0_85, %c0_86] : memref<8x8x96xf32, #tpu.memory_space<vmem>>, vector<1x8x96xf32>
    %302 = vector.shape_cast %301 : vector<1x8x96xf32> to vector<8x96xf32>
    %303 = arith.index_cast %299 : i32 to index
    %c0_87 = arith.constant 0 : index
    %c0_88 = arith.constant 0 : index
    %304 = vector.load %arg18[%303, %c0_87, %c0_88] : memref<8x8x96xf32, #tpu.memory_space<vmem>>, vector<1x8x96xf32>
    %305 = vector.shape_cast %304 : vector<1x8x96xf32> to vector<8x96xf32>
    %306 = arith.truncf %279 : vector<8x32xf32> to vector<8x32xbf16>
    %cst_89 = arith.constant dense<0.000000e+00> : vector<8x96xf32>
    %307 = tpu.matmul %306, %23, %cst_89 {dimension_numbers = #tpu.dot_dimension_numbers<[1], [0], [0], [1], [0, 0, 1, 1], [], []>} : vector<8x32xbf16>, vector<32x96xbf16>, vector<8x96xf32> -> vector<8x96xf32>
    %308 = arith.addf %307, %19 : vector<8x96xf32>
    %309 = arith.truncf %282 : vector<8x32xf32> to vector<8x32xbf16>
    %cst_90 = arith.constant dense<0.000000e+00> : vector<8x96xf32>
    %310 = tpu.matmul %309, %24, %cst_90 {dimension_numbers = #tpu.dot_dimension_numbers<[1], [0], [0], [1], [0, 0, 1, 1], [], []>} : vector<8x32xbf16>, vector<32x96xbf16>, vector<8x96xf32> -> vector<8x96xf32>
    %311 = arith.addf %310, %22 : vector<8x96xf32>
    %312 = vector.extract_strided_slice %302 {offsets = [0, 0], sizes = [8, 32], strides = [1, 1]} : vector<8x96xf32> to vector<8x32xf32>
    %313 = vector.extract_strided_slice %308 {offsets = [0, 0], sizes = [8, 32], strides = [1, 1]} : vector<8x96xf32> to vector<8x32xf32>
    %314 = arith.addf %312, %313 : vector<8x32xf32>
    %315 = arith.negf %314 : vector<8x32xf32>
    %316 = math.exp %315 : vector<8x32xf32>
    %cst_91 = arith.constant 1.000000e+00 : f32
    %317 = vector.broadcast %cst_91 : f32 to vector<8x32xf32>
    %318 = arith.addf %317, %316 : vector<8x32xf32>
    %319 = arith.divf %317, %318 : vector<8x32xf32>
    %320 = vector.extract_strided_slice %302 {offsets = [0, 32], sizes = [8, 32], strides = [1, 1]} : vector<8x96xf32> to vector<8x32xf32>
    %321 = vector.extract_strided_slice %308 {offsets = [0, 32], sizes = [8, 32], strides = [1, 1]} : vector<8x96xf32> to vector<8x32xf32>
    %322 = arith.addf %320, %321 : vector<8x32xf32>
    %323 = arith.negf %322 : vector<8x32xf32>
    %324 = math.exp %323 : vector<8x32xf32>
    %cst_92 = arith.constant 1.000000e+00 : f32
    %325 = vector.broadcast %cst_92 : f32 to vector<8x32xf32>
    %326 = arith.addf %325, %324 : vector<8x32xf32>
    %327 = arith.divf %325, %326 : vector<8x32xf32>
    %328 = vector.extract_strided_slice %302 {offsets = [0, 64], sizes = [8, 32], strides = [1, 1]} : vector<8x96xf32> to vector<8x32xf32>
    %329 = vector.extract_strided_slice %308 {offsets = [0, 64], sizes = [8, 32], strides = [1, 1]} : vector<8x96xf32> to vector<8x32xf32>
    %330 = arith.mulf %319, %329 : vector<8x32xf32>
    %331 = arith.addf %328, %330 : vector<8x32xf32>
    %332 = math.tanh %331 : vector<8x32xf32>
    %333 = vector.extract_strided_slice %305 {offsets = [0, 0], sizes = [8, 32], strides = [1, 1]} : vector<8x96xf32> to vector<8x32xf32>
    %334 = vector.extract_strided_slice %311 {offsets = [0, 0], sizes = [8, 32], strides = [1, 1]} : vector<8x96xf32> to vector<8x32xf32>
    %335 = arith.addf %333, %334 : vector<8x32xf32>
    %336 = arith.negf %335 : vector<8x32xf32>
    %337 = math.exp %336 : vector<8x32xf32>
    %cst_93 = arith.constant 1.000000e+00 : f32
    %338 = vector.broadcast %cst_93 : f32 to vector<8x32xf32>
    %339 = arith.addf %338, %337 : vector<8x32xf32>
    %340 = arith.divf %338, %339 : vector<8x32xf32>
    %341 = vector.extract_strided_slice %305 {offsets = [0, 32], sizes = [8, 32], strides = [1, 1]} : vector<8x96xf32> to vector<8x32xf32>
    %342 = vector.extract_strided_slice %311 {offsets = [0, 32], sizes = [8, 32], strides = [1, 1]} : vector<8x96xf32> to vector<8x32xf32>
    %343 = arith.addf %341, %342 : vector<8x32xf32>
    %344 = arith.negf %343 : vector<8x32xf32>
    %345 = math.exp %344 : vector<8x32xf32>
    %cst_94 = arith.constant 1.000000e+00 : f32
    %346 = vector.broadcast %cst_94 : f32 to vector<8x32xf32>
    %347 = arith.addf %346, %345 : vector<8x32xf32>
    %348 = arith.divf %346, %347 : vector<8x32xf32>
    %349 = vector.extract_strided_slice %305 {offsets = [0, 64], sizes = [8, 32], strides = [1, 1]} : vector<8x96xf32> to vector<8x32xf32>
    %350 = vector.extract_strided_slice %311 {offsets = [0, 64], sizes = [8, 32], strides = [1, 1]} : vector<8x96xf32> to vector<8x32xf32>
    %351 = arith.mulf %340, %350 : vector<8x32xf32>
    %352 = arith.addf %349, %351 : vector<8x32xf32>
    %353 = math.tanh %352 : vector<8x32xf32>
    %cst_95 = arith.constant 1.000000e+00 : f32
    %354 = vector.broadcast %cst_95 : f32 to vector<8x32xf32>
    %355 = arith.subf %354, %327 : vector<8x32xf32>
    %356 = arith.mulf %355, %332 : vector<8x32xf32>
    %357 = arith.mulf %327, %279 : vector<8x32xf32>
    %358 = arith.addf %356, %357 : vector<8x32xf32>
    %cst_96 = arith.constant 1.000000e+00 : f32
    %359 = vector.broadcast %cst_96 : f32 to vector<8x32xf32>
    %360 = arith.subf %359, %348 : vector<8x32xf32>
    %361 = arith.mulf %360, %353 : vector<8x32xf32>
    %362 = arith.mulf %348, %282 : vector<8x32xf32>
    %363 = arith.addf %361, %362 : vector<8x32xf32>
    %364 = vector.broadcast %c3_i32 : i32 to vector<8x1xi32>
    %365 = arith.cmpi slt, %364, %16 : vector<8x1xi32>
    %366 = vector.broadcast %299 : i32 to vector<8x1xi32>
    %367 = arith.cmpi slt, %366, %16 : vector<8x1xi32>
    %368 = vector.shape_cast %365 : vector<8x1xi1> to vector<8x1xi1>
    %369 = vector.broadcast %368 : vector<8x1xi1> to vector<8x32xi1>
    %370 = arith.select %369, %358, %279 : vector<8x32xi1>, vector<8x32xf32>
    %371 = vector.shape_cast %367 : vector<8x1xi1> to vector<8x1xi1>
    %372 = vector.broadcast %371 : vector<8x1xi1> to vector<8x32xi1>
    %373 = arith.select %372, %363, %282 : vector<8x32xi1>, vector<8x32xf32>
    %cst_97 = arith.constant 0.000000e+00 : f32
    %374 = vector.shape_cast %365 : vector<8x1xi1> to vector<8x1xi1>
    %375 = vector.broadcast %374 : vector<8x1xi1> to vector<8x32xi1>
    %376 = vector.broadcast %cst_97 : f32 to vector<8x32xf32>
    %377 = arith.select %375, %370, %376 : vector<8x32xi1>, vector<8x32xf32>
    %378 = arith.index_cast %c3_i32 : i32 to index
    %c0_98 = arith.constant 0 : index
    %c0_99 = arith.constant 0 : index
    %379 = vector.load %arg19[%378, %c0_98, %c0_99] : memref<8x8x32xf32, #tpu.memory_space<vmem>>, vector<1x8x32xf32>
    %380 = vector.shape_cast %379 : vector<1x8x32xf32> to vector<8x32xf32>
    %381 = vector.shape_cast %377 : vector<8x32xf32> to vector<1x8x32xf32>
    tpu.vector_store %arg19[%378, %c0_98, %c0_99], %381 {strides = array<i32>} : memref<8x8x32xf32, #tpu.memory_space<vmem>>, vector<1x8x32xf32>,
    %cst_100 = arith.constant 0.000000e+00 : f32
    %382 = vector.shape_cast %367 : vector<8x1xi1> to vector<8x1xi1>
    %383 = vector.broadcast %382 : vector<8x1xi1> to vector<8x32xi1>
    %384 = vector.broadcast %cst_100 : f32 to vector<8x32xf32>
    %385 = arith.select %383, %373, %384 : vector<8x32xi1>, vector<8x32xf32>
    %386 = arith.index_cast %299 : i32 to index
    %c0_101 = arith.constant 0 : index
    %c0_102 = arith.constant 0 : index
    %387 = vector.load %arg20[%386, %c0_101, %c0_102] : memref<8x8x32xf32, #tpu.memory_space<vmem>>, vector<1x8x32xf32>
    %388 = vector.shape_cast %387 : vector<1x8x32xf32> to vector<8x32xf32>
    %389 = vector.shape_cast %385 : vector<8x32xf32> to vector<1x8x32xf32>
    tpu.vector_store %arg20[%386, %c0_101, %c0_102], %389 {strides = array<i32>} : memref<8x8x32xf32, #tpu.memory_space<vmem>>, vector<1x8x32xf32>,
    %c4_i32 = arith.constant 4 : i32
    %c7_i32_103 = arith.constant 7 : i32
    %390 = arith.subi %c7_i32_103, %c4_i32 : i32
    %391 = arith.index_cast %c4_i32 : i32 to index
    %c0_104 = arith.constant 0 : index
    %c0_105 = arith.constant 0 : index
    %392 = vector.load %arg17[%391, %c0_104, %c0_105] : memref<8x8x96xf32, #tpu.memory_space<vmem>>, vector<1x8x96xf32>
    %393 = vector.shape_cast %392 : vector<1x8x96xf32> to vector<8x96xf32>
    %394 = arith.index_cast %390 : i32 to index
    %c0_106 = arith.constant 0 : index
    %c0_107 = arith.constant 0 : index
    %395 = vector.load %arg18[%394, %c0_106, %c0_107] : memref<8x8x96xf32, #tpu.memory_space<vmem>>, vector<1x8x96xf32>
    %396 = vector.shape_cast %395 : vector<1x8x96xf32> to vector<8x96xf32>
    %397 = arith.truncf %370 : vector<8x32xf32> to vector<8x32xbf16>
    %cst_108 = arith.constant dense<0.000000e+00> : vector<8x96xf32>
    %398 = tpu.matmul %397, %23, %cst_108 {dimension_numbers = #tpu.dot_dimension_numbers<[1], [0], [0], [1], [0, 0, 1, 1], [], []>} : vector<8x32xbf16>, vector<32x96xbf16>, vector<8x96xf32> -> vector<8x96xf32>
    %399 = arith.addf %398, %19 : vector<8x96xf32>
    %400 = arith.truncf %373 : vector<8x32xf32> to vector<8x32xbf16>
    %cst_109 = arith.constant dense<0.000000e+00> : vector<8x96xf32>
    %401 = tpu.matmul %400, %24, %cst_109 {dimension_numbers = #tpu.dot_dimension_numbers<[1], [0], [0], [1], [0, 0, 1, 1], [], []>} : vector<8x32xbf16>, vector<32x96xbf16>, vector<8x96xf32> -> vector<8x96xf32>
    %402 = arith.addf %401, %22 : vector<8x96xf32>
    %403 = vector.extract_strided_slice %393 {offsets = [0, 0], sizes = [8, 32], strides = [1, 1]} : vector<8x96xf32> to vector<8x32xf32>
    %404 = vector.extract_strided_slice %399 {offsets = [0, 0], sizes = [8, 32], strides = [1, 1]} : vector<8x96xf32> to vector<8x32xf32>
    %405 = arith.addf %403, %404 : vector<8x32xf32>
    %406 = arith.negf %405 : vector<8x32xf32>
    %407 = math.exp %406 : vector<8x32xf32>
    %cst_110 = arith.constant 1.000000e+00 : f32
    %408 = vector.broadcast %cst_110 : f32 to vector<8x32xf32>
    %409 = arith.addf %408, %407 : vector<8x32xf32>
    %410 = arith.divf %408, %409 : vector<8x32xf32>
    %411 = vector.extract_strided_slice %393 {offsets = [0, 32], sizes = [8, 32], strides = [1, 1]} : vector<8x96xf32> to vector<8x32xf32>
    %412 = vector.extract_strided_slice %399 {offsets = [0, 32], sizes = [8, 32], strides = [1, 1]} : vector<8x96xf32> to vector<8x32xf32>
    %413 = arith.addf %411, %412 : vector<8x32xf32>
    %414 = arith.negf %413 : vector<8x32xf32>
    %415 = math.exp %414 : vector<8x32xf32>
    %cst_111 = arith.constant 1.000000e+00 : f32
    %416 = vector.broadcast %cst_111 : f32 to vector<8x32xf32>
    %417 = arith.addf %416, %415 : vector<8x32xf32>
    %418 = arith.divf %416, %417 : vector<8x32xf32>
    %419 = vector.extract_strided_slice %393 {offsets = [0, 64], sizes = [8, 32], strides = [1, 1]} : vector<8x96xf32> to vector<8x32xf32>
    %420 = vector.extract_strided_slice %399 {offsets = [0, 64], sizes = [8, 32], strides = [1, 1]} : vector<8x96xf32> to vector<8x32xf32>
    %421 = arith.mulf %410, %420 : vector<8x32xf32>
    %422 = arith.addf %419, %421 : vector<8x32xf32>
    %423 = math.tanh %422 : vector<8x32xf32>
    %424 = vector.extract_strided_slice %396 {offsets = [0, 0], sizes = [8, 32], strides = [1, 1]} : vector<8x96xf32> to vector<8x32xf32>
    %425 = vector.extract_strided_slice %402 {offsets = [0, 0], sizes = [8, 32], strides = [1, 1]} : vector<8x96xf32> to vector<8x32xf32>
    %426 = arith.addf %424, %425 : vector<8x32xf32>
    %427 = arith.negf %426 : vector<8x32xf32>
    %428 = math.exp %427 : vector<8x32xf32>
    %cst_112 = arith.constant 1.000000e+00 : f32
    %429 = vector.broadcast %cst_112 : f32 to vector<8x32xf32>
    %430 = arith.addf %429, %428 : vector<8x32xf32>
    %431 = arith.divf %429, %430 : vector<8x32xf32>
    %432 = vector.extract_strided_slice %396 {offsets = [0, 32], sizes = [8, 32], strides = [1, 1]} : vector<8x96xf32> to vector<8x32xf32>
    %433 = vector.extract_strided_slice %402 {offsets = [0, 32], sizes = [8, 32], strides = [1, 1]} : vector<8x96xf32> to vector<8x32xf32>
    %434 = arith.addf %432, %433 : vector<8x32xf32>
    %435 = arith.negf %434 : vector<8x32xf32>
    %436 = math.exp %435 : vector<8x32xf32>
    %cst_113 = arith.constant 1.000000e+00 : f32
    %437 = vector.broadcast %cst_113 : f32 to vector<8x32xf32>
    %438 = arith.addf %437, %436 : vector<8x32xf32>
    %439 = arith.divf %437, %438 : vector<8x32xf32>
    %440 = vector.extract_strided_slice %396 {offsets = [0, 64], sizes = [8, 32], strides = [1, 1]} : vector<8x96xf32> to vector<8x32xf32>
    %441 = vector.extract_strided_slice %402 {offsets = [0, 64], sizes = [8, 32], strides = [1, 1]} : vector<8x96xf32> to vector<8x32xf32>
    %442 = arith.mulf %431, %441 : vector<8x32xf32>
    %443 = arith.addf %440, %442 : vector<8x32xf32>
    %444 = math.tanh %443 : vector<8x32xf32>
    %cst_114 = arith.constant 1.000000e+00 : f32
    %445 = vector.broadcast %cst_114 : f32 to vector<8x32xf32>
    %446 = arith.subf %445, %418 : vector<8x32xf32>
    %447 = arith.mulf %446, %423 : vector<8x32xf32>
    %448 = arith.mulf %418, %370 : vector<8x32xf32>
    %449 = arith.addf %447, %448 : vector<8x32xf32>
    %cst_115 = arith.constant 1.000000e+00 : f32
    %450 = vector.broadcast %cst_115 : f32 to vector<8x32xf32>
    %451 = arith.subf %450, %439 : vector<8x32xf32>
    %452 = arith.mulf %451, %444 : vector<8x32xf32>
    %453 = arith.mulf %439, %373 : vector<8x32xf32>
    %454 = arith.addf %452, %453 : vector<8x32xf32>
    %455 = vector.broadcast %c4_i32 : i32 to vector<8x1xi32>
    %456 = arith.cmpi slt, %455, %16 : vector<8x1xi32>
    %457 = vector.broadcast %390 : i32 to vector<8x1xi32>
    %458 = arith.cmpi slt, %457, %16 : vector<8x1xi32>
    %459 = vector.shape_cast %456 : vector<8x1xi1> to vector<8x1xi1>
    %460 = vector.broadcast %459 : vector<8x1xi1> to vector<8x32xi1>
    %461 = arith.select %460, %449, %370 : vector<8x32xi1>, vector<8x32xf32>
    %462 = vector.shape_cast %458 : vector<8x1xi1> to vector<8x1xi1>
    %463 = vector.broadcast %462 : vector<8x1xi1> to vector<8x32xi1>
    %464 = arith.select %463, %454, %373 : vector<8x32xi1>, vector<8x32xf32>
    %cst_116 = arith.constant 0.000000e+00 : f32
    %465 = vector.shape_cast %456 : vector<8x1xi1> to vector<8x1xi1>
    %466 = vector.broadcast %465 : vector<8x1xi1> to vector<8x32xi1>
    %467 = vector.broadcast %cst_116 : f32 to vector<8x32xf32>
    %468 = arith.select %466, %461, %467 : vector<8x32xi1>, vector<8x32xf32>
    %469 = arith.index_cast %c4_i32 : i32 to index
    %c0_117 = arith.constant 0 : index
    %c0_118 = arith.constant 0 : index
    %470 = vector.load %arg19[%469, %c0_117, %c0_118] : memref<8x8x32xf32, #tpu.memory_space<vmem>>, vector<1x8x32xf32>
    %471 = vector.shape_cast %470 : vector<1x8x32xf32> to vector<8x32xf32>
    %472 = vector.shape_cast %468 : vector<8x32xf32> to vector<1x8x32xf32>
    tpu.vector_store %arg19[%469, %c0_117, %c0_118], %472 {strides = array<i32>} : memref<8x8x32xf32, #tpu.memory_space<vmem>>, vector<1x8x32xf32>,
    %cst_119 = arith.constant 0.000000e+00 : f32
    %473 = vector.shape_cast %458 : vector<8x1xi1> to vector<8x1xi1>
    %474 = vector.broadcast %473 : vector<8x1xi1> to vector<8x32xi1>
    %475 = vector.broadcast %cst_119 : f32 to vector<8x32xf32>
    %476 = arith.select %474, %464, %475 : vector<8x32xi1>, vector<8x32xf32>
    %477 = arith.index_cast %390 : i32 to index
    %c0_120 = arith.constant 0 : index
    %c0_121 = arith.constant 0 : index
    %478 = vector.load %arg20[%477, %c0_120, %c0_121] : memref<8x8x32xf32, #tpu.memory_space<vmem>>, vector<1x8x32xf32>
    %479 = vector.shape_cast %478 : vector<1x8x32xf32> to vector<8x32xf32>
    %480 = vector.shape_cast %476 : vector<8x32xf32> to vector<1x8x32xf32>
    tpu.vector_store %arg20[%477, %c0_120, %c0_121], %480 {strides = array<i32>} : memref<8x8x32xf32, #tpu.memory_space<vmem>>, vector<1x8x32xf32>,
    %c5_i32 = arith.constant 5 : i32
    %c7_i32_122 = arith.constant 7 : i32
    %481 = arith.subi %c7_i32_122, %c5_i32 : i32
    %482 = arith.index_cast %c5_i32 : i32 to index
    %c0_123 = arith.constant 0 : index
    %c0_124 = arith.constant 0 : index
    %483 = vector.load %arg17[%482, %c0_123, %c0_124] : memref<8x8x96xf32, #tpu.memory_space<vmem>>, vector<1x8x96xf32>
    %484 = vector.shape_cast %483 : vector<1x8x96xf32> to vector<8x96xf32>
    %485 = arith.index_cast %481 : i32 to index
    %c0_125 = arith.constant 0 : index
    %c0_126 = arith.constant 0 : index
    %486 = vector.load %arg18[%485, %c0_125, %c0_126] : memref<8x8x96xf32, #tpu.memory_space<vmem>>, vector<1x8x96xf32>
    %487 = vector.shape_cast %486 : vector<1x8x96xf32> to vector<8x96xf32>
    %488 = arith.truncf %461 : vector<8x32xf32> to vector<8x32xbf16>
    %cst_127 = arith.constant dense<0.000000e+00> : vector<8x96xf32>
    %489 = tpu.matmul %488, %23, %cst_127 {dimension_numbers = #tpu.dot_dimension_numbers<[1], [0], [0], [1], [0, 0, 1, 1], [], []>} : vector<8x32xbf16>, vector<32x96xbf16>, vector<8x96xf32> -> vector<8x96xf32>
    %490 = arith.addf %489, %19 : vector<8x96xf32>
    %491 = arith.truncf %464 : vector<8x32xf32> to vector<8x32xbf16>
    %cst_128 = arith.constant dense<0.000000e+00> : vector<8x96xf32>
    %492 = tpu.matmul %491, %24, %cst_128 {dimension_numbers = #tpu.dot_dimension_numbers<[1], [0], [0], [1], [0, 0, 1, 1], [], []>} : vector<8x32xbf16>, vector<32x96xbf16>, vector<8x96xf32> -> vector<8x96xf32>
    %493 = arith.addf %492, %22 : vector<8x96xf32>
    %494 = vector.extract_strided_slice %484 {offsets = [0, 0], sizes = [8, 32], strides = [1, 1]} : vector<8x96xf32> to vector<8x32xf32>
    %495 = vector.extract_strided_slice %490 {offsets = [0, 0], sizes = [8, 32], strides = [1, 1]} : vector<8x96xf32> to vector<8x32xf32>
    %496 = arith.addf %494, %495 : vector<8x32xf32>
    %497 = arith.negf %496 : vector<8x32xf32>
    %498 = math.exp %497 : vector<8x32xf32>
    %cst_129 = arith.constant 1.000000e+00 : f32
    %499 = vector.broadcast %cst_129 : f32 to vector<8x32xf32>
    %500 = arith.addf %499, %498 : vector<8x32xf32>
    %501 = arith.divf %499, %500 : vector<8x32xf32>
    %502 = vector.extract_strided_slice %484 {offsets = [0, 32], sizes = [8, 32], strides = [1, 1]} : vector<8x96xf32> to vector<8x32xf32>
    %503 = vector.extract_strided_slice %490 {offsets = [0, 32], sizes = [8, 32], strides = [1, 1]} : vector<8x96xf32> to vector<8x32xf32>
    %504 = arith.addf %502, %503 : vector<8x32xf32>
    %505 = arith.negf %504 : vector<8x32xf32>
    %506 = math.exp %505 : vector<8x32xf32>
    %cst_130 = arith.constant 1.000000e+00 : f32
    %507 = vector.broadcast %cst_130 : f32 to vector<8x32xf32>
    %508 = arith.addf %507, %506 : vector<8x32xf32>
    %509 = arith.divf %507, %508 : vector<8x32xf32>
    %510 = vector.extract_strided_slice %484 {offsets = [0, 64], sizes = [8, 32], strides = [1, 1]} : vector<8x96xf32> to vector<8x32xf32>
    %511 = vector.extract_strided_slice %490 {offsets = [0, 64], sizes = [8, 32], strides = [1, 1]} : vector<8x96xf32> to vector<8x32xf32>
    %512 = arith.mulf %501, %511 : vector<8x32xf32>
    %513 = arith.addf %510, %512 : vector<8x32xf32>
    %514 = math.tanh %513 : vector<8x32xf32>
    %515 = vector.extract_strided_slice %487 {offsets = [0, 0], sizes = [8, 32], strides = [1, 1]} : vector<8x96xf32> to vector<8x32xf32>
    %516 = vector.extract_strided_slice %493 {offsets = [0, 0], sizes = [8, 32], strides = [1, 1]} : vector<8x96xf32> to vector<8x32xf32>
    %517 = arith.addf %515, %516 : vector<8x32xf32>
    %518 = arith.negf %517 : vector<8x32xf32>
    %519 = math.exp %518 : vector<8x32xf32>
    %cst_131 = arith.constant 1.000000e+00 : f32
    %520 = vector.broadcast %cst_131 : f32 to vector<8x32xf32>
    %521 = arith.addf %520, %519 : vector<8x32xf32>
    %522 = arith.divf %520, %521 : vector<8x32xf32>
    %523 = vector.extract_strided_slice %487 {offsets = [0, 32], sizes = [8, 32], strides = [1, 1]} : vector<8x96xf32> to vector<8x32xf32>
    %524 = vector.extract_strided_slice %493 {offsets = [0, 32], sizes = [8, 32], strides = [1, 1]} : vector<8x96xf32> to vector<8x32xf32>
    %525 = arith.addf %523, %524 : vector<8x32xf32>
    %526 = arith.negf %525 : vector<8x32xf32>
    %527 = math.exp %526 : vector<8x32xf32>
    %cst_132 = arith.constant 1.000000e+00 : f32
    %528 = vector.broadcast %cst_132 : f32 to vector<8x32xf32>
    %529 = arith.addf %528, %527 : vector<8x32xf32>
    %530 = arith.divf %528, %529 : vector<8x32xf32>
    %531 = vector.extract_strided_slice %487 {offsets = [0, 64], sizes = [8, 32], strides = [1, 1]} : vector<8x96xf32> to vector<8x32xf32>
    %532 = vector.extract_strided_slice %493 {offsets = [0, 64], sizes = [8, 32], strides = [1, 1]} : vector<8x96xf32> to vector<8x32xf32>
    %533 = arith.mulf %522, %532 : vector<8x32xf32>
    %534 = arith.addf %531, %533 : vector<8x32xf32>
    %535 = math.tanh %534 : vector<8x32xf32>
    %cst_133 = arith.constant 1.000000e+00 : f32
    %536 = vector.broadcast %cst_133 : f32 to vector<8x32xf32>
    %537 = arith.subf %536, %509 : vector<8x32xf32>
    %538 = arith.mulf %537, %514 : vector<8x32xf32>
    %539 = arith.mulf %509, %461 : vector<8x32xf32>
    %540 = arith.addf %538, %539 : vector<8x32xf32>
    %cst_134 = arith.constant 1.000000e+00 : f32
    %541 = vector.broadcast %cst_134 : f32 to vector<8x32xf32>
    %542 = arith.subf %541, %530 : vector<8x32xf32>
    %543 = arith.mulf %542, %535 : vector<8x32xf32>
    %544 = arith.mulf %530, %464 : vector<8x32xf32>
    %545 = arith.addf %543, %544 : vector<8x32xf32>
    %546 = vector.broadcast %c5_i32 : i32 to vector<8x1xi32>
    %547 = arith.cmpi slt, %546, %16 : vector<8x1xi32>
    %548 = vector.broadcast %481 : i32 to vector<8x1xi32>
    %549 = arith.cmpi slt, %548, %16 : vector<8x1xi32>
    %550 = vector.shape_cast %547 : vector<8x1xi1> to vector<8x1xi1>
    %551 = vector.broadcast %550 : vector<8x1xi1> to vector<8x32xi1>
    %552 = arith.select %551, %540, %461 : vector<8x32xi1>, vector<8x32xf32>
    %553 = vector.shape_cast %549 : vector<8x1xi1> to vector<8x1xi1>
    %554 = vector.broadcast %553 : vector<8x1xi1> to vector<8x32xi1>
    %555 = arith.select %554, %545, %464 : vector<8x32xi1>, vector<8x32xf32>
    %cst_135 = arith.constant 0.000000e+00 : f32
    %556 = vector.shape_cast %547 : vector<8x1xi1> to vector<8x1xi1>
    %557 = vector.broadcast %556 : vector<8x1xi1> to vector<8x32xi1>
    %558 = vector.broadcast %cst_135 : f32 to vector<8x32xf32>
    %559 = arith.select %557, %552, %558 : vector<8x32xi1>, vector<8x32xf32>
    %560 = arith.index_cast %c5_i32 : i32 to index
    %c0_136 = arith.constant 0 : index
    %c0_137 = arith.constant 0 : index
    %561 = vector.load %arg19[%560, %c0_136, %c0_137] : memref<8x8x32xf32, #tpu.memory_space<vmem>>, vector<1x8x32xf32>
    %562 = vector.shape_cast %561 : vector<1x8x32xf32> to vector<8x32xf32>
    %563 = vector.shape_cast %559 : vector<8x32xf32> to vector<1x8x32xf32>
    tpu.vector_store %arg19[%560, %c0_136, %c0_137], %563 {strides = array<i32>} : memref<8x8x32xf32, #tpu.memory_space<vmem>>, vector<1x8x32xf32>,
    %cst_138 = arith.constant 0.000000e+00 : f32
    %564 = vector.shape_cast %549 : vector<8x1xi1> to vector<8x1xi1>
    %565 = vector.broadcast %564 : vector<8x1xi1> to vector<8x32xi1>
    %566 = vector.broadcast %cst_138 : f32 to vector<8x32xf32>
    %567 = arith.select %565, %555, %566 : vector<8x32xi1>, vector<8x32xf32>
    %568 = arith.index_cast %481 : i32 to index
    %c0_139 = arith.constant 0 : index
    %c0_140 = arith.constant 0 : index
    %569 = vector.load %arg20[%568, %c0_139, %c0_140] : memref<8x8x32xf32, #tpu.memory_space<vmem>>, vector<1x8x32xf32>
    %570 = vector.shape_cast %569 : vector<1x8x32xf32> to vector<8x32xf32>
    %571 = vector.shape_cast %567 : vector<8x32xf32> to vector<1x8x32xf32>
    tpu.vector_store %arg20[%568, %c0_139, %c0_140], %571 {strides = array<i32>} : memref<8x8x32xf32, #tpu.memory_space<vmem>>, vector<1x8x32xf32>,
    %c6_i32 = arith.constant 6 : i32
    %c7_i32_141 = arith.constant 7 : i32
    %572 = arith.subi %c7_i32_141, %c6_i32 : i32
    %573 = arith.index_cast %c6_i32 : i32 to index
    %c0_142 = arith.constant 0 : index
    %c0_143 = arith.constant 0 : index
    %574 = vector.load %arg17[%573, %c0_142, %c0_143] : memref<8x8x96xf32, #tpu.memory_space<vmem>>, vector<1x8x96xf32>
    %575 = vector.shape_cast %574 : vector<1x8x96xf32> to vector<8x96xf32>
    %576 = arith.index_cast %572 : i32 to index
    %c0_144 = arith.constant 0 : index
    %c0_145 = arith.constant 0 : index
    %577 = vector.load %arg18[%576, %c0_144, %c0_145] : memref<8x8x96xf32, #tpu.memory_space<vmem>>, vector<1x8x96xf32>
    %578 = vector.shape_cast %577 : vector<1x8x96xf32> to vector<8x96xf32>
    %579 = arith.truncf %552 : vector<8x32xf32> to vector<8x32xbf16>
    %cst_146 = arith.constant dense<0.000000e+00> : vector<8x96xf32>
    %580 = tpu.matmul %579, %23, %cst_146 {dimension_numbers = #tpu.dot_dimension_numbers<[1], [0], [0], [1], [0, 0, 1, 1], [], []>} : vector<8x32xbf16>, vector<32x96xbf16>, vector<8x96xf32> -> vector<8x96xf32>
    %581 = arith.addf %580, %19 : vector<8x96xf32>
    %582 = arith.truncf %555 : vector<8x32xf32> to vector<8x32xbf16>
    %cst_147 = arith.constant dense<0.000000e+00> : vector<8x96xf32>
    %583 = tpu.matmul %582, %24, %cst_147 {dimension_numbers = #tpu.dot_dimension_numbers<[1], [0], [0], [1], [0, 0, 1, 1], [], []>} : vector<8x32xbf16>, vector<32x96xbf16>, vector<8x96xf32> -> vector<8x96xf32>
    %584 = arith.addf %583, %22 : vector<8x96xf32>
    %585 = vector.extract_strided_slice %575 {offsets = [0, 0], sizes = [8, 32], strides = [1, 1]} : vector<8x96xf32> to vector<8x32xf32>
    %586 = vector.extract_strided_slice %581 {offsets = [0, 0], sizes = [8, 32], strides = [1, 1]} : vector<8x96xf32> to vector<8x32xf32>
    %587 = arith.addf %585, %586 : vector<8x32xf32>
    %588 = arith.negf %587 : vector<8x32xf32>
    %589 = math.exp %588 : vector<8x32xf32>
    %cst_148 = arith.constant 1.000000e+00 : f32
    %590 = vector.broadcast %cst_148 : f32 to vector<8x32xf32>
    %591 = arith.addf %590, %589 : vector<8x32xf32>
    %592 = arith.divf %590, %591 : vector<8x32xf32>
    %593 = vector.extract_strided_slice %575 {offsets = [0, 32], sizes = [8, 32], strides = [1, 1]} : vector<8x96xf32> to vector<8x32xf32>
    %594 = vector.extract_strided_slice %581 {offsets = [0, 32], sizes = [8, 32], strides = [1, 1]} : vector<8x96xf32> to vector<8x32xf32>
    %595 = arith.addf %593, %594 : vector<8x32xf32>
    %596 = arith.negf %595 : vector<8x32xf32>
    %597 = math.exp %596 : vector<8x32xf32>
    %cst_149 = arith.constant 1.000000e+00 : f32
    %598 = vector.broadcast %cst_149 : f32 to vector<8x32xf32>
    %599 = arith.addf %598, %597 : vector<8x32xf32>
    %600 = arith.divf %598, %599 : vector<8x32xf32>
    %601 = vector.extract_strided_slice %575 {offsets = [0, 64], sizes = [8, 32], strides = [1, 1]} : vector<8x96xf32> to vector<8x32xf32>
    %602 = vector.extract_strided_slice %581 {offsets = [0, 64], sizes = [8, 32], strides = [1, 1]} : vector<8x96xf32> to vector<8x32xf32>
    %603 = arith.mulf %592, %602 : vector<8x32xf32>
    %604 = arith.addf %601, %603 : vector<8x32xf32>
    %605 = math.tanh %604 : vector<8x32xf32>
    %606 = vector.extract_strided_slice %578 {offsets = [0, 0], sizes = [8, 32], strides = [1, 1]} : vector<8x96xf32> to vector<8x32xf32>
    %607 = vector.extract_strided_slice %584 {offsets = [0, 0], sizes = [8, 32], strides = [1, 1]} : vector<8x96xf32> to vector<8x32xf32>
    %608 = arith.addf %606, %607 : vector<8x32xf32>
    %609 = arith.negf %608 : vector<8x32xf32>
    %610 = math.exp %609 : vector<8x32xf32>
    %cst_150 = arith.constant 1.000000e+00 : f32
    %611 = vector.broadcast %cst_150 : f32 to vector<8x32xf32>
    %612 = arith.addf %611, %610 : vector<8x32xf32>
    %613 = arith.divf %611, %612 : vector<8x32xf32>
    %614 = vector.extract_strided_slice %578 {offsets = [0, 32], sizes = [8, 32], strides = [1, 1]} : vector<8x96xf32> to vector<8x32xf32>
    %615 = vector.extract_strided_slice %584 {offsets = [0, 32], sizes = [8, 32], strides = [1, 1]} : vector<8x96xf32> to vector<8x32xf32>
    %616 = arith.addf %614, %615 : vector<8x32xf32>
    %617 = arith.negf %616 : vector<8x32xf32>
    %618 = math.exp %617 : vector<8x32xf32>
    %cst_151 = arith.constant 1.000000e+00 : f32
    %619 = vector.broadcast %cst_151 : f32 to vector<8x32xf32>
    %620 = arith.addf %619, %618 : vector<8x32xf32>
    %621 = arith.divf %619, %620 : vector<8x32xf32>
    %622 = vector.extract_strided_slice %578 {offsets = [0, 64], sizes = [8, 32], strides = [1, 1]} : vector<8x96xf32> to vector<8x32xf32>
    %623 = vector.extract_strided_slice %584 {offsets = [0, 64], sizes = [8, 32], strides = [1, 1]} : vector<8x96xf32> to vector<8x32xf32>
    %624 = arith.mulf %613, %623 : vector<8x32xf32>
    %625 = arith.addf %622, %624 : vector<8x32xf32>
    %626 = math.tanh %625 : vector<8x32xf32>
    %cst_152 = arith.constant 1.000000e+00 : f32
    %627 = vector.broadcast %cst_152 : f32 to vector<8x32xf32>
    %628 = arith.subf %627, %600 : vector<8x32xf32>
    %629 = arith.mulf %628, %605 : vector<8x32xf32>
    %630 = arith.mulf %600, %552 : vector<8x32xf32>
    %631 = arith.addf %629, %630 : vector<8x32xf32>
    %cst_153 = arith.constant 1.000000e+00 : f32
    %632 = vector.broadcast %cst_153 : f32 to vector<8x32xf32>
    %633 = arith.subf %632, %621 : vector<8x32xf32>
    %634 = arith.mulf %633, %626 : vector<8x32xf32>
    %635 = arith.mulf %621, %555 : vector<8x32xf32>
    %636 = arith.addf %634, %635 : vector<8x32xf32>
    %637 = vector.broadcast %c6_i32 : i32 to vector<8x1xi32>
    %638 = arith.cmpi slt, %637, %16 : vector<8x1xi32>
    %639 = vector.broadcast %572 : i32 to vector<8x1xi32>
    %640 = arith.cmpi slt, %639, %16 : vector<8x1xi32>
    %641 = vector.shape_cast %638 : vector<8x1xi1> to vector<8x1xi1>
    %642 = vector.broadcast %641 : vector<8x1xi1> to vector<8x32xi1>
    %643 = arith.select %642, %631, %552 : vector<8x32xi1>, vector<8x32xf32>
    %644 = vector.shape_cast %640 : vector<8x1xi1> to vector<8x1xi1>
    %645 = vector.broadcast %644 : vector<8x1xi1> to vector<8x32xi1>
    %646 = arith.select %645, %636, %555 : vector<8x32xi1>, vector<8x32xf32>
    %cst_154 = arith.constant 0.000000e+00 : f32
    %647 = vector.shape_cast %638 : vector<8x1xi1> to vector<8x1xi1>
    %648 = vector.broadcast %647 : vector<8x1xi1> to vector<8x32xi1>
    %649 = vector.broadcast %cst_154 : f32 to vector<8x32xf32>
    %650 = arith.select %648, %643, %649 : vector<8x32xi1>, vector<8x32xf32>
    %651 = arith.index_cast %c6_i32 : i32 to index
    %c0_155 = arith.constant 0 : index
    %c0_156 = arith.constant 0 : index
    %652 = vector.load %arg19[%651, %c0_155, %c0_156] : memref<8x8x32xf32, #tpu.memory_space<vmem>>, vector<1x8x32xf32>
    %653 = vector.shape_cast %652 : vector<1x8x32xf32> to vector<8x32xf32>
    %654 = vector.shape_cast %650 : vector<8x32xf32> to vector<1x8x32xf32>
    tpu.vector_store %arg19[%651, %c0_155, %c0_156], %654 {strides = array<i32>} : memref<8x8x32xf32, #tpu.memory_space<vmem>>, vector<1x8x32xf32>,
    %cst_157 = arith.constant 0.000000e+00 : f32
    %655 = vector.shape_cast %640 : vector<8x1xi1> to vector<8x1xi1>
    %656 = vector.broadcast %655 : vector<8x1xi1> to vector<8x32xi1>
    %657 = vector.broadcast %cst_157 : f32 to vector<8x32xf32>
    %658 = arith.select %656, %646, %657 : vector<8x32xi1>, vector<8x32xf32>
    %659 = arith.index_cast %572 : i32 to index
    %c0_158 = arith.constant 0 : index
    %c0_159 = arith.constant 0 : index
    %660 = vector.load %arg20[%659, %c0_158, %c0_159] : memref<8x8x32xf32, #tpu.memory_space<vmem>>, vector<1x8x32xf32>
    %661 = vector.shape_cast %660 : vector<1x8x32xf32> to vector<8x32xf32>
    %662 = vector.shape_cast %658 : vector<8x32xf32> to vector<1x8x32xf32>
    tpu.vector_store %arg20[%659, %c0_158, %c0_159], %662 {strides = array<i32>} : memref<8x8x32xf32, #tpu.memory_space<vmem>>, vector<1x8x32xf32>,
    %c7_i32_160 = arith.constant 7 : i32
    %c7_i32_161 = arith.constant 7 : i32
    %663 = arith.subi %c7_i32_161, %c7_i32_160 : i32
    %664 = arith.index_cast %c7_i32_160 : i32 to index
    %c0_162 = arith.constant 0 : index
    %c0_163 = arith.constant 0 : index
    %665 = vector.load %arg17[%664, %c0_162, %c0_163] : memref<8x8x96xf32, #tpu.memory_space<vmem>>, vector<1x8x96xf32>
    %666 = vector.shape_cast %665 : vector<1x8x96xf32> to vector<8x96xf32>
    %667 = arith.index_cast %663 : i32 to index
    %c0_164 = arith.constant 0 : index
    %c0_165 = arith.constant 0 : index
    %668 = vector.load %arg18[%667, %c0_164, %c0_165] : memref<8x8x96xf32, #tpu.memory_space<vmem>>, vector<1x8x96xf32>
    %669 = vector.shape_cast %668 : vector<1x8x96xf32> to vector<8x96xf32>
    %670 = arith.truncf %643 : vector<8x32xf32> to vector<8x32xbf16>
    %cst_166 = arith.constant dense<0.000000e+00> : vector<8x96xf32>
    %671 = tpu.matmul %670, %23, %cst_166 {dimension_numbers = #tpu.dot_dimension_numbers<[1], [0], [0], [1], [0, 0, 1, 1], [], []>} : vector<8x32xbf16>, vector<32x96xbf16>, vector<8x96xf32> -> vector<8x96xf32>
    %672 = arith.addf %671, %19 : vector<8x96xf32>
    %673 = arith.truncf %646 : vector<8x32xf32> to vector<8x32xbf16>
    %cst_167 = arith.constant dense<0.000000e+00> : vector<8x96xf32>
    %674 = tpu.matmul %673, %24, %cst_167 {dimension_numbers = #tpu.dot_dimension_numbers<[1], [0], [0], [1], [0, 0, 1, 1], [], []>} : vector<8x32xbf16>, vector<32x96xbf16>, vector<8x96xf32> -> vector<8x96xf32>
    %675 = arith.addf %674, %22 : vector<8x96xf32>
    %676 = vector.extract_strided_slice %666 {offsets = [0, 0], sizes = [8, 32], strides = [1, 1]} : vector<8x96xf32> to vector<8x32xf32>
    %677 = vector.extract_strided_slice %672 {offsets = [0, 0], sizes = [8, 32], strides = [1, 1]} : vector<8x96xf32> to vector<8x32xf32>
    %678 = arith.addf %676, %677 : vector<8x32xf32>
    %679 = arith.negf %678 : vector<8x32xf32>
    %680 = math.exp %679 : vector<8x32xf32>
    %cst_168 = arith.constant 1.000000e+00 : f32
    %681 = vector.broadcast %cst_168 : f32 to vector<8x32xf32>
    %682 = arith.addf %681, %680 : vector<8x32xf32>
    %683 = arith.divf %681, %682 : vector<8x32xf32>
    %684 = vector.extract_strided_slice %666 {offsets = [0, 32], sizes = [8, 32], strides = [1, 1]} : vector<8x96xf32> to vector<8x32xf32>
    %685 = vector.extract_strided_slice %672 {offsets = [0, 32], sizes = [8, 32], strides = [1, 1]} : vector<8x96xf32> to vector<8x32xf32>
    %686 = arith.addf %684, %685 : vector<8x32xf32>
    %687 = arith.negf %686 : vector<8x32xf32>
    %688 = math.exp %687 : vector<8x32xf32>
    %cst_169 = arith.constant 1.000000e+00 : f32
    %689 = vector.broadcast %cst_169 : f32 to vector<8x32xf32>
    %690 = arith.addf %689, %688 : vector<8x32xf32>
    %691 = arith.divf %689, %690 : vector<8x32xf32>
    %692 = vector.extract_strided_slice %666 {offsets = [0, 64], sizes = [8, 32], strides = [1, 1]} : vector<8x96xf32> to vector<8x32xf32>
    %693 = vector.extract_strided_slice %672 {offsets = [0, 64], sizes = [8, 32], strides = [1, 1]} : vector<8x96xf32> to vector<8x32xf32>
    %694 = arith.mulf %683, %693 : vector<8x32xf32>
    %695 = arith.addf %692, %694 : vector<8x32xf32>
    %696 = math.tanh %695 : vector<8x32xf32>
    %697 = vector.extract_strided_slice %669 {offsets = [0, 0], sizes = [8, 32], strides = [1, 1]} : vector<8x96xf32> to vector<8x32xf32>
    %698 = vector.extract_strided_slice %675 {offsets = [0, 0], sizes = [8, 32], strides = [1, 1]} : vector<8x96xf32> to vector<8x32xf32>
    %699 = arith.addf %697, %698 : vector<8x32xf32>
    %700 = arith.negf %699 : vector<8x32xf32>
    %701 = math.exp %700 : vector<8x32xf32>
    %cst_170 = arith.constant 1.000000e+00 : f32
    %702 = vector.broadcast %cst_170 : f32 to vector<8x32xf32>
    %703 = arith.addf %702, %701 : vector<8x32xf32>
    %704 = arith.divf %702, %703 : vector<8x32xf32>
    %705 = vector.extract_strided_slice %669 {offsets = [0, 32], sizes = [8, 32], strides = [1, 1]} : vector<8x96xf32> to vector<8x32xf32>
    %706 = vector.extract_strided_slice %675 {offsets = [0, 32], sizes = [8, 32], strides = [1, 1]} : vector<8x96xf32> to vector<8x32xf32>
    %707 = arith.addf %705, %706 : vector<8x32xf32>
    %708 = arith.negf %707 : vector<8x32xf32>
    %709 = math.exp %708 : vector<8x32xf32>
    %cst_171 = arith.constant 1.000000e+00 : f32
    %710 = vector.broadcast %cst_171 : f32 to vector<8x32xf32>
    %711 = arith.addf %710, %709 : vector<8x32xf32>
    %712 = arith.divf %710, %711 : vector<8x32xf32>
    %713 = vector.extract_strided_slice %669 {offsets = [0, 64], sizes = [8, 32], strides = [1, 1]} : vector<8x96xf32> to vector<8x32xf32>
    %714 = vector.extract_strided_slice %675 {offsets = [0, 64], sizes = [8, 32], strides = [1, 1]} : vector<8x96xf32> to vector<8x32xf32>
    %715 = arith.mulf %704, %714 : vector<8x32xf32>
    %716 = arith.addf %713, %715 : vector<8x32xf32>
    %717 = math.tanh %716 : vector<8x32xf32>
    %cst_172 = arith.constant 1.000000e+00 : f32
    %718 = vector.broadcast %cst_172 : f32 to vector<8x32xf32>
    %719 = arith.subf %718, %691 : vector<8x32xf32>
    %720 = arith.mulf %719, %696 : vector<8x32xf32>
    %721 = arith.mulf %691, %643 : vector<8x32xf32>
    %722 = arith.addf %720, %721 : vector<8x32xf32>
    %cst_173 = arith.constant 1.000000e+00 : f32
    %723 = vector.broadcast %cst_173 : f32 to vector<8x32xf32>
    %724 = arith.subf %723, %712 : vector<8x32xf32>
    %725 = arith.mulf %724, %717 : vector<8x32xf32>
    %726 = arith.mulf %712, %646 : vector<8x32xf32>
    %727 = arith.addf %725, %726 : vector<8x32xf32>
    %728 = vector.broadcast %c7_i32_160 : i32 to vector<8x1xi32>
    %729 = arith.cmpi slt, %728, %16 : vector<8x1xi32>
    %730 = vector.broadcast %663 : i32 to vector<8x1xi32>
    %731 = arith.cmpi slt, %730, %16 : vector<8x1xi32>
    %732 = vector.shape_cast %729 : vector<8x1xi1> to vector<8x1xi1>
    %733 = vector.broadcast %732 : vector<8x1xi1> to vector<8x32xi1>
    %734 = arith.select %733, %722, %643 : vector<8x32xi1>, vector<8x32xf32>
    %735 = vector.shape_cast %731 : vector<8x1xi1> to vector<8x1xi1>
    %736 = vector.broadcast %735 : vector<8x1xi1> to vector<8x32xi1>
    %737 = arith.select %736, %727, %646 : vector<8x32xi1>, vector<8x32xf32>
    %cst_174 = arith.constant 0.000000e+00 : f32
    %738 = vector.shape_cast %729 : vector<8x1xi1> to vector<8x1xi1>
    %739 = vector.broadcast %738 : vector<8x1xi1> to vector<8x32xi1>
    %740 = vector.broadcast %cst_174 : f32 to vector<8x32xf32>
    %741 = arith.select %739, %734, %740 : vector<8x32xi1>, vector<8x32xf32>
    %742 = arith.index_cast %c7_i32_160 : i32 to index
    %c0_175 = arith.constant 0 : index
    %c0_176 = arith.constant 0 : index
    %743 = vector.load %arg19[%742, %c0_175, %c0_176] : memref<8x8x32xf32, #tpu.memory_space<vmem>>, vector<1x8x32xf32>
    %744 = vector.shape_cast %743 : vector<1x8x32xf32> to vector<8x32xf32>
    %745 = vector.shape_cast %741 : vector<8x32xf32> to vector<1x8x32xf32>
    tpu.vector_store %arg19[%742, %c0_175, %c0_176], %745 {strides = array<i32>} : memref<8x8x32xf32, #tpu.memory_space<vmem>>, vector<1x8x32xf32>,
    %cst_177 = arith.constant 0.000000e+00 : f32
    %746 = vector.shape_cast %731 : vector<8x1xi1> to vector<8x1xi1>
    %747 = vector.broadcast %746 : vector<8x1xi1> to vector<8x32xi1>
    %748 = vector.broadcast %cst_177 : f32 to vector<8x32xf32>
    %749 = arith.select %747, %737, %748 : vector<8x32xi1>, vector<8x32xf32>
    %750 = arith.index_cast %663 : i32 to index
    %c0_178 = arith.constant 0 : index
    %c0_179 = arith.constant 0 : index
    %751 = vector.load %arg20[%750, %c0_178, %c0_179] : memref<8x8x32xf32, #tpu.memory_space<vmem>>, vector<1x8x32xf32>
    %752 = vector.shape_cast %751 : vector<1x8x32xf32> to vector<8x32xf32>
    %753 = vector.shape_cast %749 : vector<8x32xf32> to vector<1x8x32xf32>
    tpu.vector_store %arg20[%750, %c0_178, %c0_179], %753 {strides = array<i32>} : memref<8x8x32xf32, #tpu.memory_space<vmem>>, vector<1x8x32xf32>,
    %c8_i32 = arith.constant 8 : i32
    %c0_180 = arith.constant 0 : index
    %c0_181 = arith.constant 0 : index
    %c0_182 = arith.constant 0 : index
    %754 = vector.load %arg19[%c0_180, %c0_181, %c0_182] : memref<8x8x32xf32, #tpu.memory_space<vmem>>, vector<8x8x32xf32>
    %c0_183 = arith.constant 0 : index
    %c0_184 = arith.constant 0 : index
    %c0_185 = arith.constant 0 : index
    %755 = vector.load %arg20[%c0_183, %c0_184, %c0_185] : memref<8x8x32xf32, #tpu.memory_space<vmem>>, vector<8x8x32xf32>
    %756 = vector.shape_cast %754 : vector<8x8x32xf32> to vector<64x32xf32>
    %757 = arith.truncf %756 : vector<64x32xf32> to vector<64x32xbf16>
    %758 = vector.shape_cast %755 : vector<8x8x32xf32> to vector<64x32xf32>
    %759 = arith.truncf %758 : vector<64x32xf32> to vector<64x32xbf16>
    %c0_186 = arith.constant 0 : index
    %c0_187 = arith.constant 0 : index
    %760 = vector.load %arg12[%c0_186, %c0_187] : memref<32x64xbf16, #tpu.memory_space<vmem>>, vector<32x64xbf16>
    %cst_188 = arith.constant dense<0.000000e+00> : vector<64x64xf32>
    %761 = tpu.matmul %757, %760, %cst_188 {dimension_numbers = #tpu.dot_dimension_numbers<[1], [0], [0], [1], [0, 0, 1, 1], [], []>} : vector<64x32xbf16>, vector<32x64xbf16>, vector<64x64xf32> -> vector<64x64xf32>
    %c0_189 = arith.constant 0 : index
    %c0_190 = arith.constant 0 : index
    %762 = vector.load %arg13[%c0_189, %c0_190] : memref<32x64xbf16, #tpu.memory_space<vmem>>, vector<32x64xbf16>
    %cst_191 = arith.constant dense<0.000000e+00> : vector<64x64xf32>
    %763 = tpu.matmul %759, %762, %cst_191 {dimension_numbers = #tpu.dot_dimension_numbers<[1], [0], [0], [1], [0, 0, 1, 1], [], []>} : vector<64x32xbf16>, vector<32x64xbf16>, vector<64x64xf32> -> vector<64x64xf32>
    %764 = arith.addf %761, %763 : vector<64x64xf32>
    %c0_192 = arith.constant 0 : index
    %c0_193 = arith.constant 0 : index
    %765 = vector.load %arg14[%c0_192, %c0_193] : memref<1x64xf32, #tpu.memory_space<vmem>>, vector<1x64xf32>
    %766 = vector.broadcast %765 : vector<1x64xf32> to vector<64x64xf32>
    %767 = arith.addf %764, %766 : vector<64x64xf32>
    %768 = math.tanh %767 : vector<64x64xf32>
    %769 = vector.shape_cast %768 : vector<64x64xf32> to vector<8x8x64xf32>
    %c0_194 = arith.constant 0 : index
    %c0_195 = arith.constant 0 : index
    %c0_196 = arith.constant 0 : index
    %770 = vector.load %arg15[%c0_194, %c0_195, %c0_196] : memref<1x1x64xf32, #tpu.memory_space<vmem>>, vector<1x1x64xf32>
    %771 = vector.broadcast %770 : vector<1x1x64xf32> to vector<8x8x64xf32>
    %772 = arith.mulf %769, %771 : vector<8x8x64xf32>
    %cst_197 = arith.constant dense<0.000000e+00> : vector<8x8xf32>
    %773 = vector.multi_reduction <add>, %772, %cst_197 [2] : vector<8x8x64xf32> to vector<8x8xf32>
    %774 = vector.shape_cast %773 : vector<8x8xf32> to vector<8x8x1xf32>
    %c0_198 = arith.constant 0 : index
    %c0_199 = arith.constant 0 : index
    %c0_200 = arith.constant 0 : index
    %775 = vector.load %arg2[%c0_198, %c0_199, %c0_200] : memref<8x8x1xi32, #tpu.memory_space<vmem>>, vector<8x8x1xi32>
    %c0_i32_201 = arith.constant 0 : i32
    %776 = vector.broadcast %c0_i32_201 : i32 to vector<8x8x1xi32>
    %777 = arith.cmpi ne, %775, %776 : vector<8x8x1xi32>
    %cst_202 = arith.constant -1.000000e+09 : f32
    %778 = vector.broadcast %cst_202 : f32 to vector<8x8x1xf32>
    %779 = arith.select %777, %774, %778 : vector<8x8x1xi1>, vector<8x8x1xf32>
    %cst_203 = arith.constant dense<0xFF800000> : vector<8x1xf32>
    %780 = vector.multi_reduction <maximumf>, %779, %cst_203 [0] : vector<8x8x1xf32> to vector<8x1xf32>
    %781 = vector.shape_cast %780 : vector<8x1xf32> to vector<1x8x1xf32>
    %782 = vector.broadcast %781 : vector<1x8x1xf32> to vector<8x8x1xf32>
    %783 = arith.subf %779, %782 : vector<8x8x1xf32>
    %784 = math.exp %783 : vector<8x8x1xf32>
    %cst_204 = arith.constant dense<0.000000e+00> : vector<8x1xf32>
    %785 = vector.multi_reduction <add>, %784, %cst_204 [0] : vector<8x8x1xf32> to vector<8x1xf32>
    %786 = vector.shape_cast %785 : vector<8x1xf32> to vector<1x8x1xf32>
    %787 = tpu.reciprocal %786 {approx = true} : vector<1x8x1xf32> -> vector<1x8x1xf32>
    %788 = vector.broadcast %787 : vector<1x8x1xf32> to vector<8x8x1xf32>
    %789 = arith.mulf %784, %788 : vector<8x8x1xf32>
    %790 = vector.broadcast %789 : vector<8x8x1xf32> to vector<8x8x32xf32>
    %791 = arith.mulf %790, %754 : vector<8x8x32xf32>
    %cst_205 = arith.constant dense<0.000000e+00> : vector<8x32xf32>
    %792 = vector.multi_reduction <add>, %791, %cst_205 [0] : vector<8x8x32xf32> to vector<8x32xf32>
    %793 = vector.broadcast %789 : vector<8x8x1xf32> to vector<8x8x32xf32>
    %794 = arith.mulf %793, %755 : vector<8x8x32xf32>
    %cst_206 = arith.constant dense<0.000000e+00> : vector<8x32xf32>
    %795 = vector.multi_reduction <add>, %794, %cst_206 [0] : vector<8x8x32xf32> to vector<8x32xf32>
    %796 = tpu.concatenate %792, %795 in 1 : vector<8x32xf32>, vector<8x32xf32> -> vector<8x64xf32>
    %c0_207 = arith.constant 0 : index
    %c0_208 = arith.constant 0 : index
    %797 = vector.load %arg16[%c0_207, %c0_208] : memref<8x64xf32, #tpu.memory_space<vmem>>, vector<8x64xf32>
    tpu.vector_store %arg16[%c0_207, %c0_208], %796 {strides = array<i32>} : memref<8x64xf32, #tpu.memory_space<vmem>>, vector<8x64xf32>,
    return
  }
  func.func @transform_0(%arg0: i32) -> (i32, i32) {
    %c0_i32 = arith.constant 0 : i32
    %c0_i32_0 = arith.constant 0 : i32
    return %arg0, %c0_i32 : i32, i32
  }
  func.func @transform_1(%arg0: i32) -> (i32, i32, i32) {
    %c0_i32 = arith.constant 0 : i32
    %c0_i32_0 = arith.constant 0 : i32
    %c0_i32_1 = arith.constant 0 : i32
    return %c0_i32, %arg0, %c0_i32_0 : i32, i32, i32
  }
  func.func @transform_2(%arg0: i32) -> (i32, i32, i32) {
    %c0_i32 = arith.constant 0 : i32
    %c0_i32_0 = arith.constant 0 : i32
    %c0_i32_1 = arith.constant 0 : i32
    return %c0_i32, %arg0, %c0_i32_0 : i32, i32, i32
  }
  func.func @transform_3(%arg0: i32) -> (i32, i32) {
    %c0_i32 = arith.constant 0 : i32
    %c0_i32_0 = arith.constant 0 : i32
    %c0_i32_1 = arith.constant 0 : i32
    return %c0_i32, %c0_i32_0 : i32, i32
  }
  func.func @transform_4(%arg0: i32) -> (i32, i32) {
    %c0_i32 = arith.constant 0 : i32
    %c0_i32_0 = arith.constant 0 : i32
    %c0_i32_1 = arith.constant 0 : i32
    return %c0_i32, %c0_i32_0 : i32, i32
  }
  func.func @transform_5(%arg0: i32) -> (i32, i32) {
    %c0_i32 = arith.constant 0 : i32
    %c0_i32_0 = arith.constant 0 : i32
    %c0_i32_1 = arith.constant 0 : i32
    return %c0_i32, %c0_i32_0 : i32, i32
  }
  func.func @transform_6(%arg0: i32) -> (i32, i32) {
    %c0_i32 = arith.constant 0 : i32
    %c0_i32_0 = arith.constant 0 : i32
    %c0_i32_1 = arith.constant 0 : i32
    return %c0_i32, %c0_i32_0 : i32, i32
  }
  func.func @transform_7(%arg0: i32) -> (i32, i32) {
    %c0_i32 = arith.constant 0 : i32
    %c0_i32_0 = arith.constant 0 : i32
    %c0_i32_1 = arith.constant 0 : i32
    return %c0_i32, %c0_i32_0 : i32, i32
  }
  func.func @transform_8(%arg0: i32) -> (i32, i32) {
    %c0_i32 = arith.constant 0 : i32
    %c0_i32_0 = arith.constant 0 : i32
    %c0_i32_1 = arith.constant 0 : i32
    return %c0_i32, %c0_i32_0 : i32, i32
  }
  func.func @transform_9(%arg0: i32) -> (i32, i32) {
    %c0_i32 = arith.constant 0 : i32
    %c0_i32_0 = arith.constant 0 : i32
    %c0_i32_1 = arith.constant 0 : i32
    return %c0_i32, %c0_i32_0 : i32, i32
  }
  func.func @transform_10(%arg0: i32) -> (i32, i32) {
    %c0_i32 = arith.constant 0 : i32
    %c0_i32_0 = arith.constant 0 : i32
    %c0_i32_1 = arith.constant 0 : i32
    return %c0_i32, %c0_i32_0 : i32, i32
  }
  func.func @transform_11(%arg0: i32) -> (i32, i32) {
    %c0_i32 = arith.constant 0 : i32
    %c0_i32_0 = arith.constant 0 : i32
    %c0_i32_1 = arith.constant 0 : i32
    return %c0_i32, %c0_i32_0 : i32, i32
  }
  func.func @transform_12(%arg0: i32) -> (i32, i32) {
    %c0_i32 = arith.constant 0 : i32
    %c0_i32_0 = arith.constant 0 : i32
    %c0_i32_1 = arith.constant 0 : i32
    return %c0_i32, %c0_i32_0 : i32, i32
  }
  func.func @transform_13(%arg0: i32) -> (i32, i32) {
    %c0_i32 = arith.constant 0 : i32
    %c0_i32_0 = arith.constant 0 : i32
    %c0_i32_1 = arith.constant 0 : i32
    return %c0_i32, %c0_i32_0 : i32, i32
  }
  func.func @transform_14(%arg0: i32) -> (i32, i32, i32) {
    %c0_i32 = arith.constant 0 : i32
    %c0_i32_0 = arith.constant 0 : i32
    %c0_i32_1 = arith.constant 0 : i32
    %c0_i32_2 = arith.constant 0 : i32
    return %c0_i32, %c0_i32_0, %c0_i32_1 : i32, i32, i32
  }
  func.func @transform_15(%arg0: i32) -> (i32, i32) {
    %c0_i32 = arith.constant 0 : i32
    %c0_i32_0 = arith.constant 0 : i32
    return %arg0, %c0_i32 : i32, i32
  }
}

module attributes {stable_mosaic.version = 11 : i64} {
  func.func @_sent_kernel(%arg0: i32, %arg1: memref<8x1xi32, #tpu.memory_space<vmem>>, %arg2: memref<4x8x1xi32, #tpu.memory_space<vmem>>, %arg3: memref<4x8x64xbf16, #tpu.memory_space<vmem>>, %arg4: memref<64x96xbf16, #tpu.memory_space<vmem>>, %arg5: memref<64x96xbf16, #tpu.memory_space<vmem>>, %arg6: memref<1x96xf32, #tpu.memory_space<vmem>>, %arg7: memref<1x96xf32, #tpu.memory_space<vmem>>, %arg8: memref<32x96xbf16, #tpu.memory_space<vmem>>, %arg9: memref<32x96xbf16, #tpu.memory_space<vmem>>, %arg10: memref<1x96xf32, #tpu.memory_space<vmem>>, %arg11: memref<1x96xf32, #tpu.memory_space<vmem>>, %arg12: memref<32x64xbf16, #tpu.memory_space<vmem>>, %arg13: memref<32x64xbf16, #tpu.memory_space<vmem>>, %arg14: memref<1x64xf32, #tpu.memory_space<vmem>>, %arg15: memref<1x1x64xf32, #tpu.memory_space<vmem>>, %arg16: memref<32x128xbf16, #tpu.memory_space<vmem>>, %arg17: memref<32x128xbf16, #tpu.memory_space<vmem>>, %arg18: memref<1x128xf32, #tpu.memory_space<vmem>>, %arg19: memref<32x128xbf16, #tpu.memory_space<vmem>>, %arg20: memref<32x128xbf16, #tpu.memory_space<vmem>>, %arg21: memref<1x128xf32, #tpu.memory_space<vmem>>, %arg22: memref<4x8x128xf32, #tpu.memory_space<vmem>>, %arg23: memref<8x128xf32, #tpu.memory_space<vmem>>, %arg24: memref<4x8x96xf32, #tpu.memory_space<vmem>>, %arg25: memref<4x8x96xf32, #tpu.memory_space<vmem>>, %arg26: memref<4x8x32xf32, #tpu.memory_space<vmem>>, %arg27: memref<4x8x32xf32, #tpu.memory_space<vmem>>) attributes {dimension_semantics = [#tpu.dimension_semantics<parallel>], iteration_bounds = array<i64: 1>, scalar_prefetch = 0 : i64, scratch_operands = 4 : i64, tpu.core_type = #tpu.core_type<tc>, window_params = [{transform_indices = @transform_0, window_bounds = array<i64: 8, 1>}, {transform_indices = @transform_1, window_bounds = array<i64: 4, 8, 1>}, {transform_indices = @transform_2, window_bounds = array<i64: 4, 8, 64>}, {pipeline_mode = #tpu.pipeline_mode<synchronous>, transform_indices = @transform_3, window_bounds = array<i64: 64, 96>}, {pipeline_mode = #tpu.pipeline_mode<synchronous>, transform_indices = @transform_4, window_bounds = array<i64: 64, 96>}, {pipeline_mode = #tpu.pipeline_mode<synchronous>, transform_indices = @transform_5, window_bounds = array<i64: 1, 96>}, {pipeline_mode = #tpu.pipeline_mode<synchronous>, transform_indices = @transform_6, window_bounds = array<i64: 1, 96>}, {pipeline_mode = #tpu.pipeline_mode<synchronous>, transform_indices = @transform_7, window_bounds = array<i64: 32, 96>}, {pipeline_mode = #tpu.pipeline_mode<synchronous>, transform_indices = @transform_8, window_bounds = array<i64: 32, 96>}, {pipeline_mode = #tpu.pipeline_mode<synchronous>, transform_indices = @transform_9, window_bounds = array<i64: 1, 96>}, {pipeline_mode = #tpu.pipeline_mode<synchronous>, transform_indices = @transform_10, window_bounds = array<i64: 1, 96>}, {pipeline_mode = #tpu.pipeline_mode<synchronous>, transform_indices = @transform_11, window_bounds = array<i64: 32, 64>}, {pipeline_mode = #tpu.pipeline_mode<synchronous>, transform_indices = @transform_12, window_bounds = array<i64: 32, 64>}, {pipeline_mode = #tpu.pipeline_mode<synchronous>, transform_indices = @transform_13, window_bounds = array<i64: 1, 64>}, {pipeline_mode = #tpu.pipeline_mode<synchronous>, transform_indices = @transform_14, window_bounds = array<i64: 1, 1, 64>}, {pipeline_mode = #tpu.pipeline_mode<synchronous>, transform_indices = @transform_15, window_bounds = array<i64: 32, 128>}, {pipeline_mode = #tpu.pipeline_mode<synchronous>, transform_indices = @transform_16, window_bounds = array<i64: 32, 128>}, {pipeline_mode = #tpu.pipeline_mode<synchronous>, transform_indices = @transform_17, window_bounds = array<i64: 1, 128>}, {pipeline_mode = #tpu.pipeline_mode<synchronous>, transform_indices = @transform_18, window_bounds = array<i64: 32, 128>}, {pipeline_mode = #tpu.pipeline_mode<synchronous>, transform_indices = @transform_19, window_bounds = array<i64: 32, 128>}, {pipeline_mode = #tpu.pipeline_mode<synchronous>, transform_indices = @transform_20, window_bounds = array<i64: 1, 128>}, {transform_indices = @transform_21, window_bounds = array<i64: 4, 8, 128>}, {transform_indices = @transform_22, window_bounds = array<i64: 8, 128>}]} {
    %c0 = arith.constant 0 : index
    %c0_0 = arith.constant 0 : index
    %c0_1 = arith.constant 0 : index
    %0 = vector.load %arg3[%c0, %c0_0, %c0_1] : memref<4x8x64xbf16, #tpu.memory_space<vmem>>, vector<4x8x64xbf16>
    %1 = vector.shape_cast %0 : vector<4x8x64xbf16> to vector<32x64xbf16>
    %c0_2 = arith.constant 0 : index
    %c0_3 = arith.constant 0 : index
    %2 = vector.load %arg4[%c0_2, %c0_3] : memref<64x96xbf16, #tpu.memory_space<vmem>>, vector<64x96xbf16>
    %cst = arith.constant dense<0.000000e+00> : vector<32x96xf32>
    %3 = tpu.matmul %1, %2, %cst {dimension_numbers = #tpu.dot_dimension_numbers<[1], [0], [0], [1], [0, 0, 1, 1], [], []>} : vector<32x64xbf16>, vector<64x96xbf16>, vector<32x96xf32> -> vector<32x96xf32>
    %c0_4 = arith.constant 0 : index
    %c0_5 = arith.constant 0 : index
    %4 = vector.load %arg6[%c0_4, %c0_5] : memref<1x96xf32, #tpu.memory_space<vmem>>, vector<1x96xf32>
    %5 = vector.broadcast %4 : vector<1x96xf32> to vector<32x96xf32>
    %6 = arith.addf %3, %5 : vector<32x96xf32>
    %c0_6 = arith.constant 0 : index
    %c0_7 = arith.constant 0 : index
    %7 = vector.load %arg5[%c0_6, %c0_7] : memref<64x96xbf16, #tpu.memory_space<vmem>>, vector<64x96xbf16>
    %cst_8 = arith.constant dense<0.000000e+00> : vector<32x96xf32>
    %8 = tpu.matmul %1, %7, %cst_8 {dimension_numbers = #tpu.dot_dimension_numbers<[1], [0], [0], [1], [0, 0, 1, 1], [], []>} : vector<32x64xbf16>, vector<64x96xbf16>, vector<32x96xf32> -> vector<32x96xf32>
    %c0_9 = arith.constant 0 : index
    %c0_10 = arith.constant 0 : index
    %9 = vector.load %arg7[%c0_9, %c0_10] : memref<1x96xf32, #tpu.memory_space<vmem>>, vector<1x96xf32>
    %10 = vector.broadcast %9 : vector<1x96xf32> to vector<32x96xf32>
    %11 = arith.addf %8, %10 : vector<32x96xf32>
    %12 = vector.shape_cast %6 : vector<32x96xf32> to vector<4x8x96xf32>
    %c0_11 = arith.constant 0 : index
    %c0_12 = arith.constant 0 : index
    %c0_13 = arith.constant 0 : index
    %13 = vector.load %arg24[%c0_11, %c0_12, %c0_13] : memref<4x8x96xf32, #tpu.memory_space<vmem>>, vector<4x8x96xf32>
    tpu.vector_store %arg24[%c0_11, %c0_12, %c0_13], %12 {strides = array<i32>} : memref<4x8x96xf32, #tpu.memory_space<vmem>>, vector<4x8x96xf32>,
    %14 = vector.shape_cast %11 : vector<32x96xf32> to vector<4x8x96xf32>
    %c0_14 = arith.constant 0 : index
    %c0_15 = arith.constant 0 : index
    %c0_16 = arith.constant 0 : index
    %15 = vector.load %arg25[%c0_14, %c0_15, %c0_16] : memref<4x8x96xf32, #tpu.memory_space<vmem>>, vector<4x8x96xf32>
    tpu.vector_store %arg25[%c0_14, %c0_15, %c0_16], %14 {strides = array<i32>} : memref<4x8x96xf32, #tpu.memory_space<vmem>>, vector<4x8x96xf32>,
    %c0_17 = arith.constant 0 : index
    %c0_18 = arith.constant 0 : index
    %16 = vector.load %arg1[%c0_17, %c0_18] : memref<8x1xi32, #tpu.memory_space<vmem>>, vector<8x1xi32>
    %c0_19 = arith.constant 0 : index
    %c0_20 = arith.constant 0 : index
    %17 = vector.load %arg10[%c0_19, %c0_20] : memref<1x96xf32, #tpu.memory_space<vmem>>, vector<1x96xf32>
    %18 = vector.shape_cast %17 : vector<1x96xf32> to vector<1x96xf32>
    %19 = vector.broadcast %18 : vector<1x96xf32> to vector<8x96xf32>
    %c0_21 = arith.constant 0 : index
    %c0_22 = arith.constant 0 : index
    %20 = vector.load %arg11[%c0_21, %c0_22] : memref<1x96xf32, #tpu.memory_space<vmem>>, vector<1x96xf32>
    %21 = vector.shape_cast %20 : vector<1x96xf32> to vector<1x96xf32>
    %22 = vector.broadcast %21 : vector<1x96xf32> to vector<8x96xf32>
    %c0_23 = arith.constant 0 : index
    %c0_24 = arith.constant 0 : index
    %23 = vector.load %arg8[%c0_23, %c0_24] : memref<32x96xbf16, #tpu.memory_space<vmem>>, vector<32x96xbf16>
    %c0_25 = arith.constant 0 : index
    %c0_26 = arith.constant 0 : index
    %24 = vector.load %arg9[%c0_25, %c0_26] : memref<32x96xbf16, #tpu.memory_space<vmem>>, vector<32x96xbf16>
    %cst_27 = arith.constant 0.000000e+00 : f32
    %25 = vector.broadcast %cst_27 : f32 to vector<8x32xf32>
    %c0_i32 = arith.constant 0 : i32
    %c3_i32 = arith.constant 3 : i32
    %26 = arith.subi %c3_i32, %c0_i32 : i32
    %27 = arith.index_cast %c0_i32 : i32 to index
    %c0_28 = arith.constant 0 : index
    %c0_29 = arith.constant 0 : index
    %28 = vector.load %arg24[%27, %c0_28, %c0_29] : memref<4x8x96xf32, #tpu.memory_space<vmem>>, vector<1x8x96xf32>
    %29 = vector.shape_cast %28 : vector<1x8x96xf32> to vector<8x96xf32>
    %30 = arith.index_cast %26 : i32 to index
    %c0_30 = arith.constant 0 : index
    %c0_31 = arith.constant 0 : index
    %31 = vector.load %arg25[%30, %c0_30, %c0_31] : memref<4x8x96xf32, #tpu.memory_space<vmem>>, vector<1x8x96xf32>
    %32 = vector.shape_cast %31 : vector<1x8x96xf32> to vector<8x96xf32>
    %33 = arith.truncf %25 : vector<8x32xf32> to vector<8x32xbf16>
    %cst_32 = arith.constant dense<0.000000e+00> : vector<8x96xf32>
    %34 = tpu.matmul %33, %23, %cst_32 {dimension_numbers = #tpu.dot_dimension_numbers<[1], [0], [0], [1], [0, 0, 1, 1], [], []>} : vector<8x32xbf16>, vector<32x96xbf16>, vector<8x96xf32> -> vector<8x96xf32>
    %35 = arith.addf %34, %19 : vector<8x96xf32>
    %36 = arith.truncf %25 : vector<8x32xf32> to vector<8x32xbf16>
    %cst_33 = arith.constant dense<0.000000e+00> : vector<8x96xf32>
    %37 = tpu.matmul %36, %24, %cst_33 {dimension_numbers = #tpu.dot_dimension_numbers<[1], [0], [0], [1], [0, 0, 1, 1], [], []>} : vector<8x32xbf16>, vector<32x96xbf16>, vector<8x96xf32> -> vector<8x96xf32>
    %38 = arith.addf %37, %22 : vector<8x96xf32>
    %39 = vector.extract_strided_slice %29 {offsets = [0, 0], sizes = [8, 32], strides = [1, 1]} : vector<8x96xf32> to vector<8x32xf32>
    %40 = vector.extract_strided_slice %35 {offsets = [0, 0], sizes = [8, 32], strides = [1, 1]} : vector<8x96xf32> to vector<8x32xf32>
    %41 = arith.addf %39, %40 : vector<8x32xf32>
    %42 = arith.negf %41 : vector<8x32xf32>
    %43 = math.exp %42 : vector<8x32xf32>
    %cst_34 = arith.constant 1.000000e+00 : f32
    %44 = vector.broadcast %cst_34 : f32 to vector<8x32xf32>
    %45 = arith.addf %44, %43 : vector<8x32xf32>
    %46 = arith.divf %44, %45 : vector<8x32xf32>
    %47 = vector.extract_strided_slice %29 {offsets = [0, 32], sizes = [8, 32], strides = [1, 1]} : vector<8x96xf32> to vector<8x32xf32>
    %48 = vector.extract_strided_slice %35 {offsets = [0, 32], sizes = [8, 32], strides = [1, 1]} : vector<8x96xf32> to vector<8x32xf32>
    %49 = arith.addf %47, %48 : vector<8x32xf32>
    %50 = arith.negf %49 : vector<8x32xf32>
    %51 = math.exp %50 : vector<8x32xf32>
    %cst_35 = arith.constant 1.000000e+00 : f32
    %52 = vector.broadcast %cst_35 : f32 to vector<8x32xf32>
    %53 = arith.addf %52, %51 : vector<8x32xf32>
    %54 = arith.divf %52, %53 : vector<8x32xf32>
    %55 = vector.extract_strided_slice %29 {offsets = [0, 64], sizes = [8, 32], strides = [1, 1]} : vector<8x96xf32> to vector<8x32xf32>
    %56 = vector.extract_strided_slice %35 {offsets = [0, 64], sizes = [8, 32], strides = [1, 1]} : vector<8x96xf32> to vector<8x32xf32>
    %57 = arith.mulf %46, %56 : vector<8x32xf32>
    %58 = arith.addf %55, %57 : vector<8x32xf32>
    %59 = math.tanh %58 : vector<8x32xf32>
    %60 = vector.extract_strided_slice %32 {offsets = [0, 0], sizes = [8, 32], strides = [1, 1]} : vector<8x96xf32> to vector<8x32xf32>
    %61 = vector.extract_strided_slice %38 {offsets = [0, 0], sizes = [8, 32], strides = [1, 1]} : vector<8x96xf32> to vector<8x32xf32>
    %62 = arith.addf %60, %61 : vector<8x32xf32>
    %63 = arith.negf %62 : vector<8x32xf32>
    %64 = math.exp %63 : vector<8x32xf32>
    %cst_36 = arith.constant 1.000000e+00 : f32
    %65 = vector.broadcast %cst_36 : f32 to vector<8x32xf32>
    %66 = arith.addf %65, %64 : vector<8x32xf32>
    %67 = arith.divf %65, %66 : vector<8x32xf32>
    %68 = vector.extract_strided_slice %32 {offsets = [0, 32], sizes = [8, 32], strides = [1, 1]} : vector<8x96xf32> to vector<8x32xf32>
    %69 = vector.extract_strided_slice %38 {offsets = [0, 32], sizes = [8, 32], strides = [1, 1]} : vector<8x96xf32> to vector<8x32xf32>
    %70 = arith.addf %68, %69 : vector<8x32xf32>
    %71 = arith.negf %70 : vector<8x32xf32>
    %72 = math.exp %71 : vector<8x32xf32>
    %cst_37 = arith.constant 1.000000e+00 : f32
    %73 = vector.broadcast %cst_37 : f32 to vector<8x32xf32>
    %74 = arith.addf %73, %72 : vector<8x32xf32>
    %75 = arith.divf %73, %74 : vector<8x32xf32>
    %76 = vector.extract_strided_slice %32 {offsets = [0, 64], sizes = [8, 32], strides = [1, 1]} : vector<8x96xf32> to vector<8x32xf32>
    %77 = vector.extract_strided_slice %38 {offsets = [0, 64], sizes = [8, 32], strides = [1, 1]} : vector<8x96xf32> to vector<8x32xf32>
    %78 = arith.mulf %67, %77 : vector<8x32xf32>
    %79 = arith.addf %76, %78 : vector<8x32xf32>
    %80 = math.tanh %79 : vector<8x32xf32>
    %cst_38 = arith.constant 1.000000e+00 : f32
    %81 = vector.broadcast %cst_38 : f32 to vector<8x32xf32>
    %82 = arith.subf %81, %54 : vector<8x32xf32>
    %83 = arith.mulf %82, %59 : vector<8x32xf32>
    %84 = arith.mulf %54, %25 : vector<8x32xf32>
    %85 = arith.addf %83, %84 : vector<8x32xf32>
    %cst_39 = arith.constant 1.000000e+00 : f32
    %86 = vector.broadcast %cst_39 : f32 to vector<8x32xf32>
    %87 = arith.subf %86, %75 : vector<8x32xf32>
    %88 = arith.mulf %87, %80 : vector<8x32xf32>
    %89 = arith.mulf %75, %25 : vector<8x32xf32>
    %90 = arith.addf %88, %89 : vector<8x32xf32>
    %91 = vector.broadcast %c0_i32 : i32 to vector<8x1xi32>
    %92 = arith.cmpi slt, %91, %16 : vector<8x1xi32>
    %93 = vector.broadcast %26 : i32 to vector<8x1xi32>
    %94 = arith.cmpi slt, %93, %16 : vector<8x1xi32>
    %95 = vector.shape_cast %92 : vector<8x1xi1> to vector<8x1xi1>
    %96 = vector.broadcast %95 : vector<8x1xi1> to vector<8x32xi1>
    %97 = arith.select %96, %85, %25 : vector<8x32xi1>, vector<8x32xf32>
    %98 = vector.shape_cast %94 : vector<8x1xi1> to vector<8x1xi1>
    %99 = vector.broadcast %98 : vector<8x1xi1> to vector<8x32xi1>
    %100 = arith.select %99, %90, %25 : vector<8x32xi1>, vector<8x32xf32>
    %cst_40 = arith.constant 0.000000e+00 : f32
    %101 = vector.shape_cast %92 : vector<8x1xi1> to vector<8x1xi1>
    %102 = vector.broadcast %101 : vector<8x1xi1> to vector<8x32xi1>
    %103 = vector.broadcast %cst_40 : f32 to vector<8x32xf32>
    %104 = arith.select %102, %97, %103 : vector<8x32xi1>, vector<8x32xf32>
    %105 = arith.index_cast %c0_i32 : i32 to index
    %c0_41 = arith.constant 0 : index
    %c0_42 = arith.constant 0 : index
    %106 = vector.load %arg26[%105, %c0_41, %c0_42] : memref<4x8x32xf32, #tpu.memory_space<vmem>>, vector<1x8x32xf32>
    %107 = vector.shape_cast %106 : vector<1x8x32xf32> to vector<8x32xf32>
    %108 = vector.shape_cast %104 : vector<8x32xf32> to vector<1x8x32xf32>
    tpu.vector_store %arg26[%105, %c0_41, %c0_42], %108 {strides = array<i32>} : memref<4x8x32xf32, #tpu.memory_space<vmem>>, vector<1x8x32xf32>,
    %cst_43 = arith.constant 0.000000e+00 : f32
    %109 = vector.shape_cast %94 : vector<8x1xi1> to vector<8x1xi1>
    %110 = vector.broadcast %109 : vector<8x1xi1> to vector<8x32xi1>
    %111 = vector.broadcast %cst_43 : f32 to vector<8x32xf32>
    %112 = arith.select %110, %100, %111 : vector<8x32xi1>, vector<8x32xf32>
    %113 = arith.index_cast %26 : i32 to index
    %c0_44 = arith.constant 0 : index
    %c0_45 = arith.constant 0 : index
    %114 = vector.load %arg27[%113, %c0_44, %c0_45] : memref<4x8x32xf32, #tpu.memory_space<vmem>>, vector<1x8x32xf32>
    %115 = vector.shape_cast %114 : vector<1x8x32xf32> to vector<8x32xf32>
    %116 = vector.shape_cast %112 : vector<8x32xf32> to vector<1x8x32xf32>
    tpu.vector_store %arg27[%113, %c0_44, %c0_45], %116 {strides = array<i32>} : memref<4x8x32xf32, #tpu.memory_space<vmem>>, vector<1x8x32xf32>,
    %c1_i32 = arith.constant 1 : i32
    %c3_i32_46 = arith.constant 3 : i32
    %117 = arith.subi %c3_i32_46, %c1_i32 : i32
    %118 = arith.index_cast %c1_i32 : i32 to index
    %c0_47 = arith.constant 0 : index
    %c0_48 = arith.constant 0 : index
    %119 = vector.load %arg24[%118, %c0_47, %c0_48] : memref<4x8x96xf32, #tpu.memory_space<vmem>>, vector<1x8x96xf32>
    %120 = vector.shape_cast %119 : vector<1x8x96xf32> to vector<8x96xf32>
    %121 = arith.index_cast %117 : i32 to index
    %c0_49 = arith.constant 0 : index
    %c0_50 = arith.constant 0 : index
    %122 = vector.load %arg25[%121, %c0_49, %c0_50] : memref<4x8x96xf32, #tpu.memory_space<vmem>>, vector<1x8x96xf32>
    %123 = vector.shape_cast %122 : vector<1x8x96xf32> to vector<8x96xf32>
    %124 = arith.truncf %97 : vector<8x32xf32> to vector<8x32xbf16>
    %cst_51 = arith.constant dense<0.000000e+00> : vector<8x96xf32>
    %125 = tpu.matmul %124, %23, %cst_51 {dimension_numbers = #tpu.dot_dimension_numbers<[1], [0], [0], [1], [0, 0, 1, 1], [], []>} : vector<8x32xbf16>, vector<32x96xbf16>, vector<8x96xf32> -> vector<8x96xf32>
    %126 = arith.addf %125, %19 : vector<8x96xf32>
    %127 = arith.truncf %100 : vector<8x32xf32> to vector<8x32xbf16>
    %cst_52 = arith.constant dense<0.000000e+00> : vector<8x96xf32>
    %128 = tpu.matmul %127, %24, %cst_52 {dimension_numbers = #tpu.dot_dimension_numbers<[1], [0], [0], [1], [0, 0, 1, 1], [], []>} : vector<8x32xbf16>, vector<32x96xbf16>, vector<8x96xf32> -> vector<8x96xf32>
    %129 = arith.addf %128, %22 : vector<8x96xf32>
    %130 = vector.extract_strided_slice %120 {offsets = [0, 0], sizes = [8, 32], strides = [1, 1]} : vector<8x96xf32> to vector<8x32xf32>
    %131 = vector.extract_strided_slice %126 {offsets = [0, 0], sizes = [8, 32], strides = [1, 1]} : vector<8x96xf32> to vector<8x32xf32>
    %132 = arith.addf %130, %131 : vector<8x32xf32>
    %133 = arith.negf %132 : vector<8x32xf32>
    %134 = math.exp %133 : vector<8x32xf32>
    %cst_53 = arith.constant 1.000000e+00 : f32
    %135 = vector.broadcast %cst_53 : f32 to vector<8x32xf32>
    %136 = arith.addf %135, %134 : vector<8x32xf32>
    %137 = arith.divf %135, %136 : vector<8x32xf32>
    %138 = vector.extract_strided_slice %120 {offsets = [0, 32], sizes = [8, 32], strides = [1, 1]} : vector<8x96xf32> to vector<8x32xf32>
    %139 = vector.extract_strided_slice %126 {offsets = [0, 32], sizes = [8, 32], strides = [1, 1]} : vector<8x96xf32> to vector<8x32xf32>
    %140 = arith.addf %138, %139 : vector<8x32xf32>
    %141 = arith.negf %140 : vector<8x32xf32>
    %142 = math.exp %141 : vector<8x32xf32>
    %cst_54 = arith.constant 1.000000e+00 : f32
    %143 = vector.broadcast %cst_54 : f32 to vector<8x32xf32>
    %144 = arith.addf %143, %142 : vector<8x32xf32>
    %145 = arith.divf %143, %144 : vector<8x32xf32>
    %146 = vector.extract_strided_slice %120 {offsets = [0, 64], sizes = [8, 32], strides = [1, 1]} : vector<8x96xf32> to vector<8x32xf32>
    %147 = vector.extract_strided_slice %126 {offsets = [0, 64], sizes = [8, 32], strides = [1, 1]} : vector<8x96xf32> to vector<8x32xf32>
    %148 = arith.mulf %137, %147 : vector<8x32xf32>
    %149 = arith.addf %146, %148 : vector<8x32xf32>
    %150 = math.tanh %149 : vector<8x32xf32>
    %151 = vector.extract_strided_slice %123 {offsets = [0, 0], sizes = [8, 32], strides = [1, 1]} : vector<8x96xf32> to vector<8x32xf32>
    %152 = vector.extract_strided_slice %129 {offsets = [0, 0], sizes = [8, 32], strides = [1, 1]} : vector<8x96xf32> to vector<8x32xf32>
    %153 = arith.addf %151, %152 : vector<8x32xf32>
    %154 = arith.negf %153 : vector<8x32xf32>
    %155 = math.exp %154 : vector<8x32xf32>
    %cst_55 = arith.constant 1.000000e+00 : f32
    %156 = vector.broadcast %cst_55 : f32 to vector<8x32xf32>
    %157 = arith.addf %156, %155 : vector<8x32xf32>
    %158 = arith.divf %156, %157 : vector<8x32xf32>
    %159 = vector.extract_strided_slice %123 {offsets = [0, 32], sizes = [8, 32], strides = [1, 1]} : vector<8x96xf32> to vector<8x32xf32>
    %160 = vector.extract_strided_slice %129 {offsets = [0, 32], sizes = [8, 32], strides = [1, 1]} : vector<8x96xf32> to vector<8x32xf32>
    %161 = arith.addf %159, %160 : vector<8x32xf32>
    %162 = arith.negf %161 : vector<8x32xf32>
    %163 = math.exp %162 : vector<8x32xf32>
    %cst_56 = arith.constant 1.000000e+00 : f32
    %164 = vector.broadcast %cst_56 : f32 to vector<8x32xf32>
    %165 = arith.addf %164, %163 : vector<8x32xf32>
    %166 = arith.divf %164, %165 : vector<8x32xf32>
    %167 = vector.extract_strided_slice %123 {offsets = [0, 64], sizes = [8, 32], strides = [1, 1]} : vector<8x96xf32> to vector<8x32xf32>
    %168 = vector.extract_strided_slice %129 {offsets = [0, 64], sizes = [8, 32], strides = [1, 1]} : vector<8x96xf32> to vector<8x32xf32>
    %169 = arith.mulf %158, %168 : vector<8x32xf32>
    %170 = arith.addf %167, %169 : vector<8x32xf32>
    %171 = math.tanh %170 : vector<8x32xf32>
    %cst_57 = arith.constant 1.000000e+00 : f32
    %172 = vector.broadcast %cst_57 : f32 to vector<8x32xf32>
    %173 = arith.subf %172, %145 : vector<8x32xf32>
    %174 = arith.mulf %173, %150 : vector<8x32xf32>
    %175 = arith.mulf %145, %97 : vector<8x32xf32>
    %176 = arith.addf %174, %175 : vector<8x32xf32>
    %cst_58 = arith.constant 1.000000e+00 : f32
    %177 = vector.broadcast %cst_58 : f32 to vector<8x32xf32>
    %178 = arith.subf %177, %166 : vector<8x32xf32>
    %179 = arith.mulf %178, %171 : vector<8x32xf32>
    %180 = arith.mulf %166, %100 : vector<8x32xf32>
    %181 = arith.addf %179, %180 : vector<8x32xf32>
    %182 = vector.broadcast %c1_i32 : i32 to vector<8x1xi32>
    %183 = arith.cmpi slt, %182, %16 : vector<8x1xi32>
    %184 = vector.broadcast %117 : i32 to vector<8x1xi32>
    %185 = arith.cmpi slt, %184, %16 : vector<8x1xi32>
    %186 = vector.shape_cast %183 : vector<8x1xi1> to vector<8x1xi1>
    %187 = vector.broadcast %186 : vector<8x1xi1> to vector<8x32xi1>
    %188 = arith.select %187, %176, %97 : vector<8x32xi1>, vector<8x32xf32>
    %189 = vector.shape_cast %185 : vector<8x1xi1> to vector<8x1xi1>
    %190 = vector.broadcast %189 : vector<8x1xi1> to vector<8x32xi1>
    %191 = arith.select %190, %181, %100 : vector<8x32xi1>, vector<8x32xf32>
    %cst_59 = arith.constant 0.000000e+00 : f32
    %192 = vector.shape_cast %183 : vector<8x1xi1> to vector<8x1xi1>
    %193 = vector.broadcast %192 : vector<8x1xi1> to vector<8x32xi1>
    %194 = vector.broadcast %cst_59 : f32 to vector<8x32xf32>
    %195 = arith.select %193, %188, %194 : vector<8x32xi1>, vector<8x32xf32>
    %196 = arith.index_cast %c1_i32 : i32 to index
    %c0_60 = arith.constant 0 : index
    %c0_61 = arith.constant 0 : index
    %197 = vector.load %arg26[%196, %c0_60, %c0_61] : memref<4x8x32xf32, #tpu.memory_space<vmem>>, vector<1x8x32xf32>
    %198 = vector.shape_cast %197 : vector<1x8x32xf32> to vector<8x32xf32>
    %199 = vector.shape_cast %195 : vector<8x32xf32> to vector<1x8x32xf32>
    tpu.vector_store %arg26[%196, %c0_60, %c0_61], %199 {strides = array<i32>} : memref<4x8x32xf32, #tpu.memory_space<vmem>>, vector<1x8x32xf32>,
    %cst_62 = arith.constant 0.000000e+00 : f32
    %200 = vector.shape_cast %185 : vector<8x1xi1> to vector<8x1xi1>
    %201 = vector.broadcast %200 : vector<8x1xi1> to vector<8x32xi1>
    %202 = vector.broadcast %cst_62 : f32 to vector<8x32xf32>
    %203 = arith.select %201, %191, %202 : vector<8x32xi1>, vector<8x32xf32>
    %204 = arith.index_cast %117 : i32 to index
    %c0_63 = arith.constant 0 : index
    %c0_64 = arith.constant 0 : index
    %205 = vector.load %arg27[%204, %c0_63, %c0_64] : memref<4x8x32xf32, #tpu.memory_space<vmem>>, vector<1x8x32xf32>
    %206 = vector.shape_cast %205 : vector<1x8x32xf32> to vector<8x32xf32>
    %207 = vector.shape_cast %203 : vector<8x32xf32> to vector<1x8x32xf32>
    tpu.vector_store %arg27[%204, %c0_63, %c0_64], %207 {strides = array<i32>} : memref<4x8x32xf32, #tpu.memory_space<vmem>>, vector<1x8x32xf32>,
    %c2_i32 = arith.constant 2 : i32
    %c3_i32_65 = arith.constant 3 : i32
    %208 = arith.subi %c3_i32_65, %c2_i32 : i32
    %209 = arith.index_cast %c2_i32 : i32 to index
    %c0_66 = arith.constant 0 : index
    %c0_67 = arith.constant 0 : index
    %210 = vector.load %arg24[%209, %c0_66, %c0_67] : memref<4x8x96xf32, #tpu.memory_space<vmem>>, vector<1x8x96xf32>
    %211 = vector.shape_cast %210 : vector<1x8x96xf32> to vector<8x96xf32>
    %212 = arith.index_cast %208 : i32 to index
    %c0_68 = arith.constant 0 : index
    %c0_69 = arith.constant 0 : index
    %213 = vector.load %arg25[%212, %c0_68, %c0_69] : memref<4x8x96xf32, #tpu.memory_space<vmem>>, vector<1x8x96xf32>
    %214 = vector.shape_cast %213 : vector<1x8x96xf32> to vector<8x96xf32>
    %215 = arith.truncf %188 : vector<8x32xf32> to vector<8x32xbf16>
    %cst_70 = arith.constant dense<0.000000e+00> : vector<8x96xf32>
    %216 = tpu.matmul %215, %23, %cst_70 {dimension_numbers = #tpu.dot_dimension_numbers<[1], [0], [0], [1], [0, 0, 1, 1], [], []>} : vector<8x32xbf16>, vector<32x96xbf16>, vector<8x96xf32> -> vector<8x96xf32>
    %217 = arith.addf %216, %19 : vector<8x96xf32>
    %218 = arith.truncf %191 : vector<8x32xf32> to vector<8x32xbf16>
    %cst_71 = arith.constant dense<0.000000e+00> : vector<8x96xf32>
    %219 = tpu.matmul %218, %24, %cst_71 {dimension_numbers = #tpu.dot_dimension_numbers<[1], [0], [0], [1], [0, 0, 1, 1], [], []>} : vector<8x32xbf16>, vector<32x96xbf16>, vector<8x96xf32> -> vector<8x96xf32>
    %220 = arith.addf %219, %22 : vector<8x96xf32>
    %221 = vector.extract_strided_slice %211 {offsets = [0, 0], sizes = [8, 32], strides = [1, 1]} : vector<8x96xf32> to vector<8x32xf32>
    %222 = vector.extract_strided_slice %217 {offsets = [0, 0], sizes = [8, 32], strides = [1, 1]} : vector<8x96xf32> to vector<8x32xf32>
    %223 = arith.addf %221, %222 : vector<8x32xf32>
    %224 = arith.negf %223 : vector<8x32xf32>
    %225 = math.exp %224 : vector<8x32xf32>
    %cst_72 = arith.constant 1.000000e+00 : f32
    %226 = vector.broadcast %cst_72 : f32 to vector<8x32xf32>
    %227 = arith.addf %226, %225 : vector<8x32xf32>
    %228 = arith.divf %226, %227 : vector<8x32xf32>
    %229 = vector.extract_strided_slice %211 {offsets = [0, 32], sizes = [8, 32], strides = [1, 1]} : vector<8x96xf32> to vector<8x32xf32>
    %230 = vector.extract_strided_slice %217 {offsets = [0, 32], sizes = [8, 32], strides = [1, 1]} : vector<8x96xf32> to vector<8x32xf32>
    %231 = arith.addf %229, %230 : vector<8x32xf32>
    %232 = arith.negf %231 : vector<8x32xf32>
    %233 = math.exp %232 : vector<8x32xf32>
    %cst_73 = arith.constant 1.000000e+00 : f32
    %234 = vector.broadcast %cst_73 : f32 to vector<8x32xf32>
    %235 = arith.addf %234, %233 : vector<8x32xf32>
    %236 = arith.divf %234, %235 : vector<8x32xf32>
    %237 = vector.extract_strided_slice %211 {offsets = [0, 64], sizes = [8, 32], strides = [1, 1]} : vector<8x96xf32> to vector<8x32xf32>
    %238 = vector.extract_strided_slice %217 {offsets = [0, 64], sizes = [8, 32], strides = [1, 1]} : vector<8x96xf32> to vector<8x32xf32>
    %239 = arith.mulf %228, %238 : vector<8x32xf32>
    %240 = arith.addf %237, %239 : vector<8x32xf32>
    %241 = math.tanh %240 : vector<8x32xf32>
    %242 = vector.extract_strided_slice %214 {offsets = [0, 0], sizes = [8, 32], strides = [1, 1]} : vector<8x96xf32> to vector<8x32xf32>
    %243 = vector.extract_strided_slice %220 {offsets = [0, 0], sizes = [8, 32], strides = [1, 1]} : vector<8x96xf32> to vector<8x32xf32>
    %244 = arith.addf %242, %243 : vector<8x32xf32>
    %245 = arith.negf %244 : vector<8x32xf32>
    %246 = math.exp %245 : vector<8x32xf32>
    %cst_74 = arith.constant 1.000000e+00 : f32
    %247 = vector.broadcast %cst_74 : f32 to vector<8x32xf32>
    %248 = arith.addf %247, %246 : vector<8x32xf32>
    %249 = arith.divf %247, %248 : vector<8x32xf32>
    %250 = vector.extract_strided_slice %214 {offsets = [0, 32], sizes = [8, 32], strides = [1, 1]} : vector<8x96xf32> to vector<8x32xf32>
    %251 = vector.extract_strided_slice %220 {offsets = [0, 32], sizes = [8, 32], strides = [1, 1]} : vector<8x96xf32> to vector<8x32xf32>
    %252 = arith.addf %250, %251 : vector<8x32xf32>
    %253 = arith.negf %252 : vector<8x32xf32>
    %254 = math.exp %253 : vector<8x32xf32>
    %cst_75 = arith.constant 1.000000e+00 : f32
    %255 = vector.broadcast %cst_75 : f32 to vector<8x32xf32>
    %256 = arith.addf %255, %254 : vector<8x32xf32>
    %257 = arith.divf %255, %256 : vector<8x32xf32>
    %258 = vector.extract_strided_slice %214 {offsets = [0, 64], sizes = [8, 32], strides = [1, 1]} : vector<8x96xf32> to vector<8x32xf32>
    %259 = vector.extract_strided_slice %220 {offsets = [0, 64], sizes = [8, 32], strides = [1, 1]} : vector<8x96xf32> to vector<8x32xf32>
    %260 = arith.mulf %249, %259 : vector<8x32xf32>
    %261 = arith.addf %258, %260 : vector<8x32xf32>
    %262 = math.tanh %261 : vector<8x32xf32>
    %cst_76 = arith.constant 1.000000e+00 : f32
    %263 = vector.broadcast %cst_76 : f32 to vector<8x32xf32>
    %264 = arith.subf %263, %236 : vector<8x32xf32>
    %265 = arith.mulf %264, %241 : vector<8x32xf32>
    %266 = arith.mulf %236, %188 : vector<8x32xf32>
    %267 = arith.addf %265, %266 : vector<8x32xf32>
    %cst_77 = arith.constant 1.000000e+00 : f32
    %268 = vector.broadcast %cst_77 : f32 to vector<8x32xf32>
    %269 = arith.subf %268, %257 : vector<8x32xf32>
    %270 = arith.mulf %269, %262 : vector<8x32xf32>
    %271 = arith.mulf %257, %191 : vector<8x32xf32>
    %272 = arith.addf %270, %271 : vector<8x32xf32>
    %273 = vector.broadcast %c2_i32 : i32 to vector<8x1xi32>
    %274 = arith.cmpi slt, %273, %16 : vector<8x1xi32>
    %275 = vector.broadcast %208 : i32 to vector<8x1xi32>
    %276 = arith.cmpi slt, %275, %16 : vector<8x1xi32>
    %277 = vector.shape_cast %274 : vector<8x1xi1> to vector<8x1xi1>
    %278 = vector.broadcast %277 : vector<8x1xi1> to vector<8x32xi1>
    %279 = arith.select %278, %267, %188 : vector<8x32xi1>, vector<8x32xf32>
    %280 = vector.shape_cast %276 : vector<8x1xi1> to vector<8x1xi1>
    %281 = vector.broadcast %280 : vector<8x1xi1> to vector<8x32xi1>
    %282 = arith.select %281, %272, %191 : vector<8x32xi1>, vector<8x32xf32>
    %cst_78 = arith.constant 0.000000e+00 : f32
    %283 = vector.shape_cast %274 : vector<8x1xi1> to vector<8x1xi1>
    %284 = vector.broadcast %283 : vector<8x1xi1> to vector<8x32xi1>
    %285 = vector.broadcast %cst_78 : f32 to vector<8x32xf32>
    %286 = arith.select %284, %279, %285 : vector<8x32xi1>, vector<8x32xf32>
    %287 = arith.index_cast %c2_i32 : i32 to index
    %c0_79 = arith.constant 0 : index
    %c0_80 = arith.constant 0 : index
    %288 = vector.load %arg26[%287, %c0_79, %c0_80] : memref<4x8x32xf32, #tpu.memory_space<vmem>>, vector<1x8x32xf32>
    %289 = vector.shape_cast %288 : vector<1x8x32xf32> to vector<8x32xf32>
    %290 = vector.shape_cast %286 : vector<8x32xf32> to vector<1x8x32xf32>
    tpu.vector_store %arg26[%287, %c0_79, %c0_80], %290 {strides = array<i32>} : memref<4x8x32xf32, #tpu.memory_space<vmem>>, vector<1x8x32xf32>,
    %cst_81 = arith.constant 0.000000e+00 : f32
    %291 = vector.shape_cast %276 : vector<8x1xi1> to vector<8x1xi1>
    %292 = vector.broadcast %291 : vector<8x1xi1> to vector<8x32xi1>
    %293 = vector.broadcast %cst_81 : f32 to vector<8x32xf32>
    %294 = arith.select %292, %282, %293 : vector<8x32xi1>, vector<8x32xf32>
    %295 = arith.index_cast %208 : i32 to index
    %c0_82 = arith.constant 0 : index
    %c0_83 = arith.constant 0 : index
    %296 = vector.load %arg27[%295, %c0_82, %c0_83] : memref<4x8x32xf32, #tpu.memory_space<vmem>>, vector<1x8x32xf32>
    %297 = vector.shape_cast %296 : vector<1x8x32xf32> to vector<8x32xf32>
    %298 = vector.shape_cast %294 : vector<8x32xf32> to vector<1x8x32xf32>
    tpu.vector_store %arg27[%295, %c0_82, %c0_83], %298 {strides = array<i32>} : memref<4x8x32xf32, #tpu.memory_space<vmem>>, vector<1x8x32xf32>,
    %c3_i32_84 = arith.constant 3 : i32
    %c3_i32_85 = arith.constant 3 : i32
    %299 = arith.subi %c3_i32_85, %c3_i32_84 : i32
    %300 = arith.index_cast %c3_i32_84 : i32 to index
    %c0_86 = arith.constant 0 : index
    %c0_87 = arith.constant 0 : index
    %301 = vector.load %arg24[%300, %c0_86, %c0_87] : memref<4x8x96xf32, #tpu.memory_space<vmem>>, vector<1x8x96xf32>
    %302 = vector.shape_cast %301 : vector<1x8x96xf32> to vector<8x96xf32>
    %303 = arith.index_cast %299 : i32 to index
    %c0_88 = arith.constant 0 : index
    %c0_89 = arith.constant 0 : index
    %304 = vector.load %arg25[%303, %c0_88, %c0_89] : memref<4x8x96xf32, #tpu.memory_space<vmem>>, vector<1x8x96xf32>
    %305 = vector.shape_cast %304 : vector<1x8x96xf32> to vector<8x96xf32>
    %306 = arith.truncf %279 : vector<8x32xf32> to vector<8x32xbf16>
    %cst_90 = arith.constant dense<0.000000e+00> : vector<8x96xf32>
    %307 = tpu.matmul %306, %23, %cst_90 {dimension_numbers = #tpu.dot_dimension_numbers<[1], [0], [0], [1], [0, 0, 1, 1], [], []>} : vector<8x32xbf16>, vector<32x96xbf16>, vector<8x96xf32> -> vector<8x96xf32>
    %308 = arith.addf %307, %19 : vector<8x96xf32>
    %309 = arith.truncf %282 : vector<8x32xf32> to vector<8x32xbf16>
    %cst_91 = arith.constant dense<0.000000e+00> : vector<8x96xf32>
    %310 = tpu.matmul %309, %24, %cst_91 {dimension_numbers = #tpu.dot_dimension_numbers<[1], [0], [0], [1], [0, 0, 1, 1], [], []>} : vector<8x32xbf16>, vector<32x96xbf16>, vector<8x96xf32> -> vector<8x96xf32>
    %311 = arith.addf %310, %22 : vector<8x96xf32>
    %312 = vector.extract_strided_slice %302 {offsets = [0, 0], sizes = [8, 32], strides = [1, 1]} : vector<8x96xf32> to vector<8x32xf32>
    %313 = vector.extract_strided_slice %308 {offsets = [0, 0], sizes = [8, 32], strides = [1, 1]} : vector<8x96xf32> to vector<8x32xf32>
    %314 = arith.addf %312, %313 : vector<8x32xf32>
    %315 = arith.negf %314 : vector<8x32xf32>
    %316 = math.exp %315 : vector<8x32xf32>
    %cst_92 = arith.constant 1.000000e+00 : f32
    %317 = vector.broadcast %cst_92 : f32 to vector<8x32xf32>
    %318 = arith.addf %317, %316 : vector<8x32xf32>
    %319 = arith.divf %317, %318 : vector<8x32xf32>
    %320 = vector.extract_strided_slice %302 {offsets = [0, 32], sizes = [8, 32], strides = [1, 1]} : vector<8x96xf32> to vector<8x32xf32>
    %321 = vector.extract_strided_slice %308 {offsets = [0, 32], sizes = [8, 32], strides = [1, 1]} : vector<8x96xf32> to vector<8x32xf32>
    %322 = arith.addf %320, %321 : vector<8x32xf32>
    %323 = arith.negf %322 : vector<8x32xf32>
    %324 = math.exp %323 : vector<8x32xf32>
    %cst_93 = arith.constant 1.000000e+00 : f32
    %325 = vector.broadcast %cst_93 : f32 to vector<8x32xf32>
    %326 = arith.addf %325, %324 : vector<8x32xf32>
    %327 = arith.divf %325, %326 : vector<8x32xf32>
    %328 = vector.extract_strided_slice %302 {offsets = [0, 64], sizes = [8, 32], strides = [1, 1]} : vector<8x96xf32> to vector<8x32xf32>
    %329 = vector.extract_strided_slice %308 {offsets = [0, 64], sizes = [8, 32], strides = [1, 1]} : vector<8x96xf32> to vector<8x32xf32>
    %330 = arith.mulf %319, %329 : vector<8x32xf32>
    %331 = arith.addf %328, %330 : vector<8x32xf32>
    %332 = math.tanh %331 : vector<8x32xf32>
    %333 = vector.extract_strided_slice %305 {offsets = [0, 0], sizes = [8, 32], strides = [1, 1]} : vector<8x96xf32> to vector<8x32xf32>
    %334 = vector.extract_strided_slice %311 {offsets = [0, 0], sizes = [8, 32], strides = [1, 1]} : vector<8x96xf32> to vector<8x32xf32>
    %335 = arith.addf %333, %334 : vector<8x32xf32>
    %336 = arith.negf %335 : vector<8x32xf32>
    %337 = math.exp %336 : vector<8x32xf32>
    %cst_94 = arith.constant 1.000000e+00 : f32
    %338 = vector.broadcast %cst_94 : f32 to vector<8x32xf32>
    %339 = arith.addf %338, %337 : vector<8x32xf32>
    %340 = arith.divf %338, %339 : vector<8x32xf32>
    %341 = vector.extract_strided_slice %305 {offsets = [0, 32], sizes = [8, 32], strides = [1, 1]} : vector<8x96xf32> to vector<8x32xf32>
    %342 = vector.extract_strided_slice %311 {offsets = [0, 32], sizes = [8, 32], strides = [1, 1]} : vector<8x96xf32> to vector<8x32xf32>
    %343 = arith.addf %341, %342 : vector<8x32xf32>
    %344 = arith.negf %343 : vector<8x32xf32>
    %345 = math.exp %344 : vector<8x32xf32>
    %cst_95 = arith.constant 1.000000e+00 : f32
    %346 = vector.broadcast %cst_95 : f32 to vector<8x32xf32>
    %347 = arith.addf %346, %345 : vector<8x32xf32>
    %348 = arith.divf %346, %347 : vector<8x32xf32>
    %349 = vector.extract_strided_slice %305 {offsets = [0, 64], sizes = [8, 32], strides = [1, 1]} : vector<8x96xf32> to vector<8x32xf32>
    %350 = vector.extract_strided_slice %311 {offsets = [0, 64], sizes = [8, 32], strides = [1, 1]} : vector<8x96xf32> to vector<8x32xf32>
    %351 = arith.mulf %340, %350 : vector<8x32xf32>
    %352 = arith.addf %349, %351 : vector<8x32xf32>
    %353 = math.tanh %352 : vector<8x32xf32>
    %cst_96 = arith.constant 1.000000e+00 : f32
    %354 = vector.broadcast %cst_96 : f32 to vector<8x32xf32>
    %355 = arith.subf %354, %327 : vector<8x32xf32>
    %356 = arith.mulf %355, %332 : vector<8x32xf32>
    %357 = arith.mulf %327, %279 : vector<8x32xf32>
    %358 = arith.addf %356, %357 : vector<8x32xf32>
    %cst_97 = arith.constant 1.000000e+00 : f32
    %359 = vector.broadcast %cst_97 : f32 to vector<8x32xf32>
    %360 = arith.subf %359, %348 : vector<8x32xf32>
    %361 = arith.mulf %360, %353 : vector<8x32xf32>
    %362 = arith.mulf %348, %282 : vector<8x32xf32>
    %363 = arith.addf %361, %362 : vector<8x32xf32>
    %364 = vector.broadcast %c3_i32_84 : i32 to vector<8x1xi32>
    %365 = arith.cmpi slt, %364, %16 : vector<8x1xi32>
    %366 = vector.broadcast %299 : i32 to vector<8x1xi32>
    %367 = arith.cmpi slt, %366, %16 : vector<8x1xi32>
    %368 = vector.shape_cast %365 : vector<8x1xi1> to vector<8x1xi1>
    %369 = vector.broadcast %368 : vector<8x1xi1> to vector<8x32xi1>
    %370 = arith.select %369, %358, %279 : vector<8x32xi1>, vector<8x32xf32>
    %371 = vector.shape_cast %367 : vector<8x1xi1> to vector<8x1xi1>
    %372 = vector.broadcast %371 : vector<8x1xi1> to vector<8x32xi1>
    %373 = arith.select %372, %363, %282 : vector<8x32xi1>, vector<8x32xf32>
    %cst_98 = arith.constant 0.000000e+00 : f32
    %374 = vector.shape_cast %365 : vector<8x1xi1> to vector<8x1xi1>
    %375 = vector.broadcast %374 : vector<8x1xi1> to vector<8x32xi1>
    %376 = vector.broadcast %cst_98 : f32 to vector<8x32xf32>
    %377 = arith.select %375, %370, %376 : vector<8x32xi1>, vector<8x32xf32>
    %378 = arith.index_cast %c3_i32_84 : i32 to index
    %c0_99 = arith.constant 0 : index
    %c0_100 = arith.constant 0 : index
    %379 = vector.load %arg26[%378, %c0_99, %c0_100] : memref<4x8x32xf32, #tpu.memory_space<vmem>>, vector<1x8x32xf32>
    %380 = vector.shape_cast %379 : vector<1x8x32xf32> to vector<8x32xf32>
    %381 = vector.shape_cast %377 : vector<8x32xf32> to vector<1x8x32xf32>
    tpu.vector_store %arg26[%378, %c0_99, %c0_100], %381 {strides = array<i32>} : memref<4x8x32xf32, #tpu.memory_space<vmem>>, vector<1x8x32xf32>,
    %cst_101 = arith.constant 0.000000e+00 : f32
    %382 = vector.shape_cast %367 : vector<8x1xi1> to vector<8x1xi1>
    %383 = vector.broadcast %382 : vector<8x1xi1> to vector<8x32xi1>
    %384 = vector.broadcast %cst_101 : f32 to vector<8x32xf32>
    %385 = arith.select %383, %373, %384 : vector<8x32xi1>, vector<8x32xf32>
    %386 = arith.index_cast %299 : i32 to index
    %c0_102 = arith.constant 0 : index
    %c0_103 = arith.constant 0 : index
    %387 = vector.load %arg27[%386, %c0_102, %c0_103] : memref<4x8x32xf32, #tpu.memory_space<vmem>>, vector<1x8x32xf32>
    %388 = vector.shape_cast %387 : vector<1x8x32xf32> to vector<8x32xf32>
    %389 = vector.shape_cast %385 : vector<8x32xf32> to vector<1x8x32xf32>
    tpu.vector_store %arg27[%386, %c0_102, %c0_103], %389 {strides = array<i32>} : memref<4x8x32xf32, #tpu.memory_space<vmem>>, vector<1x8x32xf32>,
    %c4_i32 = arith.constant 4 : i32
    %c0_104 = arith.constant 0 : index
    %c0_105 = arith.constant 0 : index
    %c0_106 = arith.constant 0 : index
    %390 = vector.load %arg26[%c0_104, %c0_105, %c0_106] : memref<4x8x32xf32, #tpu.memory_space<vmem>>, vector<4x8x32xf32>
    %c0_107 = arith.constant 0 : index
    %c0_108 = arith.constant 0 : index
    %c0_109 = arith.constant 0 : index
    %391 = vector.load %arg27[%c0_107, %c0_108, %c0_109] : memref<4x8x32xf32, #tpu.memory_space<vmem>>, vector<4x8x32xf32>
    %392 = vector.shape_cast %390 : vector<4x8x32xf32> to vector<32x32xf32>
    %393 = arith.truncf %392 : vector<32x32xf32> to vector<32x32xbf16>
    %394 = vector.shape_cast %391 : vector<4x8x32xf32> to vector<32x32xf32>
    %395 = arith.truncf %394 : vector<32x32xf32> to vector<32x32xbf16>
    %c0_110 = arith.constant 0 : index
    %c0_111 = arith.constant 0 : index
    %396 = vector.load %arg12[%c0_110, %c0_111] : memref<32x64xbf16, #tpu.memory_space<vmem>>, vector<32x64xbf16>
    %cst_112 = arith.constant dense<0.000000e+00> : vector<32x64xf32>
    %397 = tpu.matmul %393, %396, %cst_112 {dimension_numbers = #tpu.dot_dimension_numbers<[1], [0], [0], [1], [0, 0, 1, 1], [], []>} : vector<32x32xbf16>, vector<32x64xbf16>, vector<32x64xf32> -> vector<32x64xf32>
    %c0_113 = arith.constant 0 : index
    %c0_114 = arith.constant 0 : index
    %398 = vector.load %arg13[%c0_113, %c0_114] : memref<32x64xbf16, #tpu.memory_space<vmem>>, vector<32x64xbf16>
    %cst_115 = arith.constant dense<0.000000e+00> : vector<32x64xf32>
    %399 = tpu.matmul %395, %398, %cst_115 {dimension_numbers = #tpu.dot_dimension_numbers<[1], [0], [0], [1], [0, 0, 1, 1], [], []>} : vector<32x32xbf16>, vector<32x64xbf16>, vector<32x64xf32> -> vector<32x64xf32>
    %400 = arith.addf %397, %399 : vector<32x64xf32>
    %c0_116 = arith.constant 0 : index
    %c0_117 = arith.constant 0 : index
    %401 = vector.load %arg14[%c0_116, %c0_117] : memref<1x64xf32, #tpu.memory_space<vmem>>, vector<1x64xf32>
    %402 = vector.broadcast %401 : vector<1x64xf32> to vector<32x64xf32>
    %403 = arith.addf %400, %402 : vector<32x64xf32>
    %404 = math.tanh %403 : vector<32x64xf32>
    %405 = vector.shape_cast %404 : vector<32x64xf32> to vector<4x8x64xf32>
    %c0_118 = arith.constant 0 : index
    %c0_119 = arith.constant 0 : index
    %c0_120 = arith.constant 0 : index
    %406 = vector.load %arg15[%c0_118, %c0_119, %c0_120] : memref<1x1x64xf32, #tpu.memory_space<vmem>>, vector<1x1x64xf32>
    %407 = vector.broadcast %406 : vector<1x1x64xf32> to vector<4x8x64xf32>
    %408 = arith.mulf %405, %407 : vector<4x8x64xf32>
    %cst_121 = arith.constant dense<0.000000e+00> : vector<4x8xf32>
    %409 = vector.multi_reduction <add>, %408, %cst_121 [2] : vector<4x8x64xf32> to vector<4x8xf32>
    %410 = vector.shape_cast %409 : vector<4x8xf32> to vector<4x8x1xf32>
    %c0_122 = arith.constant 0 : index
    %c0_123 = arith.constant 0 : index
    %c0_124 = arith.constant 0 : index
    %411 = vector.load %arg2[%c0_122, %c0_123, %c0_124] : memref<4x8x1xi32, #tpu.memory_space<vmem>>, vector<4x8x1xi32>
    %c0_i32_125 = arith.constant 0 : i32
    %412 = vector.broadcast %c0_i32_125 : i32 to vector<4x8x1xi32>
    %413 = arith.cmpi ne, %411, %412 : vector<4x8x1xi32>
    %cst_126 = arith.constant -1.000000e+09 : f32
    %414 = vector.broadcast %cst_126 : f32 to vector<4x8x1xf32>
    %415 = arith.select %413, %410, %414 : vector<4x8x1xi1>, vector<4x8x1xf32>
    %cst_127 = arith.constant dense<0xFF800000> : vector<8x1xf32>
    %416 = vector.multi_reduction <maximumf>, %415, %cst_127 [0] : vector<4x8x1xf32> to vector<8x1xf32>
    %417 = vector.shape_cast %416 : vector<8x1xf32> to vector<1x8x1xf32>
    %418 = vector.broadcast %417 : vector<1x8x1xf32> to vector<4x8x1xf32>
    %419 = arith.subf %415, %418 : vector<4x8x1xf32>
    %420 = math.exp %419 : vector<4x8x1xf32>
    %cst_128 = arith.constant dense<0.000000e+00> : vector<8x1xf32>
    %421 = vector.multi_reduction <add>, %420, %cst_128 [0] : vector<4x8x1xf32> to vector<8x1xf32>
    %422 = vector.shape_cast %421 : vector<8x1xf32> to vector<1x8x1xf32>
    %423 = tpu.reciprocal %422 {approx = true} : vector<1x8x1xf32> -> vector<1x8x1xf32>
    %424 = vector.broadcast %423 : vector<1x8x1xf32> to vector<4x8x1xf32>
    %425 = arith.mulf %420, %424 : vector<4x8x1xf32>
    %426 = vector.broadcast %425 : vector<4x8x1xf32> to vector<4x8x32xf32>
    %427 = arith.mulf %426, %390 : vector<4x8x32xf32>
    %cst_129 = arith.constant dense<0.000000e+00> : vector<8x32xf32>
    %428 = vector.multi_reduction <add>, %427, %cst_129 [0] : vector<4x8x32xf32> to vector<8x32xf32>
    %429 = vector.broadcast %425 : vector<4x8x1xf32> to vector<4x8x32xf32>
    %430 = arith.mulf %429, %391 : vector<4x8x32xf32>
    %cst_130 = arith.constant dense<0.000000e+00> : vector<8x32xf32>
    %431 = vector.multi_reduction <add>, %430, %cst_130 [0] : vector<4x8x32xf32> to vector<8x32xf32>
    %c0_131 = arith.constant 0 : index
    %c0_132 = arith.constant 0 : index
    %432 = vector.load %arg16[%c0_131, %c0_132] : memref<32x128xbf16, #tpu.memory_space<vmem>>, vector<32x128xbf16>
    %cst_133 = arith.constant dense<0.000000e+00> : vector<32x128xf32>
    %433 = tpu.matmul %393, %432, %cst_133 {dimension_numbers = #tpu.dot_dimension_numbers<[1], [0], [0], [1], [0, 0, 1, 1], [], []>} : vector<32x32xbf16>, vector<32x128xbf16>, vector<32x128xf32> -> vector<32x128xf32>
    %c0_134 = arith.constant 0 : index
    %c0_135 = arith.constant 0 : index
    %434 = vector.load %arg17[%c0_134, %c0_135] : memref<32x128xbf16, #tpu.memory_space<vmem>>, vector<32x128xbf16>
    %cst_136 = arith.constant dense<0.000000e+00> : vector<32x128xf32>
    %435 = tpu.matmul %395, %434, %cst_136 {dimension_numbers = #tpu.dot_dimension_numbers<[1], [0], [0], [1], [0, 0, 1, 1], [], []>} : vector<32x32xbf16>, vector<32x128xbf16>, vector<32x128xf32> -> vector<32x128xf32>
    %436 = arith.addf %433, %435 : vector<32x128xf32>
    %c0_137 = arith.constant 0 : index
    %c0_138 = arith.constant 0 : index
    %437 = vector.load %arg18[%c0_137, %c0_138] : memref<1x128xf32, #tpu.memory_space<vmem>>, vector<1x128xf32>
    %438 = vector.broadcast %437 : vector<1x128xf32> to vector<32x128xf32>
    %439 = arith.addf %436, %438 : vector<32x128xf32>
    %440 = vector.shape_cast %439 : vector<32x128xf32> to vector<4x8x128xf32>
    %c0_139 = arith.constant 0 : index
    %c0_140 = arith.constant 0 : index
    %c0_141 = arith.constant 0 : index
    %441 = vector.load %arg22[%c0_139, %c0_140, %c0_141] : memref<4x8x128xf32, #tpu.memory_space<vmem>>, vector<4x8x128xf32>
    tpu.vector_store %arg22[%c0_139, %c0_140, %c0_141], %440 {strides = array<i32>} : memref<4x8x128xf32, #tpu.memory_space<vmem>>, vector<4x8x128xf32>,
    %442 = arith.truncf %428 : vector<8x32xf32> to vector<8x32xbf16>
    %c0_142 = arith.constant 0 : index
    %c0_143 = arith.constant 0 : index
    %443 = vector.load %arg19[%c0_142, %c0_143] : memref<32x128xbf16, #tpu.memory_space<vmem>>, vector<32x128xbf16>
    %cst_144 = arith.constant dense<0.000000e+00> : vector<8x128xf32>
    %444 = tpu.matmul %442, %443, %cst_144 {dimension_numbers = #tpu.dot_dimension_numbers<[1], [0], [0], [1], [0, 0, 1, 1], [], []>} : vector<8x32xbf16>, vector<32x128xbf16>, vector<8x128xf32> -> vector<8x128xf32>
    %445 = arith.truncf %431 : vector<8x32xf32> to vector<8x32xbf16>
    %c0_145 = arith.constant 0 : index
    %c0_146 = arith.constant 0 : index
    %446 = vector.load %arg20[%c0_145, %c0_146] : memref<32x128xbf16, #tpu.memory_space<vmem>>, vector<32x128xbf16>
    %cst_147 = arith.constant dense<0.000000e+00> : vector<8x128xf32>
    %447 = tpu.matmul %445, %446, %cst_147 {dimension_numbers = #tpu.dot_dimension_numbers<[1], [0], [0], [1], [0, 0, 1, 1], [], []>} : vector<8x32xbf16>, vector<32x128xbf16>, vector<8x128xf32> -> vector<8x128xf32>
    %448 = arith.addf %444, %447 : vector<8x128xf32>
    %c0_148 = arith.constant 0 : index
    %c0_149 = arith.constant 0 : index
    %449 = vector.load %arg21[%c0_148, %c0_149] : memref<1x128xf32, #tpu.memory_space<vmem>>, vector<1x128xf32>
    %450 = vector.broadcast %449 : vector<1x128xf32> to vector<8x128xf32>
    %451 = arith.addf %448, %450 : vector<8x128xf32>
    %c0_150 = arith.constant 0 : index
    %c0_151 = arith.constant 0 : index
    %452 = vector.load %arg23[%c0_150, %c0_151] : memref<8x128xf32, #tpu.memory_space<vmem>>, vector<8x128xf32>
    tpu.vector_store %arg23[%c0_150, %c0_151], %451 {strides = array<i32>} : memref<8x128xf32, #tpu.memory_space<vmem>>, vector<8x128xf32>,
    return
  }
  func.func @transform_0(%arg0: i32) -> (i32, i32) {
    %c0_i32 = arith.constant 0 : i32
    %c0_i32_0 = arith.constant 0 : i32
    return %arg0, %c0_i32 : i32, i32
  }
  func.func @transform_1(%arg0: i32) -> (i32, i32, i32) {
    %c0_i32 = arith.constant 0 : i32
    %c0_i32_0 = arith.constant 0 : i32
    %c0_i32_1 = arith.constant 0 : i32
    return %c0_i32, %arg0, %c0_i32_0 : i32, i32, i32
  }
  func.func @transform_2(%arg0: i32) -> (i32, i32, i32) {
    %c0_i32 = arith.constant 0 : i32
    %c0_i32_0 = arith.constant 0 : i32
    %c0_i32_1 = arith.constant 0 : i32
    return %c0_i32, %arg0, %c0_i32_0 : i32, i32, i32
  }
  func.func @transform_3(%arg0: i32) -> (i32, i32) {
    %c0_i32 = arith.constant 0 : i32
    %c0_i32_0 = arith.constant 0 : i32
    %c0_i32_1 = arith.constant 0 : i32
    return %c0_i32, %c0_i32_0 : i32, i32
  }
  func.func @transform_4(%arg0: i32) -> (i32, i32) {
    %c0_i32 = arith.constant 0 : i32
    %c0_i32_0 = arith.constant 0 : i32
    %c0_i32_1 = arith.constant 0 : i32
    return %c0_i32, %c0_i32_0 : i32, i32
  }
  func.func @transform_5(%arg0: i32) -> (i32, i32) {
    %c0_i32 = arith.constant 0 : i32
    %c0_i32_0 = arith.constant 0 : i32
    %c0_i32_1 = arith.constant 0 : i32
    return %c0_i32, %c0_i32_0 : i32, i32
  }
  func.func @transform_6(%arg0: i32) -> (i32, i32) {
    %c0_i32 = arith.constant 0 : i32
    %c0_i32_0 = arith.constant 0 : i32
    %c0_i32_1 = arith.constant 0 : i32
    return %c0_i32, %c0_i32_0 : i32, i32
  }
  func.func @transform_7(%arg0: i32) -> (i32, i32) {
    %c0_i32 = arith.constant 0 : i32
    %c0_i32_0 = arith.constant 0 : i32
    %c0_i32_1 = arith.constant 0 : i32
    return %c0_i32, %c0_i32_0 : i32, i32
  }
  func.func @transform_8(%arg0: i32) -> (i32, i32) {
    %c0_i32 = arith.constant 0 : i32
    %c0_i32_0 = arith.constant 0 : i32
    %c0_i32_1 = arith.constant 0 : i32
    return %c0_i32, %c0_i32_0 : i32, i32
  }
  func.func @transform_9(%arg0: i32) -> (i32, i32) {
    %c0_i32 = arith.constant 0 : i32
    %c0_i32_0 = arith.constant 0 : i32
    %c0_i32_1 = arith.constant 0 : i32
    return %c0_i32, %c0_i32_0 : i32, i32
  }
  func.func @transform_10(%arg0: i32) -> (i32, i32) {
    %c0_i32 = arith.constant 0 : i32
    %c0_i32_0 = arith.constant 0 : i32
    %c0_i32_1 = arith.constant 0 : i32
    return %c0_i32, %c0_i32_0 : i32, i32
  }
  func.func @transform_11(%arg0: i32) -> (i32, i32) {
    %c0_i32 = arith.constant 0 : i32
    %c0_i32_0 = arith.constant 0 : i32
    %c0_i32_1 = arith.constant 0 : i32
    return %c0_i32, %c0_i32_0 : i32, i32
  }
  func.func @transform_12(%arg0: i32) -> (i32, i32) {
    %c0_i32 = arith.constant 0 : i32
    %c0_i32_0 = arith.constant 0 : i32
    %c0_i32_1 = arith.constant 0 : i32
    return %c0_i32, %c0_i32_0 : i32, i32
  }
  func.func @transform_13(%arg0: i32) -> (i32, i32) {
    %c0_i32 = arith.constant 0 : i32
    %c0_i32_0 = arith.constant 0 : i32
    %c0_i32_1 = arith.constant 0 : i32
    return %c0_i32, %c0_i32_0 : i32, i32
  }
  func.func @transform_14(%arg0: i32) -> (i32, i32, i32) {
    %c0_i32 = arith.constant 0 : i32
    %c0_i32_0 = arith.constant 0 : i32
    %c0_i32_1 = arith.constant 0 : i32
    %c0_i32_2 = arith.constant 0 : i32
    return %c0_i32, %c0_i32_0, %c0_i32_1 : i32, i32, i32
  }
  func.func @transform_15(%arg0: i32) -> (i32, i32) {
    %c0_i32 = arith.constant 0 : i32
    %c0_i32_0 = arith.constant 0 : i32
    %c0_i32_1 = arith.constant 0 : i32
    return %c0_i32, %c0_i32_0 : i32, i32
  }
  func.func @transform_16(%arg0: i32) -> (i32, i32) {
    %c0_i32 = arith.constant 0 : i32
    %c0_i32_0 = arith.constant 0 : i32
    %c0_i32_1 = arith.constant 0 : i32
    return %c0_i32, %c0_i32_0 : i32, i32
  }
  func.func @transform_17(%arg0: i32) -> (i32, i32) {
    %c0_i32 = arith.constant 0 : i32
    %c0_i32_0 = arith.constant 0 : i32
    %c0_i32_1 = arith.constant 0 : i32
    return %c0_i32, %c0_i32_0 : i32, i32
  }
  func.func @transform_18(%arg0: i32) -> (i32, i32) {
    %c0_i32 = arith.constant 0 : i32
    %c0_i32_0 = arith.constant 0 : i32
    %c0_i32_1 = arith.constant 0 : i32
    return %c0_i32, %c0_i32_0 : i32, i32
  }
  func.func @transform_19(%arg0: i32) -> (i32, i32) {
    %c0_i32 = arith.constant 0 : i32
    %c0_i32_0 = arith.constant 0 : i32
    %c0_i32_1 = arith.constant 0 : i32
    return %c0_i32, %c0_i32_0 : i32, i32
  }
  func.func @transform_20(%arg0: i32) -> (i32, i32) {
    %c0_i32 = arith.constant 0 : i32
    %c0_i32_0 = arith.constant 0 : i32
    %c0_i32_1 = arith.constant 0 : i32
    return %c0_i32, %c0_i32_0 : i32, i32
  }
  func.func @transform_21(%arg0: i32) -> (i32, i32, i32) {
    %c0_i32 = arith.constant 0 : i32
    %c0_i32_0 = arith.constant 0 : i32
    %c0_i32_1 = arith.constant 0 : i32
    return %c0_i32, %arg0, %c0_i32_0 : i32, i32, i32
  }
  func.func @transform_22(%arg0: i32) -> (i32, i32) {
    %c0_i32 = arith.constant 0 : i32
    %c0_i32_0 = arith.constant 0 : i32
    return %arg0, %c0_i32 : i32, i32
  }
}

</mosaic_0001>

<bundles_post_ra>
// kernel: hierarchical_forward.3
= control target key start
LH: loop header
LB: loop body
LE: loop exit
PB: predicated region body
PF: predicated region fallthrough
CT: control target
= control target key end

     0   :  { %v1917_v1 = vmov 0   ;;  %vm124_vm0 = vcmask 523264   ;;  %v1918_v12 = vmov 0.0   ;;  %vm1919_vm1 = vmmov 0   ;;  %s2465_s4 = inlined_call_operand.vmem [shape: bf16[64,96], index: 4, kind: input, shape index: {}]   ;;  %s2466_s3 = inlined_call_operand.vmem [shape: bf16[64,96], index: 3, kind: input, shape index: {}]   ;;  %s2467_s2 = inlined_call_operand.vmem [shape: bf16[4,8,64], index: 2, kind: input, shape index: {}]   ;;  %s2468_s8 = inlined_call_operand.vmem [shape: bf16[32,96], index: 8, kind: input, shape index: {}]   ;;  %s2469_s7 = inlined_call_operand.vmem [shape: bf16[32,96], index: 7, kind: input, shape index: {}]   ;;  %s2470_s6 = inlined_call_operand.vmem [shape: f32[1,96], index: 6, kind: input, shape index: {}]   ;;  %s2471_s5 = inlined_call_operand.vmem [shape: f32[1,96], index: 5, kind: input, shape index: {}]   ;;  %s2472_s10 = inlined_call_operand.vmem [shape: f32[1,96], index: 10, kind: input, shape index: {}]   ;;  %s2473_s9 = inlined_call_operand.vmem [shape: f32[1,96], index: 9, kind: input, shape index: {}]   ;;  %s2474_s0 = inlined_call_operand.vmem [shape: s32[8,1], index: 0, kind: input, shape index: {}]   ;;  %s2475_s12 = inlined_call_operand.vmem [shape: bf16[32,64], index: 12, kind: input, shape index: {}]   ;;  %s2476_s16 = inlined_call_operand.vmem [shape: bf16[32,128], index: 16, kind: input, shape index: {}]   ;;  %s2477_s11 = inlined_call_operand.vmem [shape: bf16[32,64], index: 11, kind: input, shape index: {}]   ;;  %s2478_s15 = inlined_call_operand.vmem [shape: bf16[32,128], index: 15, kind: input, shape index: {}]   ;;  %s2479_s13 = inlined_call_operand.vmem [shape: f32[1,64], index: 13, kind: input, shape index: {}]   ;;  %s2480_s17 = inlined_call_operand.vmem [shape: f32[1,128], index: 17, kind: input, shape index: {}]   ;;  %s2481_s21 = inlined_call_operand.vmem [shape: f32[4,8,128], index: 21, kind: output, shape index: {0}]   ;;  %s2482_s14 = inlined_call_operand.vmem [shape: f32[1,1,64], index: 14, kind: input, shape index: {}]   ;;  %s2483_s1 = inlined_call_operand.vmem [shape: s32[4,8,1], index: 1, kind: input, shape index: {}]   ;;  %s2484_s19 = inlined_call_operand.vmem [shape: bf16[32,128], index: 19, kind: input, shape index: {}]   ;;  %s2485_s18 = inlined_call_operand.vmem [shape: bf16[32,128], index: 18, kind: input, shape index: {}]   ;;  %s2486_s20 = inlined_call_operand.vmem [shape: f32[1,128], index: 20, kind: input, shape index: {}]   ;;  %s2487_s22 = inlined_call_operand.vmem [shape: f32[8,128], index: 22, kind: output, shape index: {1}]  }
   0x1   :  { %2493 = sst [smem:[#allocation6_spill]] %s2465_s4  ;;  %1823 = vset.pattern.permute.xlu0 %v1917_v1  ;;  %1824 = vset.pattern.permute.xlu1 %v1917_v1  ;;  %vm268_vm2 = vcmask 785408   ;;  %v2136_v34 = vld [vmem:[%s2472_s10] ss:$0 sm:$0xff]  ;;  %vm315_vm7 = vcmask 261120  }
   0x2   :  { %2494 = sst [smem:[#allocation7_spill]] %s2466_s3  ;;  %s2500_s29 = sld [smem:[#allocation6_spill]]  ;;  %v2143_v36 = vld [vmem:[%s2473_s9] ss:$0 sm:$0xff] }
   0x3   :  { %2495 = sst [smem:[#allocation8_spill]] %s2467_s2  ;;  %s2501_s4 = sld [smem:[#allocation7_spill]]  ;;  %v2152_v55 = vld [vmem:[%s2474_s0] sm:$0xff] }
   0x4   :  { %2496 = sst [smem:[#allocation9_spill]] %s2468_s8  ;;  %s2502_s28 = sld [smem:[#allocation8_spill]]  ;;  %vm464_vm3 = vcmp.gt.s32.totalorder %v2152_v55, 3  ;;  %vm463_vm4 = vcmp.gt.s32.totalorder %v2152_v55, 0  ;;  %vm639_vm8 = vcmp.gt.s32.totalorder %v2152_v55, 2  ;;  %vm638_vm9 = vcmp.gt.s32.totalorder %v2152_v55, 1 }
   0x5   :  { %2497 = sst [smem:[#allocation10_spill]] %s2469_s7  ;;  %s2503_s25 = sld [smem:[#allocation9_spill]]  ;;  %v471_v56 = vsel %vm464_vm3, 1, %v1917_v1 }
   0x6   :  { %2498 = sst [smem:[#allocation11_spill]] %s2470_s6  ;;  %s2504_s2 = sld [smem:[#allocation10_spill]] }
   0x7   :  { %2499 = sst [smem:[#allocation12_spill]] %s2471_s5  ;;  %s2505_s3 = sld [smem:[#allocation11_spill]] }
   0x8   :  { %v1825_v0 = vld [vmem:[%s2500_s29] sm:$0xff]   ;;  %v1827_v3 = vld [vmem:[%s2500_s29 + $0x8] sm:$0xff]   ;;  %v1829_v5 = vld [vmem:[%s2500_s29 + $0x10] sm:$0xff]   ;;  %s2506_s5 = sld [smem:[#allocation12_spill]]  ;;  %s1921_s0 = smov 96  }
   0x9   :  { %v1826_v2 = vld [vmem:[%s2501_s4] sm:$0xff]   ;;  %1686 = vmatprep.subr.bf16.mxu1 %v1825_v0  ;;  %v1828_v4 = vld [vmem:[%s2501_s4 + $0x8] sm:$0xff]   ;;  %v1830_v6 = vld [vmem:[%s2501_s4 + $0x10] sm:$0xff]  }
   0xa   :  { %1687 = vmatpush3.bf16.msra.mxu1 %v1825_v0  ;;  %1674 = vmatprep.subr.bf16.mxu0 %v1826_v2  ;;  %v1832_v7 = vld [vmem:[%s2502_s28] sm:$0xff]   ;;  %v1831_v8 = vld [vmem:[%s2500_s29 + $0x18] sm:$0xff]   ;;  %v1834_v10 = vld [vmem:[%s2502_s28 + $0x8] sm:$0xff]  }
   0xb   :  { %1688 = vmatprep.subr.bf16.mxu1 %v1827_v3  ;;  %1675 = vmatpush3.bf16.msra.mxu0 %v1826_v2  ;;  %v1833_v9 = vld [vmem:[%s2501_s4 + $0x18] sm:$0xff]   ;;  %v2074_v11 = vld [vmem:[%s2503_s25] sm:$0xff]   ;;  %v2089_v14 = vld [vmem:[%s2503_s25 + $0x8] sm:$0xff]  }
   0xc   :  { %1676 = vmatprep.subr.bf16.mxu0 %v1828_v4  ;;  %1694 = vmatprep.mubr.msk.bf16.mxu1 %vm124_vm0, %v1832_v7  ;;  %v2080_v13 = vld [vmem:[%s2504_s2] sm:$0xff]   ;;  %v2096_v15 = vld [vmem:[%s2504_s2 + $0x8] sm:$0xff]   ;;  %s1920_s2 = smov 64  }
   0xd   :  { %1682 = vmatprep.mubr.msk.bf16.mxu0 %vm124_vm0, %v1832_v7  ;;  %v1563_v16 = vld [vmem:[%s2505_s3] ss:$0 sm:$0xff] }
   0xe   :  { %1689 = vmatpush3.bf16.msra.mxu1 %v1827_v3  ;;  %v1554_v17 = vld [vmem:[%s2506_s5] ss:$0 sm:$0xff] }
   0xf   :  { %1690 = vmatprep.subr.bf16.mxu1 %v1829_v5  ;;  %1677 = vmatpush3.bf16.msra.mxu0 %v1828_v4 }
  0x10   :  { %1678 = vmatprep.subr.bf16.mxu0 %v1830_v6 }
  0x12   :  { %1691 = vmatpush3.bf16.msra.mxu1 %v1829_v5 }
  0x13   :  { %1692 = vmatprep.subr.bf16.mxu1 %v1831_v8  ;;  %1679 = vmatpush3.bf16.msra.mxu0 %v1830_v6  ;;  %v465_v6 = vsel %vm463_vm4, 1, %v1917_v1 }
  0x14   :  { %1680 = vmatprep.subr.bf16.mxu0 %v1833_v9 }
  0x16   :  { %1693 = vmatpush3.bf16.msra.mxu1 %v1831_v8 }
  0x17   :  { %1706 = vmatprep.subr.bf16.mxu1 %v1918_v12  ;;  %1681 = vmatpush3.bf16.msra.mxu0 %v1833_v9 }
  0x18   :  { %1698 = vmatprep.subr.bf16.mxu0 %v1918_v12 }
  0x19   :  { %1695 = vmatmul.mubr.msk.bf16.vlgmr.msra.gmra.mrb[0].mxu1 %vm124_vm0, %v1834_v10 }
  0x1a   :  { %1707 = vmatpush3.bf16.msra.mxu1 %v2074_v11  ;;  %1683 = vmatmul.mubr.msk.bf16.vlgmr.msra.gmra.mrb[0].mxu0 %vm124_vm0, %v1834_v10 }
  0x1b   :  { %1708 = vmatprep.subr.bf16.mxu1 %v1918_v12  ;;  %1699 = vmatpush3.bf16.msra.mxu0 %v2080_v13 }
  0x1c   :  { %1710 = vmatprep.mubr.msk.bf16.mxu1 %vm1919_vm1, %v1918_v12  ;;  %1700 = vmatprep.subr.bf16.mxu0 %v1918_v12 }
  0x1d   :  { %1702 = vmatprep.mubr.msk.bf16.mxu0 %vm1919_vm1, %v1918_v12 }
  0x1e   :  { %1709 = vmatpush3.bf16.msra.mxu1 %v2089_v14 }
  0x1f   :  { %1701 = vmatpush3.bf16.msra.mxu0 %v2096_v15  ;;  %1722 = vmatprep.subr.bf16.mxu1 %v1918_v12 }
  0x20   :  { %1714 = vmatprep.subr.bf16.mxu0 %v1918_v12 }
  0x21   :  { %1711 = vmatmul.mubr.bf16.vlgmr.msra.gmra.mrb[4].mxu1 %v1917_v1 }
  0x22   :  { %1703 = vmatmul.mubr.bf16.vlgmr.msra.gmra.mrb[4].mxu0 %v1917_v1  ;;  %1723 = vmatpush3.bf16.msra.mxu1 %v2074_v11 }
  0x23   :  { %1724 = vmatprep.subr.bf16.mxu1 %v1918_v12  ;;  %1726 = vmatprep.mubr.msk.bf16.mxu1 %vm1919_vm1, %v1918_v12 }
  0x24   :  { %1715 = vmatpush3.bf16.msra.mxu0 %v2080_v13  ;;  %1718 = vmatprep.mubr.msk.bf16.mxu0 %vm1919_vm1, %v1918_v12 }
  0x25   :  { %1716 = vmatprep.subr.bf16.mxu0 %v1918_v12 }
  0x26   :  { %1725 = vmatpush3.bf16.msra.mxu1 %v2089_v14 }
  0x27   :  { %1738 = vmatprep.subr.bf16.mxu1 %v1918_v12 }
  0x28   :  { %1717 = vmatpush3.bf16.msra.mxu0 %v2096_v15 }
  0x29   :  { %1730 = vmatprep.subr.bf16.mxu0 %v1918_v12 }
  0xec   :  { %v1696_v18 = vpop.f32.mrb[0].mxu1 }
  0xed   :  { %v262_v19 = vadd.f32 %v1696_v18, %v1563_v16  ;;  %v253_v20 = vpop.f32.mrb[1].mxu1  ;;  %v1684_v21 = vpop.f32.mrb[0].mxu0 }
  0xee   :  { %v254_v22 = vadd.f32 %v1563_v16, %v253_v20  ;;  %v1697_v23 = vpop.f32.mrb[2].mxu1  ;;  %v174_v24 = vadd.f32 %v1684_v21, %v1554_v17  ;;  %v165_v25 = vpop.f32.mrb[1].mxu0 }
  0xef   :  { %275 = vst.msk [vmem:[#allocation3 + $0x10] sm:$0xff] %vm268_vm2, %v262_v19  ;;  %v265_v26 = vadd.f32 %v1697_v23, %v1563_v16  ;;  %v256_v27 = vpop.f32.mrb[3].mxu1  ;;  %v166_v28 = vadd.f32 %v1554_v17, %v165_v25  ;;  %v1685_v29 = vpop.f32.mrb[2].mxu0 }
  0xf0   :  { %273 = vst.msk [vmem:[#allocation3] sm:$0xff] %vm268_vm2, %v254_v22  ;;  %v257_v30 = vadd.f32 %v1563_v16, %v256_v27  ;;  %271 = vst.msk [vmem:[#allocation2 + $0x10] sm:$0xff] %vm268_vm2, %v174_v24  ;;  %v177_v31 = vadd.f32 %v1685_v29, %v1554_v17  ;;  %v168_v32 = vpop.f32.mrb[3].mxu0 }
  0xf1   :  { %276 = vst.msk [vmem:[#allocation3 + $0x18] sm:$0xff] %vm268_vm2, %v265_v26  ;;  %269 = vst.msk [vmem:[#allocation2] sm:$0xff] %vm268_vm2, %v166_v28  ;;  %v169_v33 = vadd.f32 %v1554_v17, %v168_v32 }
  0xf2   :  { %274 = vst.msk [vmem:[#allocation3 + $0x8] sm:$0xff] %vm268_vm2, %v257_v30  ;;  %272 = vst.msk [vmem:[#allocation2 + $0x18] sm:$0xff] %vm268_vm2, %v177_v31 }
  0xf3   :  { %270 = vst.msk [vmem:[#allocation2 + $0x8] sm:$0xff] %vm268_vm2, %v169_v33 }
  0xf4   :  { %v405_v35 = vpop.f32.mrb[4].mxu1 }
  0xf5   :  { %v406_v37 = vadd.f32 %v2136_v34, %v405_v35  ;;  %v1712_v38 = vpop.f32.mrb[5].mxu1  ;;  %v353_v39 = vpop.f32.mrb[4].mxu0 }
  0xf6   :  { %v408_v40 = vpop.f32.mrb[6].mxu1  ;;  %v1704_v41 = vpop.f32.mrb[5].mxu0  ;;  %v354_v43 = vadd.f32 %v2143_v36, %v353_v39 }
  0xf7   :  { %437 = vrot.lane.b32.xlu0 %v406_v37, %s1920_s2  ;;  %v1713_v42 = vpop.f32.mrb[7].mxu1  ;;  %v356_v44 = vpop.f32.mrb[6].mxu0 }
  0xf8   :  { %v1705_v45 = vpop.f32.mrb[7].mxu0  ;;  %v302_v46 = vld [vmem:[#allocation3 + $0x18] sm:$0xff]  ;;  %v300_v48 = vld [vmem:[#allocation2] sm:$0xff] }
  0xf9   :  { %v429_v47 = vadd.f32 %v406_v37, %v302_v46  ;;  %v411_v50 = vadd.f32 %v354_v43, %v300_v48 }
  0xfb   :  { %419 = vrot.lane.b32.xlu0 %v354_v43, %s1920_s2  ;;  %v1577_v49 = vmul.f32 -1.442695, %v429_v47  ;;  %v1576_v51 = vmul.f32 -1.442695, %v411_v50  ;;  %v491_v43 = vld [vmem:[#allocation3 + $0x10] sm:$0xff] }
  0xfd   :  { %1851 = vpow2.f32 %v1577_v49 }
  0xfe   :  { %1853 = vpow2.f32 %v1576_v51 }
  0xff   :  { %473 = vperm.xlu0 %1823, %v471_v56  }
 0x107   :  { %v1852_v52 = vpop.eup %1851 }
 0x108   :  { %v433_v53 = vadd.f32 1.0, %v1852_v52  ;;  %v1854_v54 = vpop.eup %1853 }
 0x109   :  { %v415_v57 = vadd.f32 1.0, %v1854_v54 }
 0x10a   :  { %1855 = vrcp.f32 %v433_v53 }
 0x10b   :  { %1857 = vrcp.f32 %v415_v57  ;;  %v646_v57 = vsel %vm639_vm8, 1, %v1917_v1 }
 0x114   :  { %v1856_v58 = vpop.eup %1855 }
 0x115   :  { %v1858_v61 = vpop.eup %1857  ;;  %v455_v8 = vsub.f32 1.0, %v1856_v58  ;;  %v461_v10 = vmul.f32 0.0, %v1856_v58 }
 0x116   :  { %v447_v22 = vsub.f32 1.0, %v1858_v61  ;;  %v453_v24 = vmul.f32 0.0, %v1858_v61 }
 0x169   :  { %v438_v59 = vpop.permute.xlu0 %437 }
 0x16a   :  { %v440_v60 = vmul.f32 %v1856_v58, %v438_v59  ;;  %v640_v58 = vsel %vm638_vm9, 1, %v1917_v1 }
 0x16c   :  { %442 = vrot.lane.b32.xlu1 %v440_v60, %s1920_s2 }
 0x16d   :  { %v420_v62 = vpop.permute.xlu0 %419 }
 0x16e   :  { %v422_v63 = vmul.f32 %v1858_v61, %v420_v62 }
 0x170   :  { %424 = vrot.lane.b32.xlu1 %v422_v63, %s1920_s2 }
 0x17e   :  { %v2162_v17 = vpop.permute.xlu0 %473 }
 0x17f   :  { %vm475_vm5 = vcmp.eq.s32.totalorder %v2162_v17, 1 }
 0x1de   :  { %v443_v0 = vpop.permute.xlu1 %442 }
 0x1df   :  { %v445_v2 = vadd.f32 %v443_v0, %v302_v46  ;;  %v489_v46 = vld [vmem:[#allocation2 + $0x8] sm:$0xff] }
 0x1e1   :  { %1859 = vtanh.f32 %v445_v2 }
 0x1e2   :  { %v425_v3 = vpop.permute.xlu1 %424 }
 0x1e3   :  { %v427_v4 = vadd.f32 %v425_v3, %v300_v48 }
 0x1e5   :  { %1861 = vtanh.f32 %v427_v4 }
 0x1eb   :  { %v1860_v5 = vpop.eup %1859 }
 0x1ec   :  { %457 = vrot.lane.b32.xlu1 %v1860_v5, %s1921_s0 }
 0x1ef   :  { %v1862_v7 = vpop.eup %1861 }
 0x1f0   :  { %449 = vrot.lane.b32.xlu0 %v1862_v7, %s1921_s0  ;;  %467 = vperm.xlu1 %1824, %v465_v6  }
 0x25e   :  { %v458_v9 = vpop.permute.xlu1 %457 }
 0x25f   :  { %v460_v16 = vmul.f32 %v458_v9, %v455_v8 }
 0x261   :  { %v462_v18 = vadd.f32 %v461_v10, %v460_v16 }
 0x262   :  { %v450_v21 = vpop.permute.xlu0 %449 }
 0x263   :  { %v2167_v19 = vsel %vm475_vm5, %v462_v18, 0.0  ;;  %v452_v23 = vmul.f32 %v450_v21, %v447_v22 }
 0x264   :  { %v539_v20 = vpack.c.bf16 %v2167_v19, %v2167_v19 }
 0x265   :  { %v454_v25 = vadd.f32 %v453_v24, %v452_v23 }
 0x266   :  { %541 = vrot.lane.b32.xlu1 %v539_v20, %s1921_s0 }
 0x26f   :  { %v2172_v26 = vpop.permute.xlu1 %467 }
 0x270   :  { %vm469_vm6 = vcmp.eq.s32.totalorder %v2172_v26, 1 }
 0x271   :  { %v2177_v27 = vsel %vm469_vm6, %v454_v25, 0.0 }
 0x272   :  { %v492_v28 = vpack.c.bf16 %v2177_v27, %v2177_v27 }
 0x274   :  { %494 = vrot.lane.b32.xlu0 %v492_v28, %s1921_s0 }
 0x2d8   :  { %v542_v29 = vpop.permute.xlu1 %541 }
 0x2d9   :  { %1727 = vmatmul.mubr.msk.bf16.vlgmr.msra.gmra.mrb[8].mxu1 %vm315_vm7, %v542_v29 }
 0x2da   :  { %1739 = vmatpush3.bf16.msra.mxu1 %v2074_v11  ;;  %1742 = vmatprep.mubr.msk.bf16.mxu1 %vm1919_vm1, %v1918_v12 }
 0x2db   :  { %1740 = vmatprep.subr.bf16.mxu1 %v1918_v12 }
 0x2de   :  { %1741 = vmatpush3.bf16.msra.mxu1 %v2089_v14 }
 0x2df   :  { %1754 = vmatprep.subr.bf16.mxu1 %v1918_v12 }
 0x2e6   :  { %v495_v30 = vpop.permute.xlu0 %494 }
 0x2e7   :  { %1719 = vmatmul.mubr.msk.bf16.vlgmr.msra.gmra.mrb[8].mxu0 %vm315_vm7, %v495_v30 }
 0x2e8   :  { %1731 = vmatpush3.bf16.msra.mxu0 %v2080_v13  ;;  %1734 = vmatprep.mubr.msk.bf16.mxu0 %vm1919_vm1, %v1918_v12 }
 0x2e9   :  { %1732 = vmatprep.subr.bf16.mxu0 %v1918_v12 }
 0x2ec   :  { %1733 = vmatpush3.bf16.msra.mxu0 %v2096_v15 }
 0x2ed   :  { %1746 = vmatprep.subr.bf16.mxu0 %v1918_v12 }
 0x3ac   :  { %v580_v31 = vpop.f32.mrb[8].mxu1 }
 0x3ad   :  { %v581_v32 = vadd.f32 %v2136_v34, %v580_v31  ;;  %v1728_v33 = vpop.f32.mrb[9].mxu1 }
 0x3ae   :  { %v583_v35 = vpop.f32.mrb[10].mxu1 }
 0x3af   :  { %612 = vrot.lane.b32.xlu1 %v581_v32, %s1920_s2  ;;  %v1729_v37 = vpop.f32.mrb[11].mxu1  ;;  %v604_v44 = vadd.f32 %v581_v32, %v491_v43 }
 0x3b1   :  { %v1581_v45 = vmul.f32 -1.442695, %v604_v44 }
 0x3b3   :  { %1863 = vpow2.f32 %v1581_v45 }
 0x3ba   :  { %v533_v38 = vpop.f32.mrb[8].mxu0 }
 0x3bb   :  { %v534_v39 = vadd.f32 %v2143_v36, %v533_v38  ;;  %v1720_v40 = vpop.f32.mrb[9].mxu0 }
 0x3bc   :  { %v536_v41 = vpop.f32.mrb[10].mxu0 }
 0x3bd   :  { %594 = vrot.lane.b32.xlu0 %v534_v39, %s1920_s2  ;;  %v1721_v42 = vpop.f32.mrb[11].mxu0  ;;  %v586_v47 = vadd.f32 %v534_v39, %v489_v46  ;;  %v1864_v48 = vpop.eup %1863  ;;  %v669_v39 = vld [vmem:[#allocation3 + $0x8] sm:$0xff] }
 0x3be   :  { %v608_v50 = vadd.f32 1.0, %v1864_v48 }
 0x3bf   :  { %v1580_v49 = vmul.f32 -1.442695, %v586_v47 }
 0x3c1   :  { %1865 = vpow2.f32 %v1580_v49 }
 0x3c2   :  { %1867 = vrcp.f32 %v608_v50 }
 0x3cb   :  { %v1866_v51 = vpop.eup %1865 }
 0x3cc   :  { %v1868_v52 = vpop.eup %1867  ;;  %v590_v53 = vadd.f32 1.0, %v1866_v51 }
 0x3cd   :  { %v630_v55 = vsub.f32 1.0, %v1868_v52  ;;  %v636_v6 = vmul.f32 %v1868_v52, %v2167_v19 }
 0x3ce   :  { %1869 = vrcp.f32 %v590_v53 }
 0x3d8   :  { %v1870_v59 = vpop.eup %1869 }
 0x3d9   :  { %v622_v16 = vsub.f32 1.0, %v1870_v59  ;;  %v628_v21 = vmul.f32 %v1870_v59, %v2177_v27 }
 0x421   :  { %v613_v54 = vpop.permute.xlu1 %612 }
 0x422   :  { %v615_v56 = vmul.f32 %v1868_v52, %v613_v54 }
 0x424   :  { %617 = vrot.lane.b32.xlu1 %v615_v56, %s1920_s2 }
 0x428   :  { %648 = vperm.xlu1 %1824, %v646_v57  }
 0x42c   :  { %642 = vperm.xlu1 %1824, %v640_v58  }
 0x42f   :  { %v595_v60 = vpop.permute.xlu0 %594 }
 0x430   :  { %v597_v61 = vmul.f32 %v1870_v59, %v595_v60 }
 0x432   :  { %599 = vrot.lane.b32.xlu0 %v597_v61, %s1920_s2 }
 0x496   :  { %v618_v62 = vpop.permute.xlu1 %617 }
 0x497   :  { %v620_v63 = vadd.f32 %v618_v62, %v491_v43 }
 0x499   :  { %1871 = vtanh.f32 %v620_v63 }
 0x4a3   :  { %v1872_v0 = vpop.eup %1871 }
 0x4a4   :  { %v600_v2 = vpop.permute.xlu0 %599  ;;  %632 = vrot.lane.b32.xlu0 %v1872_v0, %s1921_s0 }
 0x4a5   :  { %v602_v3 = vadd.f32 %v600_v2, %v489_v46 }
 0x4a7   :  { %1873 = vtanh.f32 %v602_v3  ;;  %v2208_v5 = vpop.permute.xlu1 %648 }
 0x4a8   :  { %vm650_vm10 = vcmp.eq.s32.totalorder %v2208_v5, 1 }
 0x4ab   :  { %v2223_v20 = vpop.permute.xlu1 %642 }
 0x4ac   :  { %vm644_vm11 = vcmp.eq.s32.totalorder %v2223_v20, 1 }
 0x4b1   :  { %v1874_v4 = vpop.eup %1873 }
 0x4b2   :  { %624 = vrot.lane.b32.xlu0 %v1874_v4, %s1921_s0 }
 0x516   :  { %v633_v1 = vpop.permute.xlu0 %632 }
 0x517   :  { %v635_v7 = vmul.f32 %v633_v1, %v630_v55 }
 0x519   :  { %v2211_v8 = vadd.f32 %v636_v6, %v635_v7 }
 0x51b   :  { %v2218_v9 = vsel %vm650_vm10, %v2211_v8, %v2167_v19 }
 0x51c   :  { %v717_v10 = vpack.c.bf16 %v2218_v9, %v2218_v9 }
 0x51e   :  { %719 = vrot.lane.b32.xlu1 %v717_v10, %s1921_s0 }
 0x524   :  { %v625_v18 = vpop.permute.xlu0 %624 }
 0x525   :  { %v627_v22 = vmul.f32 %v625_v18, %v622_v16 }
 0x527   :  { %v2226_v23 = vadd.f32 %v628_v21, %v627_v22 }
 0x529   :  { %v2233_v24 = vsel %vm644_vm11, %v2226_v23, %v2177_v27 }
 0x52a   :  { %v670_v25 = vpack.c.bf16 %v2233_v24, %v2233_v24 }
 0x52c   :  { %672 = vrot.lane.b32.xlu0 %v670_v25, %s1921_s0 }
 0x590   :  { %v720_v28 = vpop.permute.xlu1 %719 }
 0x591   :  { %1743 = vmatmul.mubr.msk.bf16.vlgmr.msra.gmra.mrb[12].mxu1 %vm315_vm7, %v720_v28 }
 0x592   :  { %1755 = vmatpush3.bf16.msra.mxu1 %v2074_v11  ;;  %1758 = vmatprep.mubr.msk.bf16.mxu1 %vm1919_vm1, %v1918_v12 }
 0x593   :  { %1756 = vmatprep.subr.bf16.mxu1 %v1918_v12 }
 0x596   :  { %1757 = vmatpush3.bf16.msra.mxu1 %v2089_v14 }
 0x59e   :  { %v673_v29 = vpop.permute.xlu0 %672 }
 0x59f   :  { %1735 = vmatmul.mubr.msk.bf16.vlgmr.msra.gmra.mrb[12].mxu0 %vm315_vm7, %v673_v29 }
 0x5a0   :  { %1747 = vmatpush3.bf16.msra.mxu0 %v2080_v13  ;;  %1750 = vmatprep.mubr.msk.bf16.mxu0 %vm1919_vm1, %v1918_v12 }
 0x5a1   :  { %1748 = vmatprep.subr.bf16.mxu0 %v1918_v12 }
 0x5a4   :  { %1749 = vmatpush3.bf16.msra.mxu0 %v2096_v15  ;;  %v667_v15 = vld [vmem:[#allocation2 + $0x10] sm:$0xff] }
 0x664   :  { %v758_v11 = vpop.f32.mrb[12].mxu1 }
 0x665   :  { %v759_v30 = vadd.f32 %v2136_v34, %v758_v11  ;;  %v1744_v31 = vpop.f32.mrb[13].mxu1 }
 0x666   :  { %v761_v32 = vpop.f32.mrb[14].mxu1 }
 0x667   :  { %790 = vrot.lane.b32.xlu1 %v759_v30, %s1920_s2  ;;  %v1745_v14 = vpop.f32.mrb[15].mxu1  ;;  %v782_v40 = vadd.f32 %v759_v30, %v669_v39 }
 0x669   :  { %v1585_v41 = vmul.f32 -1.442695, %v782_v40 }
 0x66b   :  { %1875 = vpow2.f32 %v1585_v41 }
 0x672   :  { %v711_v33 = vpop.f32.mrb[12].mxu0 }
 0x673   :  { %v712_v35 = vadd.f32 %v2143_v36, %v711_v33  ;;  %v1736_v37 = vpop.f32.mrb[13].mxu0  ;;  %v834_v33 = vld [vmem:[#allocation3] sm:$0xff] }
 0x674   :  { %v714_v13 = vpop.f32.mrb[14].mxu0 }
 0x675   :  { %772 = vrot.lane.b32.xlu0 %v712_v35, %s1920_s2  ;;  %v1737_v38 = vpop.f32.mrb[15].mxu0  ;;  %v764_v42 = vadd.f32 %v712_v35, %v667_v15  ;;  %v1876_v43 = vpop.eup %1875  ;;  %v833_v13 = vld [vmem:[#allocation2 + $0x18] sm:$0xff] }
 0x676   :  { %v786_v45 = vadd.f32 1.0, %v1876_v43 }
 0x677   :  { %v1584_v44 = vmul.f32 -1.442695, %v764_v42 }
 0x679   :  { %1877 = vpow2.f32 %v1584_v44 }
 0x67a   :  { %1879 = vrcp.f32 %v786_v45 }
 0x683   :  { %v1878_v46 = vpop.eup %1877 }
 0x684   :  { %v1880_v47 = vpop.eup %1879  ;;  %v768_v48 = vadd.f32 1.0, %v1878_v46 }
 0x685   :  { %v808_v61 = vsub.f32 1.0, %v1880_v47  ;;  %v814_v63 = vmul.f32 %v1880_v47, %v2218_v9 }
 0x686   :  { %1881 = vrcp.f32 %v768_v48 }
 0x690   :  { %v1882_v51 = vpop.eup %1881 }
 0x691   :  { %v800_v55 = vsub.f32 1.0, %v1882_v51  ;;  %v806_v6 = vmul.f32 %v1882_v51, %v2233_v24 }
 0x6d9   :  { %v791_v49 = vpop.permute.xlu1 %790 }
 0x6da   :  { %v793_v50 = vmul.f32 %v1880_v47, %v791_v49 }
 0x6dc   :  { %795 = vrot.lane.b32.xlu1 %v793_v50, %s1920_s2 }
 0x6e7   :  { %v773_v52 = vpop.permute.xlu0 %772 }
 0x6e8   :  { %v775_v53 = vmul.f32 %v1882_v51, %v773_v52 }
 0x6ea   :  { %777 = vrot.lane.b32.xlu0 %v775_v53, %s1920_s2 }
 0x74e   :  { %v796_v54 = vpop.permute.xlu1 %795 }
 0x74f   :  { %v798_v56 = vadd.f32 %v796_v54, %v669_v39 }
 0x751   :  { %1883 = vtanh.f32 %v798_v56  ;;  %v1839_v56 = vld [vmem:[%s2475_s12] sm:$0xff]  }
 0x752   :  { %1762 = vmatprep.subr.bf16.mxu0 %v1839_v56 }
 0x75b   :  { %v1884_v57 = vpop.eup %1883 }
 0x75c   :  { %v778_v58 = vpop.permute.xlu0 %777  ;;  %810 = vrot.lane.b32.xlu1 %v1884_v57, %s1921_s0 }
 0x75d   :  { %v780_v59 = vadd.f32 %v778_v58, %v667_v15 }
 0x75f   :  { %1885 = vtanh.f32 %v780_v59 }
 0x769   :  { %v1886_v60 = vpop.eup %1885 }
 0x76a   :  { %802 = vrot.lane.b32.xlu0 %v1886_v60, %s1921_s0  ;;  %v1841_v60 = vld [vmem:[%s2475_s12 + $0x8] sm:$0xff]  }
 0x7ce   :  { %v811_v62 = vpop.permute.xlu1 %810 }
 0x7cf   :  { %v813_v0 = vmul.f32 %v811_v62, %v808_v61  ;;  %v1842_v61 = vld [vmem:[%s2476_s16 + $0x8] sm:$0xff]  }
 0x7d1   :  { %v815_v2 = vadd.f32 %v814_v63, %v813_v0 }
 0x7d3   :  { %v2262_v3 = vsel %vm644_vm11, %v815_v2, %v2218_v9  ;;  %v825_v52 = vsel %vm644_vm11, %v815_v2, 0.0 }
 0x7d4   :  { %v882_v4 = vpack.c.bf16 %v2262_v3, %v2262_v3 }
 0x7d6   :  { %884 = vrot.lane.b32.xlu1 %v882_v4, %s1921_s0  ;;  %v659_v4 = vsel %vm650_vm10, %v2211_v8, 0.0 }
 0x7dc   :  { %v803_v1 = vpop.permute.xlu0 %802 }
 0x7dd   :  { %v805_v7 = vmul.f32 %v803_v1, %v800_v55  ;;  %v1844_v55 = vld [vmem:[%s2478_s15] sm:$0xff]  }
 0x7df   :  { %v807_v10 = vadd.f32 %v806_v6, %v805_v7  ;;  %v652_v6 = vsel %vm644_vm11, %v2226_v23, 0.0 }
 0x7e1   :  { %v2271_v16 = vsel %vm650_vm10, %v807_v10, %v2233_v24  ;;  %v818_v54 = vsel %vm650_vm10, %v807_v10, 0.0 }
 0x7e2   :  { %v835_v9 = vpack.c.bf16 %v2271_v16, %v2271_v16 }
 0x7e4   :  { %837 = vrot.lane.b32.xlu0 %v835_v9, %s1921_s0 }
 0x848   :  { %v885_v18 = vpop.permute.xlu1 %884 }
 0x849   :  { %1759 = vmatmul.mubr.msk.bf16.vlgmr.msra.gmra.mrb[16].mxu1 %vm315_vm7, %v885_v18 }
 0x856   :  { %v838_v21 = vpop.permute.xlu0 %837 }
 0x857   :  { %1751 = vmatmul.mubr.msk.bf16.vlgmr.msra.gmra.mrb[16].mxu0 %vm315_vm7, %v838_v21 }
 0x858   :  { %1763 = vmatpush3.bf16.msra.mxu0 %v1839_v56 }
 0x859   :  { %1764 = vmatprep.subr.bf16.mxu0 %v1841_v60 }
 0x85c   :  { %1765 = vmatpush3.bf16.msra.mxu0 %v1841_v60 }
 0x91c   :  { %v923_v22 = vpop.f32.mrb[16].mxu1 }
 0x91d   :  { %v924_v25 = vadd.f32 %v2136_v34, %v923_v22  ;;  %v1760_v28 = vpop.f32.mrb[17].mxu1 }
 0x91e   :  { %v926_v29 = vpop.f32.mrb[18].mxu1 }
 0x91f   :  { %955 = vrot.lane.b32.xlu1 %v924_v25, %s1920_s2  ;;  %v1761_v24 = vpop.f32.mrb[19].mxu1  ;;  %v947_v35 = vadd.f32 %v924_v25, %v834_v33 }
 0x920   :  { %v1845_v24 = vld [vmem:[%s2477_s11 + $0x8] sm:$0xff]  }
 0x921   :  { %v1589_v37 = vmul.f32 -1.442695, %v947_v35 }
 0x923   :  { %1887 = vpow2.f32 %v1589_v37 }
 0x92a   :  { %v876_v11 = vpop.f32.mrb[16].mxu0 }
 0x92b   :  { %v877_v30 = vadd.f32 %v2143_v36, %v876_v11  ;;  %v1752_v31 = vpop.f32.mrb[17].mxu0  ;;  %v1846_v11 = vld [vmem:[%s2478_s15 + $0x8] sm:$0xff]  }
 0x92c   :  { %v879_v32 = vpop.f32.mrb[18].mxu0 }
 0x92d   :  { %937 = vrot.lane.b32.xlu0 %v877_v30, %s1920_s2  ;;  %v1753_v14 = vpop.f32.mrb[19].mxu0  ;;  %v929_v38 = vadd.f32 %v877_v30, %v833_v13  ;;  %v1888_v34 = vpop.eup %1887 }
 0x92e   :  { %v951_v40 = vadd.f32 1.0, %v1888_v34 }
 0x92f   :  { %v1588_v39 = vmul.f32 -1.442695, %v929_v38  ;;  %v1608_v38 = vld [vmem:[%s2480_s17] ss:$0 sm:$0xff] }
 0x931   :  { %1889 = vpow2.f32 %v1588_v39 }
 0x932   :  { %1891 = vrcp.f32 %v951_v40 }
 0x93b   :  { %v1890_v41 = vpop.eup %1889 }
 0x93c   :  { %v1892_v15 = vpop.eup %1891  ;;  %v933_v42 = vadd.f32 1.0, %v1890_v41 }
 0x93d   :  { %v973_v57 = vsub.f32 1.0, %v1892_v15 }
 0x93e   :  { %1893 = vrcp.f32 %v933_v42 }
 0x948   :  { %v1894_v44 = vpop.eup %1893 }
 0x949   :  { %v965_v1 = vsub.f32 1.0, %v1894_v44  ;;  %v971_v5 = vmul.f32 %v1894_v44, %v2271_v16 }
 0x991   :  { %v956_v36 = vpop.permute.xlu1 %955 }
 0x992   :  { %v958_v43 = vmul.f32 %v1892_v15, %v956_v36 }
 0x994   :  { %960 = vrot.lane.b32.xlu1 %v958_v43, %s1920_s2 }
 0x99f   :  { %v938_v45 = vpop.permute.xlu0 %937 }
 0x9a0   :  { %v940_v46 = vmul.f32 %v1894_v44, %v938_v45 }
 0x9a2   :  { %942 = vrot.lane.b32.xlu0 %v940_v46, %s1920_s2 }
 0xa06   :  { %v961_v47 = vpop.permute.xlu1 %960 }
 0xa07   :  { %v963_v48 = vadd.f32 %v961_v47, %v834_v33 }
 0xa09   :  { %1895 = vtanh.f32 %v963_v48 }
 0xa13   :  { %v1896_v49 = vpop.eup %1895 }
 0xa14   :  { %v943_v50 = vpop.permute.xlu0 %942  ;;  %975 = vrot.lane.b32.xlu1 %v1896_v49, %s1921_s0 }
 0xa15   :  { %v945_v51 = vadd.f32 %v943_v50, %v833_v13  ;;  %v1598_v13 = vld [vmem:[%s2479_s13] ss:$0 sm:$0xff] }
 0xa17   :  { %1897 = vtanh.f32 %v945_v51 }
 0xa18   :  { %827 = vrot.lane.b32.xlu1 %v825_v52, %s1921_s0  ;;  %v1599_v52 = vld [vmem:[%s2482_s14] ss:$0 sm:$0xff] }
 0xa1c   :  { %483 = vrot.lane.b32.xlu1 %v2167_v19, %s1921_s0  ;;  %v1840_v19 = vld [vmem:[%s2476_s16] sm:$0xff]  }
 0xa1d   :  { %1778 = vmatprep.subr.bf16.mxu1 %v1840_v19 }
 0xa1e   :  { %1779 = vmatpush3.bf16.msra.mxu1 %v1840_v19 }
 0xa1f   :  { %1780 = vmatprep.subr.bf16.mxu1 %v1842_v61 }
 0xa20   :  { %478 = vrot.lane.b32.xlu1 %v2177_v27, %s1921_s0  ;;  %v979_v27 = vmul.f32 %v1892_v15, %v2262_v3  ;;  %v1843_v3 = vld [vmem:[%s2477_s11] sm:$0xff]  }
 0xa21   :  { %v1898_v53 = vpop.eup %1897  ;;  %1770 = vmatprep.subr.bf16.mxu0 %v1843_v3 }
 0xa22   :  { %967 = vrot.lane.b32.xlu0 %v1898_v53, %s1921_s0  ;;  %1781 = vmatpush3.bf16.msra.mxu1 %v1842_v61 }
 0xa23   :  { %1786 = vmatprep.subr.bf16.mxu1 %v1844_v55 }
 0xa24   :  { %820 = vrot.lane.b32.xlu1 %v818_v54, %s1921_s0 }
 0xa86   :  { %v976_v58 = vpop.permute.xlu1 %975 }
 0xa87   :  { %v978_v59 = vmul.f32 %v976_v58, %v973_v57 }
 0xa89   :  { %v980_v62 = vadd.f32 %v979_v27, %v978_v59 }
 0xa8a   :  { %v828_v63 = vpop.permute.xlu1 %827 }
 0xa8b   :  { %831 = vst.msk [vmem:[#allocation5 + $0x8] sm:$0xff] %vm315_vm7, %v828_v63  ;;  %v988_v0 = vsel %vm469_vm6, %v980_v62, 0.0 }
 0xa8c   :  { %990 = vrot.lane.b32.xlu0 %v988_v0, %s1921_s0  ;;  %v1187_v0 = vld [vmem:[%s2483_s1 + $0x8] sm:$0xff] }
 0xa8d   :  { %vm1191_vm12 = vcmp.ne.s32.totalorder %v1187_v0, 0 }
 0xa8e   :  { %v484_v2 = vpop.permute.xlu1 %483 }
 0xa8f   :  { %487 = vst.msk [vmem:[#allocation5 + $0x18] sm:$0xff] %vm315_vm7, %v484_v2  ;;  %v1186_v2 = vld [vmem:[%s2483_s1] sm:$0xff] }
 0xa90   :  { %661 = vrot.lane.b32.xlu0 %v659_v4, %s1921_s0  ;;  %vm1190_vm13 = vcmp.ne.s32.totalorder %v1186_v2, 0 }
 0xa92   :  { %v479_v26 = vpop.permute.xlu1 %478  ;;  %v2338_v16 = vld [vmem:[#allocation5 + $0x8] sm:$0xff] }
 0xa93   :  { %481 = vst.msk [vmem:[#allocation4] sm:$0xff] %vm315_vm7, %v479_v26 }
 0xa94   :  { %v968_v7 = vpop.permute.xlu0 %967  ;;  %654 = vrot.lane.b32.xlu0 %v652_v6, %s1921_s0 }
 0xa95   :  { %v970_v8 = vmul.f32 %v968_v7, %v965_v1 }
 0xa96   :  { %v821_v10 = vpop.permute.xlu1 %820  ;;  %v2347_v28 = vld [vmem:[#allocation5 + $0x18] sm:$0xff] }
 0xa97   :  { %v972_v9 = vadd.f32 %v971_v5, %v970_v8  ;;  %824 = vst.msk [vmem:[#allocation4 + $0x10] sm:$0xff] %vm315_vm7, %v821_v10 }
 0xa99   :  { %v981_v18 = vsel %vm475_vm5, %v972_v9, 0.0 }
 0xa9a   :  { %983 = vrot.lane.b32.xlu0 %v981_v18, %s1921_s0  ;;  %v2360_v31 = vld [vmem:[#allocation4] sm:$0xff] }
 0xa9e   :  { %v2372_v35 = vld [vmem:[#allocation4 + $0x10] sm:$0xff] }
 0xafe   :  { %v991_v21 = vpop.permute.xlu0 %990 }
 0xaff   :  { %993 = vst.msk [vmem:[#allocation5] sm:$0xff] %vm315_vm7, %v991_v21 }
 0xb02   :  { %v662_v20 = vpop.permute.xlu0 %661 }
 0xb03   :  { %665 = vst.msk [vmem:[#allocation5 + $0x10] sm:$0xff] %vm315_vm7, %v662_v20 }
 0xb06   :  { %v655_v23 = vpop.permute.xlu0 %654  ;;  %v2336_v22 = vld [vmem:[#allocation5] sm:$0xff] }
 0xb07   :  { %658 = vst.msk [vmem:[#allocation4 + $0x8] sm:$0xff] %vm315_vm7, %v655_v23  ;;  %v1004_v25 = vpack.c.bf16 %v2338_v16, %v2336_v22 }
 0xb09   :  { %1766 = vmatprep.mubr.msk.bf16.mxu0 %vm315_vm7, %v1004_v25  ;;  %1782 = vmatprep.mubr.msk.bf16.mxu1 %vm315_vm7, %v1004_v25 }
 0xb0a   :  { %v2345_v17 = vld [vmem:[#allocation5 + $0x10] sm:$0xff] }
 0xb0b   :  { %v1005_v29 = vpack.c.bf16 %v2347_v28, %v2345_v17 }
 0xb0c   :  { %v984_v30 = vpop.permute.xlu0 %983 }
 0xb0d   :  { %987 = vst.msk [vmem:[#allocation4 + $0x18] sm:$0xff] %vm315_vm7, %v984_v30  ;;  %1767 = vmatmul.mubr.msk.bf16.vlgmr.msra.gmra.mrb[20].mxu0 %vm315_vm7, %v1005_v29  ;;  %1783 = vmatmul.mubr.msk.bf16.vlgmr.msra.gmra.mrb[20].mxu1 %vm315_vm7, %v1005_v29 }
 0xb0e   :  { %1771 = vmatpush3.bf16.msra.mxu0 %v1843_v3  ;;  %v2362_v32 = vld [vmem:[#allocation4 + $0x8] sm:$0xff]  ;;  %1787 = vmatpush3.bf16.msra.mxu1 %v1844_v55  ;;  %v1189_v3 = vld [vmem:[%s2483_s1 + $0x18] sm:$0xff]  ;;  %v1188_v55 = vld [vmem:[%s2483_s1 + $0x10] sm:$0xff] }
 0xb0f   :  { %v1002_v14 = vpack.c.bf16 %v2362_v32, %v2360_v31  ;;  %1772 = vmatprep.subr.bf16.mxu0 %v1845_v24  ;;  %1788 = vmatprep.subr.bf16.mxu1 %v1846_v11  ;;  %vm1193_vm14 = vcmp.ne.s32.totalorder %v1189_v3, 0  ;;  %vm1192_vm15 = vcmp.ne.s32.totalorder %v1188_v55, 0 }
 0xb11   :  { %1774 = vmatprep.mubr.msk.bf16.mxu0 %vm315_vm7, %v1002_v14  ;;  %1790 = vmatprep.mubr.msk.bf16.mxu1 %vm315_vm7, %v1002_v14 }
 0xb12   :  { %1773 = vmatpush3.bf16.msra.mxu0 %v1845_v24  ;;  %1789 = vmatpush3.bf16.msra.mxu1 %v1846_v11 }
 0xb13   :  { %1794 = vmatprep.subr.bf16.mxu0 %v1918_v12  ;;  %1802 = vmatprep.subr.bf16.mxu1 %v1918_v12 }
 0xb14   :  { %v2370_v33 = vld [vmem:[#allocation4 + $0x18] sm:$0xff] }
 0xb15   :  { %v1003_v37 = vpack.c.bf16 %v2370_v33, %v2372_v35 }
 0xb19   :  { %1775 = vmatmul.mubr.msk.bf16.vlgmr.msra.gmra.mrb[20].mxu0 %vm315_vm7, %v1003_v37  ;;  %1791 = vmatmul.mubr.msk.bf16.vlgmr.msra.gmra.mrb[20].mxu1 %vm315_vm7, %v1003_v37 }
 0xb1a   :  { %1798 = vmatprep.mubr.msk.bf16.mxu0 %vm1919_vm1, %v1918_v12  ;;  %1806 = vmatprep.mubr.msk.bf16.mxu1 %vm1919_vm1, %v1918_v12 }
 0xbec   :  { %v1776_v34 = vpop.f32.mrb[20].mxu0  ;;  %v1792_v39 = vpop.f32.mrb[20].mxu1 }
 0xbed   :  { %v1157_v40 = vadd.f32 %v1776_v34, %v1598_v13  ;;  %v1411_v41 = vadd.f32 %v1792_v39, %v1608_v38  ;;  %v1133_v15 = vpop.f32.mrb[21].mxu0  ;;  %v1387_v42 = vpop.f32.mrb[21].mxu1 }
 0xbee   :  { %v1155_v36 = vadd.f32 %v1598_v13, %v1133_v15  ;;  %v1409_v43 = vadd.f32 %v1608_v38, %v1387_v42  ;;  %v1777_v44 = vpop.f32.mrb[22].mxu0  ;;  %v1793_v45 = vpop.f32.mrb[22].mxu1 }
 0xbef   :  { %1899 = vtanh.f32 %v1157_v40  ;;  %1415 = vst [vmem:[%s2481_s21 + $0x10] sm:$0xff] %v1411_v41  ;;  %v1158_v46 = vadd.f32 %v1777_v44, %v1598_v13  ;;  %v1412_v47 = vadd.f32 %v1793_v45, %v1608_v38  ;;  %v1136_v48 = vpop.f32.mrb[23].mxu0  ;;  %v1390_v49 = vpop.f32.mrb[23].mxu1 }
 0xbf0   :  { %1901 = vtanh.f32 %v1155_v36  ;;  %1413 = vst [vmem:[%s2481_s21] sm:$0xff] %v1409_v43  ;;  %v1156_v50 = vadd.f32 %v1598_v13, %v1136_v48  ;;  %v1410_v51 = vadd.f32 %v1608_v38, %v1390_v49 }
 0xbf1   :  { %1903 = vtanh.f32 %v1158_v46  ;;  %1416 = vst [vmem:[%s2481_s21 + $0x18] sm:$0xff] %v1412_v47 }
 0xbf2   :  { %1905 = vtanh.f32 %v1156_v50  ;;  %1414 = vst [vmem:[%s2481_s21 + $0x8] sm:$0xff] %v1410_v51 }
 0xbf9   :  { %v1900_v53 = vpop.eup %1899 }
 0xbfa   :  { %v1902_v54 = vpop.eup %1901  ;;  %v1172_v61 = vmul.f32 %v1900_v53, %v1599_v52  ;;  %v1847_v53 = vld [vmem:[%s2484_s19] sm:$0xff]  }
 0xbfb   :  { %v1904_v56 = vpop.eup %1903  ;;  %v1170_v57 = vmul.f32 %v1902_v54, %v1599_v52  ;;  %v1848_v54 = vld [vmem:[%s2485_s18] sm:$0xff]   ;;  %1795 = vmatpush3.bf16.msra.mxu0 %v1847_v53 }
 0xbfc   :  { %v1906_v19 = vpop.eup %1905  ;;  %v1173_v59 = vmul.f32 %v1904_v56, %v1599_v52  ;;  %v1180_v63 = vsel %vm124_vm0, %v1172_v61, 0.0  ;;  %1803 = vmatpush3.bf16.msra.mxu1 %v1848_v54  ;;  %1796 = vmatprep.subr.bf16.mxu0 %v1918_v12  ;;  %v1849_v56 = vld [vmem:[%s2484_s19 + $0x8] sm:$0xff]  }
 0xbfd   :  { %v1174_v58 = vsel %vm124_vm0, %v1170_v57, 0.0  ;;  %v1171_v27 = vmul.f32 %v1906_v19, %v1599_v52  ;;  %1804 = vmatprep.subr.bf16.mxu1 %v1918_v12  ;;  %v1850_v57 = vld [vmem:[%s2485_s18 + $0x8] sm:$0xff]  }
 0xbfe   :  { %1175 = vadd.xlane.f32.xlu1 %v1174_v58  ;;  %v1183_v62 = vsel %vm124_vm0, %v1173_v59, 0.0 }
 0xbff   :  { %v1177_v60 = vsel %vm124_vm0, %v1171_v27, 0.0  ;;  %vm1198_vm0 = vcmask 7168   ;;  %1797 = vmatpush3.bf16.msra.mxu0 %v1849_v56 }
 0xc00   :  { %1178 = vadd.xlane.f32.xlu0 %v1177_v60  ;;  %1805 = vmatpush3.bf16.msra.mxu1 %v1850_v57 }
 0xc02   :  { %1184 = vadd.xlane.f32.xlu1 %v1183_v62 }
 0xc04   :  { %1181 = vadd.xlane.f32.xlu0 %v1180_v63 }
 0xc8b   :  { %v1176_v4 = vpop.xlane.xlu1 %1175 }
 0xc8c   :  { %v1194_v7 = vsel %vm1190_vm13, %v1176_v4, -1e+09 }
 0xc8d   :  { %v1179_v26 = vpop.xlane.xlu0 %1178  ;;  %v1199_v18 = vsel %vm1198_vm0, %v1194_v7, -inf }
 0xc8e   :  { %v1195_v1 = vsel %vm1191_vm12, %v1179_v26, -1e+09 }
 0xc8f   :  { %v1185_v6 = vpop.xlane.xlu1 %1184  ;;  %v1200_v8 = vsel %vm1198_vm0, %v1195_v1, -inf }
 0xc90   :  { %v1197_v5 = vsel %vm1193_vm14, %v1185_v6, -1e+09  ;;  %v1203_v23 = vmax.f32 %v1199_v18, %v1200_v8  ;;  %v1615_v18 = vld [vmem:[%s2486_s20] ss:$0 sm:$0xff] }
 0xc91   :  { %v1182_v10 = vpop.xlane.xlu0 %1181  ;;  %v1202_v21 = vsel %vm1198_vm0, %v1197_v5, -inf }
 0xc92   :  { %v1196_v9 = vsel %vm1192_vm15, %v1182_v10, -1e+09 }
 0xc93   :  { %v1201_v20 = vsel %vm1198_vm0, %v1196_v9, -inf }
 0xc94   :  { %v1204_v25 = vmax.f32 %v1201_v20, %v1202_v21 }
 0xc96   :  { %v1205_v29 = vmax.f32 %v1203_v23, %v1204_v25 }
 0xc98   :  { %v1206_v24 = vsub.f32 %v1194_v7, %v1205_v29  ;;  %v1207_v11 = vsub.f32 %v1195_v1, %v1205_v29  ;;  %v1208_v30 = vsub.f32 %v1196_v9, %v1205_v29  ;;  %v1209_v14 = vsub.f32 %v1197_v5, %v1205_v29 }
 0xc9a   :  { %v1210_v37 = vmul.f32 1.442695, %v1206_v24  ;;  %v1212_v13 = vmul.f32 1.442695, %v1207_v11  ;;  %v1214_v38 = vmul.f32 1.442695, %v1208_v30 }
 0xc9b   :  { %v1216_v34 = vmul.f32 1.442695, %v1209_v14 }
 0xc9c   :  { %1907 = vpow2.f32 %v1210_v37 }
 0xc9d   :  { %1909 = vpow2.f32 %v1212_v13 }
 0xc9e   :  { %1911 = vpow2.f32 %v1214_v38 }
 0xc9f   :  { %1913 = vpow2.f32 %v1216_v34 }
 0xca6   :  { %v1908_v39 = vpop.eup %1907 }
 0xca7   :  { %v1910_v40 = vpop.eup %1909  ;;  %v1218_v41 = vsel %vm1198_vm0, %v1908_v39, 0.0 }
 0xca8   :  { %v1912_v15 = vpop.eup %1911  ;;  %v1219_v42 = vsel %vm1198_vm0, %v1910_v40, 0.0 }
 0xca9   :  { %v1914_v36 = vpop.eup %1913  ;;  %v1220_v43 = vadd.f32 %v1219_v42, %v1218_v41  ;;  %v1221_v44 = vsel %vm1198_vm0, %v1912_v15, 0.0 }
 0xcaa   :  { %v1223_v46 = vsel %vm1198_vm0, %v1914_v36, 0.0 }
 0xcab   :  { %v1222_v45 = vadd.f32 %v1221_v44, %v1220_v43 }
 0xcad   :  { %v1224_v47 = vadd.f32 %v1223_v46, %v1222_v45 }
 0xcaf   :  { %1915 = vrcp.f32 %v1224_v47 }
 0xcb9   :  { %v1916_v48 = vpop.eup %1915 }
 0xcba   :  { %v1227_v49 = vmul.f32 %v1916_v48, %v1910_v40  ;;  %v1226_v50 = vmul.f32 %v1916_v48, %v1908_v39  ;;  %v1228_v51 = vmul.f32 %v1916_v48, %v1912_v15  ;;  %v1229_v52 = vmul.f32 %v1916_v48, %v1914_v36 }
 0xcbc   :  { %1237 = vperm.xlu1 %1824, %v1227_v49   ;;  %1232 = vperm.xlu0 %1823, %v1226_v50  }
 0xcc0   :  { %1242 = vperm.xlu1 %1824, %v1228_v51   ;;  %1247 = vperm.xlu0 %1823, %v1229_v52  }
 0xd3b   :  { %v1238_v19 = vpop.permute.xlu1 %1237  ;;  %v1233_v58 = vpop.permute.xlu0 %1232 }
 0xd3c   :  { %v1251_v27 = vmul.f32 %v1238_v19, %v2362_v32  ;;  %v1262_v59 = vmul.f32 %v1238_v19, %v2338_v16  ;;  %v1250_v60 = vmul.f32 %v1233_v58, %v2360_v31  ;;  %v1261_v12 = vmul.f32 %v1233_v58, %v2336_v22 }
 0xd3e   :  { %v1255_v61 = vsel %vm315_vm7, %v1251_v27, 0.0  ;;  %v1266_v62 = vsel %vm315_vm7, %v1262_v59, 0.0  ;;  %v1254_v63 = vsel %vm315_vm7, %v1250_v60, 0.0  ;;  %v1265_v0 = vsel %vm315_vm7, %v1261_v12, 0.0 }
 0xd3f   :  { %v1243_v2 = vpop.permute.xlu1 %1242  ;;  %v1248_v3 = vpop.permute.xlu0 %1247  ;;  %v1256_v55 = vadd.f32 %v1255_v61, %v1254_v63  ;;  %v1267_v22 = vadd.f32 %v1266_v62, %v1265_v0 }
 0xd40   :  { %v1252_v4 = vmul.f32 %v1243_v2, %v2372_v35  ;;  %v1263_v32 = vmul.f32 %v1243_v2, %v2345_v17  ;;  %v1253_v16 = vmul.f32 %v1248_v3, %v2370_v33  ;;  %v1264_v31 = vmul.f32 %v1248_v3, %v2347_v28 }
 0xd42   :  { %v1257_v26 = vsel %vm315_vm7, %v1252_v4, 0.0  ;;  %v1268_v1 = vsel %vm315_vm7, %v1263_v32, 0.0  ;;  %v1259_v5 = vsel %vm315_vm7, %v1253_v16, 0.0  ;;  %v1270_v8 = vsel %vm315_vm7, %v1264_v31, 0.0 }
 0xd43   :  { %v1258_v6 = vadd.f32 %v1257_v26, %v1256_v55  ;;  %v1269_v7 = vadd.f32 %v1268_v1, %v1267_v22 }
 0xd45   :  { %v1260_v10 = vadd.f32 %v1259_v5, %v1258_v6  ;;  %v1271_v35 = vadd.f32 %v1270_v8, %v1269_v7 }
 0xd47   :  { %v1417_v9 = vpack.c.bf16 %v1260_v10, %v1260_v10  ;;  %v1422_v17 = vpack.c.bf16 %v1271_v35, %v1271_v35 }
 0xd49   :  { %1799 = vmatmul.mubr.msk.bf16.vlgmr.msra.gmra.mrb[24].mxu0 %vm315_vm7, %v1422_v17  ;;  %1807 = vmatmul.mubr.msk.bf16.vlgmr.msra.gmra.mrb[24].mxu1 %vm315_vm7, %v1417_v9 }
 0xe1c   :  { %v1476_v28 = vpop.f32.mrb[24].mxu0  ;;  %v1531_v33 = vpop.f32.mrb[24].mxu1 }
 0xe1d   :  { %v1532_v21 = vadd.f32 %v1531_v33, %v1476_v28  ;;  %v1800_v20 = vpop.f32.mrb[25].mxu0  ;;  %v1808_v23 = vpop.f32.mrb[25].mxu1 }
 0xe1e   :  { %v1479_v25 = vpop.f32.mrb[26].mxu0  ;;  %v1534_v29 = vpop.f32.mrb[26].mxu1 }
 0xe1f   :  { %v1544_v24 = vadd.f32 %v1615_v18, %v1532_v21  ;;  %v1801_v11 = vpop.f32.mrb[27].mxu0  ;;  %v1809_v30 = vpop.f32.mrb[27].mxu1 }
 0xe21   :  { %1545 = vst [vmem:[%s2487_s22] sm:$0xff] %v1544_v24 }

// kernel: hierarchical_forward.2
= control target key start
LH: loop header
LB: loop body
LE: loop exit
PB: predicated region body
PF: predicated region fallthrough
CT: control target
= control target key end

     0   :  { %v2630_v1 = vmov 0.0   ;;  %vm2631_vm0 = vmmov 0   ;;  %vm102_vm1 = vcmask 261120   ;;  %v2632_v3 = vmov 0   ;;  %s2633_s29 = smov 64   ;;  %s3435_s3 = inlined_call_operand.vmem [shape: bf16[32,96], index: 3, kind: input, shape index: {}]   ;;  %s3436_s2 = inlined_call_operand.vmem [shape: bf16[8,8,32], index: 2, kind: input, shape index: {}]   ;;  %s3437_s4 = inlined_call_operand.vmem [shape: bf16[32,96], index: 4, kind: input, shape index: {}]   ;;  %s3438_s7 = inlined_call_operand.vmem [shape: bf16[32,96], index: 7, kind: input, shape index: {}]   ;;  %s3439_s8 = inlined_call_operand.vmem [shape: bf16[32,96], index: 8, kind: input, shape index: {}]   ;;  %s3440_s5 = inlined_call_operand.vmem [shape: f32[1,96], index: 5, kind: input, shape index: {}]   ;;  %s3441_s6 = inlined_call_operand.vmem [shape: f32[1,96], index: 6, kind: input, shape index: {}]   ;;  %s3442_s10 = inlined_call_operand.vmem [shape: f32[1,96], index: 10, kind: input, shape index: {}]   ;;  %s3443_s9 = inlined_call_operand.vmem [shape: f32[1,96], index: 9, kind: input, shape index: {}]   ;;  %s3444_s0 = inlined_call_operand.vmem [shape: s32[8,1], index: 0, kind: input, shape index: {}]   ;;  %s3445_s12 = inlined_call_operand.vmem [shape: bf16[32,64], index: 12, kind: input, shape index: {}]   ;;  %s3446_s11 = inlined_call_operand.vmem [shape: bf16[32,64], index: 11, kind: input, shape index: {}]   ;;  %s3447_s13 = inlined_call_operand.vmem [shape: f32[1,64], index: 13, kind: input, shape index: {}]   ;;  %s3448_s14 = inlined_call_operand.vmem [shape: f32[1,1,64], index: 14, kind: input, shape index: {}]   ;;  %s3449_s1 = inlined_call_operand.vmem [shape: s32[8,8,1], index: 1, kind: input, shape index: {}]   ;;  %s3450_s15 = inlined_call_operand.vmem [shape: f32[8,64], index: 15, kind: output, shape index: {}]  }
   0x1   :  { %v2478_v0 = vld [vmem:[%s3435_s3] sm:$0xff]   ;;  %2310 = vmatprep.subr.bf16.mxu0 %v2630_v1  ;;  %2314 = vmatprep.mubr.msk.bf16.mxu0 %vm2631_vm0, %v2630_v1  ;;  %v2479_v2 = vld [vmem:[%s3435_s3 + $0x8] sm:$0xff]   ;;  %v2485_v9 = vld [vmem:[%s3436_s2 + $0x10] sm:$0xff]   ;;  %vm268_vm2 = vcmask 785408  }
   0x2   :  { %2476 = vset.pattern.permute.xlu0 %v2632_v3  ;;  %2477 = vset.pattern.permute.xlu1 %v2632_v3  ;;  %v2480_v4 = vld [vmem:[%s3436_s2] sm:$0xff]   ;;  %v2481_v7 = vld [vmem:[%s3436_s2 + $0x8] sm:$0xff]   ;;  %v2486_v11 = vld [vmem:[%s3436_s2 + $0x18] sm:$0xff]  }
   0x3   :  { %2286 = vmatprep.subr.bf16.mxu1 %v2478_v0  ;;  %2290 = vmatprep.mubr.msk.bf16.mxu1 %vm102_vm1, %v2480_v4  ;;  %v2482_v5 = vld [vmem:[%s3437_s4] sm:$0xff]   ;;  %v2746_v8 = vld [vmem:[%s3438_s7 + $0x8] sm:$0xff]  }
   0x4   :  { %2287 = vmatpush3.bf16.msra.mxu1 %v2478_v0  ;;  %v2737_v6 = vld [vmem:[%s3438_s7] sm:$0xff]   ;;  %v2487_v10 = vld [vmem:[%s3437_s4 + $0x8] sm:$0xff]  }
   0x5   :  { %2288 = vmatprep.subr.bf16.mxu1 %v2479_v2  ;;  %2311 = vmatpush3.bf16.msra.mxu0 %v2737_v6  ;;  %v2775_v12 = vld [vmem:[%s3439_s8] sm:$0xff]   ;;  %v2783_v13 = vld [vmem:[%s3439_s8 + $0x8] sm:$0xff]  }
   0x6   :  { %2312 = vmatprep.subr.bf16.mxu0 %v2630_v1  ;;  %v2146_v14 = vld [vmem:[%s3440_s5] ss:$0 sm:$0xff] }
   0x7   :  { %v2157_v35 = vld [vmem:[%s3441_s6] ss:$0 sm:$0xff] }
   0x8   :  { %2289 = vmatpush3.bf16.msra.mxu1 %v2479_v2  ;;  %v2823_v52 = vld [vmem:[%s3442_s10] ss:$0 sm:$0xff] }
   0x9   :  { %2298 = vmatprep.subr.bf16.mxu1 %v2482_v5  ;;  %2313 = vmatpush3.bf16.msra.mxu0 %v2746_v8  ;;  %v2829_v56 = vld [vmem:[%s3443_s9] ss:$0 sm:$0xff] }
   0xa   :  { %2326 = vmatprep.subr.bf16.mxu0 %v2630_v1 }
   0xb   :  { %2291 = vmatmul.mubr.msk.bf16.vlgmr.msra.gmra.mrb[0].mxu1 %vm102_vm1, %v2481_v7 }
   0xc   :  { %2299 = vmatpush3.bf16.msra.mxu1 %v2482_v5  ;;  %2294 = vmatprep.mubr.msk.bf16.mxu1 %vm102_vm1, %v2485_v9 }
   0xd   :  { %2300 = vmatprep.subr.bf16.mxu1 %v2487_v10  ;;  %2315 = vmatmul.mubr.bf16.vlgmr.msra.gmra.mrb[0].mxu0 %v2632_v3 }
   0xe   :  { %2327 = vmatpush3.bf16.msra.mxu0 %v2737_v6  ;;  %2330 = vmatprep.mubr.msk.bf16.mxu0 %vm2631_vm0, %v2630_v1 }
   0xf   :  { %2328 = vmatprep.subr.bf16.mxu0 %v2630_v1 }
  0x10   :  { %2301 = vmatpush3.bf16.msra.mxu1 %v2487_v10 }
  0x11   :  { %2318 = vmatprep.subr.bf16.mxu1 %v2630_v1 }
  0x12   :  { %2329 = vmatpush3.bf16.msra.mxu0 %v2746_v8 }
  0x13   :  { %2295 = vmatmul.mubr.msk.bf16.gmra.mrb[4].mxu1 %vm102_vm1, %v2486_v11  ;;  %2342 = vmatprep.subr.bf16.mxu0 %v2630_v1 }
  0x14   :  { %2302 = vmatprep.mubr.msk.bf16.mxu1 %vm102_vm1, %v2480_v4 }
  0x1b   :  { %2303 = vmatmul.mubr.msk.bf16.vlgmr.msra.gmra.mrb[8].mxu1 %vm102_vm1, %v2481_v7 }
  0x1c   :  { %2319 = vmatpush3.bf16.msra.mxu1 %v2775_v12  ;;  %2306 = vmatprep.mubr.msk.bf16.mxu1 %vm102_vm1, %v2485_v9  ;;  %v2837_v9 = vld [vmem:[%s3444_s0] sm:$0xff]  ;;  %s2634_s0 = smov 96  }
  0x1d   :  { %2320 = vmatprep.subr.bf16.mxu1 %v2630_v1  ;;  %vm471_vm3 = vcmp.gt.s32.totalorder %v2837_v9, 7  ;;  %vm470_vm4 = vcmp.gt.s32.totalorder %v2837_v9, 0  ;;  %vm646_vm7 = vcmp.gt.s32.totalorder %v2837_v9, 6  ;;  %vm645_vm8 = vcmp.gt.s32.totalorder %v2837_v9, 1 }
  0x1e   :  { %v478_v10 = vsel %vm471_vm3, 1, %v2632_v3  ;;  %vm824_vm11 = vcmp.gt.s32.totalorder %v2837_v9, 5  ;;  %vm823_vm12 = vcmp.gt.s32.totalorder %v2837_v9, 2  ;;  %vm1002_vm15 = vcmp.gt.s32.totalorder %v2837_v9, 4 }
  0x20   :  { %2321 = vmatpush3.bf16.msra.mxu1 %v2783_v13 }
  0x21   :  { %2334 = vmatprep.subr.bf16.mxu1 %v2630_v1 }
  0x23   :  { %2307 = vmatmul.mubr.msk.bf16.gmra.mrb[12].mxu1 %vm102_vm1, %v2486_v11 }
  0x24   :  { %2322 = vmatprep.mubr.msk.bf16.mxu1 %vm2631_vm0, %v2630_v1 }
  0x2b   :  { %2323 = vmatmul.mubr.bf16.vlgmr.msra.gmra.mrb[16].mxu1 %v2632_v3 }
  0x2c   :  { %2335 = vmatpush3.bf16.msra.mxu1 %v2775_v12  ;;  %2338 = vmatprep.mubr.msk.bf16.mxu1 %vm2631_vm0, %v2630_v1 }
  0x2d   :  { %2336 = vmatprep.subr.bf16.mxu1 %v2630_v1 }
  0x30   :  { %2337 = vmatpush3.bf16.msra.mxu1 %v2783_v13 }
  0x31   :  { %2350 = vmatprep.subr.bf16.mxu1 %v2630_v1 }
  0xde   :  { %v2292_v15 = vpop.f32.mrb[0].mxu1 }
  0xdf   :  { %v158_v16 = vadd.f32 %v2292_v15, %v2146_v14  ;;  %v149_v17 = vpop.f32.mrb[1].mxu1 }
  0xe0   :  { %v150_v18 = vadd.f32 %v2146_v14, %v149_v17  ;;  %v2293_v19 = vpop.f32.mrb[2].mxu1  ;;  %v360_v23 = vpop.f32.mrb[0].mxu0 }
  0xe1   :  { %271 = vst.msk [vmem:[#allocation2 + $0x10] sm:$0xff] %vm268_vm2, %v158_v16  ;;  %v161_v20 = vadd.f32 %v2293_v19, %v2146_v14  ;;  %v152_v21 = vpop.f32.mrb[3].mxu1  ;;  %v2316_v24 = vpop.f32.mrb[1].mxu0  ;;  %v361_v59 = vadd.f32 %v2829_v56, %v360_v23 }
  0xe2   :  { %269 = vst.msk [vmem:[#allocation2] sm:$0xff] %vm268_vm2, %v150_v18  ;;  %v153_v22 = vadd.f32 %v2146_v14, %v152_v21  ;;  %v363_v25 = vpop.f32.mrb[2].mxu0 }
  0xe3   :  { %272 = vst.msk [vmem:[#allocation2 + $0x18] sm:$0xff] %vm268_vm2, %v161_v20  ;;  %v2317_v26 = vpop.f32.mrb[3].mxu0  ;;  %v472_v25 = vsel %vm470_vm4, 1, %v2632_v3 }
  0xe4   :  { %270 = vst.msk [vmem:[#allocation2 + $0x8] sm:$0xff] %vm268_vm2, %v153_v22 }
  0xe6   :  { %v2296_v27 = vpop.f32.mrb[4].mxu1 }
  0xe7   :  { %v174_v28 = vadd.f32 %v2296_v27, %v2146_v14  ;;  %v165_v29 = vpop.f32.mrb[5].mxu1 }
  0xe8   :  { %v166_v30 = vadd.f32 %v2146_v14, %v165_v29  ;;  %v2297_v31 = vpop.f32.mrb[6].mxu1 }
  0xe9   :  { %275 = vst.msk [vmem:[#allocation2 + $0x30] sm:$0xff] %vm268_vm2, %v174_v28  ;;  %v177_v32 = vadd.f32 %v2297_v31, %v2146_v14  ;;  %v168_v33 = vpop.f32.mrb[7].mxu1  ;;  %v308_v62 = vld [vmem:[#allocation2] sm:$0xff] }
  0xea   :  { %273 = vst.msk [vmem:[#allocation2 + $0x20] sm:$0xff] %vm268_vm2, %v166_v30  ;;  %v169_v34 = vadd.f32 %v2146_v14, %v168_v33  ;;  %v418_v63 = vadd.f32 %v361_v59, %v308_v62 }
  0xeb   :  { %276 = vst.msk [vmem:[#allocation2 + $0x38] sm:$0xff] %vm268_vm2, %v177_v32 }
  0xec   :  { %274 = vst.msk [vmem:[#allocation2 + $0x28] sm:$0xff] %vm268_vm2, %v169_v34  ;;  %v2170_v2 = vmul.f32 -1.442695, %v418_v63 }
  0xee   :  { %v2304_v36 = vpop.f32.mrb[8].mxu1 }
  0xef   :  { %v246_v37 = vadd.f32 %v2304_v36, %v2157_v35  ;;  %v237_v38 = vpop.f32.mrb[9].mxu1 }
  0xf0   :  { %v238_v39 = vadd.f32 %v2157_v35, %v237_v38  ;;  %v2305_v40 = vpop.f32.mrb[10].mxu1 }
  0xf1   :  { %279 = vst.msk [vmem:[#allocation3 + $0x10] sm:$0xff] %vm268_vm2, %v246_v37  ;;  %v249_v41 = vadd.f32 %v2305_v40, %v2157_v35  ;;  %v240_v42 = vpop.f32.mrb[11].mxu1 }
  0xf2   :  { %277 = vst.msk [vmem:[#allocation3] sm:$0xff] %vm268_vm2, %v238_v39  ;;  %v241_v43 = vadd.f32 %v2157_v35, %v240_v42 }
  0xf3   :  { %280 = vst.msk [vmem:[#allocation3 + $0x18] sm:$0xff] %vm268_vm2, %v249_v41 }
  0xf4   :  { %278 = vst.msk [vmem:[#allocation3 + $0x8] sm:$0xff] %vm268_vm2, %v241_v43 }
  0xf6   :  { %v2308_v44 = vpop.f32.mrb[12].mxu1 }
  0xf7   :  { %v262_v45 = vadd.f32 %v2308_v44, %v2157_v35  ;;  %v253_v46 = vpop.f32.mrb[13].mxu1 }
  0xf8   :  { %v254_v47 = vadd.f32 %v2157_v35, %v253_v46  ;;  %v2309_v48 = vpop.f32.mrb[14].mxu1 }
  0xf9   :  { %283 = vst.msk [vmem:[#allocation3 + $0x30] sm:$0xff] %vm268_vm2, %v262_v45  ;;  %v265_v49 = vadd.f32 %v2309_v48, %v2157_v35  ;;  %v256_v50 = vpop.f32.mrb[15].mxu1 }
  0xfa   :  { %281 = vst.msk [vmem:[#allocation3 + $0x20] sm:$0xff] %vm268_vm2, %v254_v47  ;;  %v257_v51 = vadd.f32 %v2157_v35, %v256_v50 }
  0xfb   :  { %284 = vst.msk [vmem:[#allocation3 + $0x38] sm:$0xff] %vm268_vm2, %v265_v49 }
  0xfc   :  { %282 = vst.msk [vmem:[#allocation3 + $0x28] sm:$0xff] %vm268_vm2, %v257_v51  ;;  %vm1001_vm2 = vcmp.gt.s32.totalorder %v2837_v9, 3 }
  0xfe   :  { %v412_v53 = vpop.f32.mrb[16].mxu1 }
  0xff   :  { %v413_v54 = vadd.f32 %v2823_v52, %v412_v53  ;;  %v2324_v55 = vpop.f32.mrb[17].mxu1 }
 0x100   :  { %v415_v57 = vpop.f32.mrb[18].mxu1 }
 0x101   :  { %444 = vrot.lane.b32.xlu0 %v413_v54, %s2633_s29  ;;  %v2325_v58 = vpop.f32.mrb[19].mxu1  ;;  %v498_v57 = vld [vmem:[#allocation3 + $0x30] sm:$0xff] }
 0x102   :  { %v310_v60 = vld [vmem:[#allocation3 + $0x38] sm:$0xff] }
 0x103   :  { %v436_v61 = vadd.f32 %v413_v54, %v310_v60 }
 0x105   :  { %426 = vrot.lane.b32.xlu0 %v361_v59, %s2633_s29  ;;  %v2171_v0 = vmul.f32 -1.442695, %v436_v61 }
 0x107   :  { %2494 = vpow2.f32 %v2171_v0 }
 0x108   :  { %2496 = vpow2.f32 %v2170_v2 }
 0x109   :  { %480 = vperm.xlu0 %2476, %v478_v10  }
 0x111   :  { %v2495_v4 = vpop.eup %2494 }
 0x112   :  { %v440_v5 = vadd.f32 1.0, %v2495_v4  ;;  %v2497_v7 = vpop.eup %2496 }
 0x113   :  { %v422_v11 = vadd.f32 1.0, %v2497_v7 }
 0x114   :  { %2498 = vrcp.f32 %v440_v5 }
 0x115   :  { %2500 = vrcp.f32 %v422_v11  ;;  %v653_v11 = vsel %vm646_vm7, 1, %v2632_v3 }
 0x11e   :  { %v2499_v14 = vpop.eup %2498 }
 0x11f   :  { %v2501_v17 = vpop.eup %2500  ;;  %v462_v27 = vsub.f32 1.0, %v2499_v14  ;;  %v468_v30 = vmul.f32 0.0, %v2499_v14 }
 0x120   :  { %v454_v36 = vsub.f32 1.0, %v2501_v17  ;;  %v460_v38 = vmul.f32 0.0, %v2501_v17 }
 0x173   :  { %v445_v15 = vpop.permute.xlu0 %444 }
 0x174   :  { %v447_v16 = vmul.f32 %v2499_v14, %v445_v15  ;;  %v647_v14 = vsel %vm645_vm8, 1, %v2632_v3 }
 0x176   :  { %449 = vrot.lane.b32.xlu1 %v447_v16, %s2633_s29 }
 0x177   :  { %v427_v18 = vpop.permute.xlu0 %426 }
 0x178   :  { %v429_v19 = vmul.f32 %v2501_v17, %v427_v18 }
 0x17a   :  { %431 = vrot.lane.b32.xlu1 %v429_v19, %s2633_s29 }
 0x188   :  { %v2847_v31 = vpop.permute.xlu0 %480 }
 0x189   :  { %vm482_vm5 = vcmp.eq.s32.totalorder %v2847_v31, 1 }
 0x1e8   :  { %v450_v20 = vpop.permute.xlu1 %449 }
 0x1e9   :  { %v452_v21 = vadd.f32 %v450_v20, %v310_v60  ;;  %v496_v60 = vld [vmem:[#allocation2 + $0x8] sm:$0xff] }
 0x1eb   :  { %2502 = vtanh.f32 %v452_v21 }
 0x1ec   :  { %v432_v22 = vpop.permute.xlu1 %431 }
 0x1ed   :  { %v434_v23 = vadd.f32 %v432_v22, %v308_v62 }
 0x1ef   :  { %2504 = vtanh.f32 %v434_v23 }
 0x1f5   :  { %v2503_v24 = vpop.eup %2502 }
 0x1f6   :  { %464 = vrot.lane.b32.xlu1 %v2503_v24, %s2634_s0 }
 0x1f9   :  { %v2505_v26 = vpop.eup %2504 }
 0x1fa   :  { %456 = vrot.lane.b32.xlu0 %v2505_v26, %s2634_s0  ;;  %474 = vperm.xlu1 %2477, %v472_v25  }
 0x268   :  { %v465_v28 = vpop.permute.xlu1 %464 }
 0x269   :  { %v467_v29 = vmul.f32 %v465_v28, %v462_v27 }
 0x26b   :  { %v469_v32 = vadd.f32 %v468_v30, %v467_v29 }
 0x26c   :  { %v457_v35 = vpop.permute.xlu0 %456 }
 0x26d   :  { %v2852_v33 = vsel %vm482_vm5, %v469_v32, 0.0  ;;  %v459_v37 = vmul.f32 %v457_v35, %v454_v36 }
 0x26e   :  { %v546_v34 = vpack.c.bf16 %v2852_v33, %v2852_v33 }
 0x26f   :  { %v461_v39 = vadd.f32 %v460_v38, %v459_v37 }
 0x270   :  { %548 = vrot.lane.b32.xlu1 %v546_v34, %s2634_s0 }
 0x279   :  { %v2857_v40 = vpop.permute.xlu1 %474 }
 0x27a   :  { %vm476_vm6 = vcmp.eq.s32.totalorder %v2857_v40, 1 }
 0x27b   :  { %v2862_v41 = vsel %vm476_vm6, %v461_v39, 0.0 }
 0x27c   :  { %v499_v42 = vpack.c.bf16 %v2862_v41, %v2862_v41 }
 0x27e   :  { %501 = vrot.lane.b32.xlu0 %v499_v42, %s2634_s0 }
 0x2e2   :  { %v549_v43 = vpop.permute.xlu1 %548 }
 0x2e3   :  { %2339 = vmatmul.mubr.msk.bf16.vlgmr.msra.gmra.mrb[20].mxu1 %vm102_vm1, %v549_v43 }
 0x2e4   :  { %2351 = vmatpush3.bf16.msra.mxu1 %v2775_v12  ;;  %2354 = vmatprep.mubr.msk.bf16.mxu1 %vm2631_vm0, %v2630_v1 }
 0x2e5   :  { %2352 = vmatprep.subr.bf16.mxu1 %v2630_v1 }
 0x2e8   :  { %2353 = vmatpush3.bf16.msra.mxu1 %v2783_v13 }
 0x2e9   :  { %2366 = vmatprep.subr.bf16.mxu1 %v2630_v1 }
 0x2f0   :  { %v502_v44 = vpop.permute.xlu0 %501 }
 0x2f1   :  { %2331 = vmatmul.mubr.msk.bf16.vlgmr.msra.gmra.mrb[4].mxu0 %vm102_vm1, %v502_v44 }
 0x2f2   :  { %2343 = vmatpush3.bf16.msra.mxu0 %v2737_v6  ;;  %2346 = vmatprep.mubr.msk.bf16.mxu0 %vm2631_vm0, %v2630_v1 }
 0x2f3   :  { %2344 = vmatprep.subr.bf16.mxu0 %v2630_v1 }
 0x2f6   :  { %2345 = vmatpush3.bf16.msra.mxu0 %v2746_v8 }
 0x2f7   :  { %2358 = vmatprep.subr.bf16.mxu0 %v2630_v1 }
 0x3b6   :  { %v587_v45 = vpop.f32.mrb[20].mxu1 }
 0x3b7   :  { %v588_v46 = vadd.f32 %v2823_v52, %v587_v45  ;;  %v2340_v47 = vpop.f32.mrb[21].mxu1 }
 0x3b8   :  { %v590_v48 = vpop.f32.mrb[22].mxu1 }
 0x3b9   :  { %619 = vrot.lane.b32.xlu1 %v588_v46, %s2633_s29  ;;  %v2341_v49 = vpop.f32.mrb[23].mxu1  ;;  %v611_v58 = vadd.f32 %v588_v46, %v498_v57 }
 0x3bb   :  { %v2175_v59 = vmul.f32 -1.442695, %v611_v58  ;;  %v676_v58 = vld [vmem:[#allocation3 + $0x28] sm:$0xff] }
 0x3bd   :  { %2506 = vpow2.f32 %v2175_v59 }
 0x3c4   :  { %v540_v50 = vpop.f32.mrb[4].mxu0 }
 0x3c5   :  { %v541_v51 = vadd.f32 %v2829_v56, %v540_v50  ;;  %v2332_v53 = vpop.f32.mrb[5].mxu0 }
 0x3c6   :  { %v543_v54 = vpop.f32.mrb[6].mxu0 }
 0x3c7   :  { %601 = vrot.lane.b32.xlu0 %v541_v51, %s2633_s29  ;;  %v2333_v55 = vpop.f32.mrb[7].mxu0  ;;  %v593_v61 = vadd.f32 %v541_v51, %v496_v60  ;;  %v2507_v62 = vpop.eup %2506 }
 0x3c8   :  { %v615_v0 = vadd.f32 1.0, %v2507_v62 }
 0x3c9   :  { %v2174_v63 = vmul.f32 -1.442695, %v593_v61  ;;  %v674_v61 = vld [vmem:[#allocation2 + $0x10] sm:$0xff] }
 0x3cb   :  { %2508 = vpow2.f32 %v2174_v63 }
 0x3cc   :  { %2510 = vrcp.f32 %v615_v0 }
 0x3d5   :  { %v2509_v2 = vpop.eup %2508 }
 0x3d6   :  { %v2511_v4 = vpop.eup %2510  ;;  %v597_v5 = vadd.f32 1.0, %v2509_v2 }
 0x3d7   :  { %v637_v24 = vsub.f32 1.0, %v2511_v4  ;;  %v643_v27 = vmul.f32 %v2511_v4, %v2852_v33 }
 0x3d8   :  { %2512 = vrcp.f32 %v597_v5 }
 0x3e2   :  { %v2513_v15 = vpop.eup %2512 }
 0x3e3   :  { %v629_v34 = vsub.f32 1.0, %v2513_v15  ;;  %v635_v37 = vmul.f32 %v2513_v15, %v2862_v41 }
 0x42b   :  { %v620_v7 = vpop.permute.xlu1 %619 }
 0x42c   :  { %v622_v10 = vmul.f32 %v2511_v4, %v620_v7 }
 0x42e   :  { %624 = vrot.lane.b32.xlu1 %v622_v10, %s2633_s29 }
 0x432   :  { %655 = vperm.xlu1 %2477, %v653_v11  }
 0x436   :  { %649 = vperm.xlu1 %2477, %v647_v14   ;;  %v831_v14 = vsel %vm824_vm11, 1, %v2632_v3 }
 0x439   :  { %v602_v16 = vpop.permute.xlu0 %601 }
 0x43a   :  { %v604_v17 = vmul.f32 %v2513_v15, %v602_v16  ;;  %v825_v15 = vsel %vm823_vm12, 1, %v2632_v3 }
 0x43c   :  { %606 = vrot.lane.b32.xlu0 %v604_v17, %s2633_s29 }
 0x4a0   :  { %v625_v18 = vpop.permute.xlu1 %624 }
 0x4a1   :  { %v627_v19 = vadd.f32 %v625_v18, %v498_v57 }
 0x4a3   :  { %2514 = vtanh.f32 %v627_v19 }
 0x4ad   :  { %v2515_v20 = vpop.eup %2514 }
 0x4ae   :  { %v607_v21 = vpop.permute.xlu0 %606  ;;  %639 = vrot.lane.b32.xlu0 %v2515_v20, %s2634_s0 }
 0x4af   :  { %v609_v22 = vadd.f32 %v607_v21, %v496_v60 }
 0x4b1   :  { %2516 = vtanh.f32 %v609_v22  ;;  %v2893_v26 = vpop.permute.xlu1 %655 }
 0x4b2   :  { %vm657_vm9 = vcmp.eq.s32.totalorder %v2893_v26, 1 }
 0x4b5   :  { %v2908_v36 = vpop.permute.xlu1 %649 }
 0x4b6   :  { %vm651_vm10 = vcmp.eq.s32.totalorder %v2908_v36, 1 }
 0x4bb   :  { %v2517_v23 = vpop.eup %2516 }
 0x4bc   :  { %631 = vrot.lane.b32.xlu0 %v2517_v23, %s2634_s0 }
 0x520   :  { %v640_v25 = vpop.permute.xlu0 %639 }
 0x521   :  { %v642_v28 = vmul.f32 %v640_v25, %v637_v24 }
 0x523   :  { %v2896_v29 = vadd.f32 %v643_v27, %v642_v28 }
 0x525   :  { %v2903_v30 = vsel %vm657_vm9, %v2896_v29, %v2852_v33 }
 0x526   :  { %v724_v32 = vpack.c.bf16 %v2903_v30, %v2903_v30 }
 0x528   :  { %726 = vrot.lane.b32.xlu1 %v724_v32, %s2634_s0 }
 0x52e   :  { %v632_v35 = vpop.permute.xlu0 %631 }
 0x52f   :  { %v634_v38 = vmul.f32 %v632_v35, %v629_v34 }
 0x531   :  { %v2911_v39 = vadd.f32 %v635_v37, %v634_v38 }
 0x533   :  { %v2918_v42 = vsel %vm651_vm10, %v2911_v39, %v2862_v41 }
 0x534   :  { %v677_v43 = vpack.c.bf16 %v2918_v42, %v2918_v42 }
 0x536   :  { %679 = vrot.lane.b32.xlu0 %v677_v43, %s2634_s0 }
 0x59a   :  { %v727_v44 = vpop.permute.xlu1 %726 }
 0x59b   :  { %2355 = vmatmul.mubr.msk.bf16.vlgmr.msra.gmra.mrb[24].mxu1 %vm102_vm1, %v727_v44 }
 0x59c   :  { %2367 = vmatpush3.bf16.msra.mxu1 %v2775_v12  ;;  %2370 = vmatprep.mubr.msk.bf16.mxu1 %vm2631_vm0, %v2630_v1 }
 0x59d   :  { %2368 = vmatprep.subr.bf16.mxu1 %v2630_v1 }
 0x5a0   :  { %2369 = vmatpush3.bf16.msra.mxu1 %v2783_v13 }
 0x5a1   :  { %2382 = vmatprep.subr.bf16.mxu1 %v2630_v1 }
 0x5a8   :  { %v680_v45 = vpop.permute.xlu0 %679 }
 0x5a9   :  { %2347 = vmatmul.mubr.msk.bf16.vlgmr.msra.gmra.mrb[8].mxu0 %vm102_vm1, %v680_v45 }
 0x5aa   :  { %2359 = vmatpush3.bf16.msra.mxu0 %v2737_v6  ;;  %2362 = vmatprep.mubr.msk.bf16.mxu0 %vm2631_vm0, %v2630_v1 }
 0x5ab   :  { %2360 = vmatprep.subr.bf16.mxu0 %v2630_v1 }
 0x5ae   :  { %2361 = vmatpush3.bf16.msra.mxu0 %v2746_v8 }
 0x5af   :  { %2374 = vmatprep.subr.bf16.mxu0 %v2630_v1 }
 0x66e   :  { %v765_v46 = vpop.f32.mrb[24].mxu1 }
 0x66f   :  { %v766_v47 = vadd.f32 %v2823_v52, %v765_v46  ;;  %v2356_v48 = vpop.f32.mrb[25].mxu1 }
 0x670   :  { %v768_v49 = vpop.f32.mrb[26].mxu1 }
 0x671   :  { %797 = vrot.lane.b32.xlu1 %v766_v47, %s2633_s29  ;;  %v2357_v50 = vpop.f32.mrb[27].mxu1  ;;  %v789_v59 = vadd.f32 %v766_v47, %v676_v58 }
 0x673   :  { %v2179_v60 = vmul.f32 -1.442695, %v789_v59 }
 0x675   :  { %2518 = vpow2.f32 %v2179_v60 }
 0x67c   :  { %v718_v51 = vpop.f32.mrb[8].mxu0 }
 0x67d   :  { %v719_v53 = vadd.f32 %v2829_v56, %v718_v51  ;;  %v2348_v54 = vpop.f32.mrb[9].mxu0 }
 0x67e   :  { %v721_v55 = vpop.f32.mrb[10].mxu0 }
 0x67f   :  { %779 = vrot.lane.b32.xlu0 %v719_v53, %s2633_s29  ;;  %v2349_v57 = vpop.f32.mrb[11].mxu0  ;;  %v771_v62 = vadd.f32 %v719_v53, %v674_v61  ;;  %v2519_v63 = vpop.eup %2518 }
 0x680   :  { %v793_v2 = vadd.f32 1.0, %v2519_v63  ;;  %v854_v63 = vld [vmem:[#allocation3 + $0x20] sm:$0xff] }
 0x681   :  { %v2178_v0 = vmul.f32 -1.442695, %v771_v62 }
 0x683   :  { %2520 = vpow2.f32 %v2178_v0 }
 0x684   :  { %2522 = vrcp.f32 %v793_v2 }
 0x68d   :  { %v2521_v4 = vpop.eup %2520 }
 0x68e   :  { %v2523_v5 = vpop.eup %2522  ;;  %v775_v7 = vadd.f32 1.0, %v2521_v4  ;;  %v852_v4 = vld [vmem:[#allocation2 + $0x18] sm:$0xff] }
 0x68f   :  { %v815_v25 = vsub.f32 1.0, %v2523_v5  ;;  %v821_v32 = vmul.f32 %v2523_v5, %v2903_v30 }
 0x690   :  { %2524 = vrcp.f32 %v775_v7 }
 0x69a   :  { %v2525_v16 = vpop.eup %2524 }
 0x69b   :  { %v807_v43 = vsub.f32 1.0, %v2525_v16  ;;  %v813_v46 = vmul.f32 %v2525_v16, %v2918_v42 }
 0x6e3   :  { %v798_v10 = vpop.permute.xlu1 %797 }
 0x6e4   :  { %v800_v11 = vmul.f32 %v2523_v5, %v798_v10 }
 0x6e6   :  { %802 = vrot.lane.b32.xlu1 %v800_v11, %s2633_s29 }
 0x6ea   :  { %833 = vperm.xlu1 %2477, %v831_v14  }
 0x6ee   :  { %827 = vperm.xlu1 %2477, %v825_v15  }
 0x6f1   :  { %v780_v17 = vpop.permute.xlu0 %779 }
 0x6f2   :  { %v782_v18 = vmul.f32 %v2525_v16, %v780_v17 }
 0x6f4   :  { %784 = vrot.lane.b32.xlu0 %v782_v18, %s2633_s29 }
 0x758   :  { %v803_v19 = vpop.permute.xlu1 %802 }
 0x759   :  { %v805_v20 = vadd.f32 %v803_v19, %v676_v58  ;;  %v1009_v19 = vsel %vm1002_vm15, 1, %v2632_v3 }
 0x75b   :  { %2526 = vtanh.f32 %v805_v20  ;;  %v1003_v20 = vsel %vm1001_vm2, 1, %v2632_v3 }
 0x765   :  { %v2527_v21 = vpop.eup %2526 }
 0x766   :  { %v785_v22 = vpop.permute.xlu0 %784  ;;  %817 = vrot.lane.b32.xlu0 %v2527_v21, %s2634_s0 }
 0x767   :  { %v787_v23 = vadd.f32 %v785_v22, %v674_v61 }
 0x769   :  { %2528 = vtanh.f32 %v787_v23  ;;  %v2949_v28 = vpop.permute.xlu1 %833 }
 0x76a   :  { %vm835_vm13 = vcmp.eq.s32.totalorder %v2949_v28, 1 }
 0x76d   :  { %v2964_v45 = vpop.permute.xlu1 %827 }
 0x76e   :  { %vm829_vm14 = vcmp.eq.s32.totalorder %v2964_v45, 1  ;;  %v666_v45 = vsel %vm657_vm9, %v2896_v29, 0.0 }
 0x773   :  { %v2529_v24 = vpop.eup %2528 }
 0x774   :  { %809 = vrot.lane.b32.xlu0 %v2529_v24, %s2634_s0 }
 0x7d8   :  { %v818_v27 = vpop.permute.xlu0 %817 }
 0x7d9   :  { %v820_v34 = vmul.f32 %v818_v27, %v815_v25 }
 0x7db   :  { %v2952_v35 = vadd.f32 %v821_v32, %v820_v34 }
 0x7dd   :  { %v2959_v37 = vsel %vm835_vm13, %v2952_v35, %v2903_v30 }
 0x7de   :  { %v902_v38 = vpack.c.bf16 %v2959_v37, %v2959_v37 }
 0x7e0   :  { %904 = vrot.lane.b32.xlu1 %v902_v38, %s2634_s0 }
 0x7e6   :  { %v810_v44 = vpop.permute.xlu0 %809 }
 0x7e7   :  { %v812_v47 = vmul.f32 %v810_v44, %v807_v43 }
 0x7e9   :  { %v2967_v48 = vadd.f32 %v813_v46, %v812_v47 }
 0x7eb   :  { %v2974_v30 = vsel %vm829_vm14, %v2967_v48, %v2918_v42 }
 0x7ec   :  { %v855_v49 = vpack.c.bf16 %v2974_v30, %v2974_v30 }
 0x7ee   :  { %857 = vrot.lane.b32.xlu0 %v855_v49, %s2634_s0 }
 0x852   :  { %v905_v50 = vpop.permute.xlu1 %904 }
 0x853   :  { %2371 = vmatmul.mubr.msk.bf16.vlgmr.msra.gmra.mrb[28].mxu1 %vm102_vm1, %v905_v50 }
 0x854   :  { %2383 = vmatpush3.bf16.msra.mxu1 %v2775_v12  ;;  %2386 = vmatprep.mubr.msk.bf16.mxu1 %vm2631_vm0, %v2630_v1 }
 0x855   :  { %2384 = vmatprep.subr.bf16.mxu1 %v2630_v1 }
 0x858   :  { %2385 = vmatpush3.bf16.msra.mxu1 %v2783_v13 }
 0x859   :  { %2398 = vmatprep.subr.bf16.mxu1 %v2630_v1 }
 0x860   :  { %v858_v42 = vpop.permute.xlu0 %857 }
 0x861   :  { %2363 = vmatmul.mubr.msk.bf16.vlgmr.msra.gmra.mrb[12].mxu0 %vm102_vm1, %v858_v42 }
 0x862   :  { %2375 = vmatpush3.bf16.msra.mxu0 %v2737_v6  ;;  %2378 = vmatprep.mubr.msk.bf16.mxu0 %vm2631_vm0, %v2630_v1 }
 0x863   :  { %2376 = vmatprep.subr.bf16.mxu0 %v2630_v1 }
 0x866   :  { %2377 = vmatpush3.bf16.msra.mxu0 %v2746_v8 }
 0x867   :  { %2390 = vmatprep.subr.bf16.mxu0 %v2630_v1 }
 0x926   :  { %v943_v51 = vpop.f32.mrb[28].mxu1 }
 0x927   :  { %v944_v53 = vadd.f32 %v2823_v52, %v943_v51  ;;  %v2372_v54 = vpop.f32.mrb[29].mxu1 }
 0x928   :  { %v946_v55 = vpop.f32.mrb[30].mxu1 }
 0x929   :  { %975 = vrot.lane.b32.xlu1 %v944_v53, %s2633_s29  ;;  %v2373_v57 = vpop.f32.mrb[31].mxu1  ;;  %v967_v0 = vadd.f32 %v944_v53, %v854_v63 }
 0x92b   :  { %v2183_v2 = vmul.f32 -1.442695, %v967_v0 }
 0x92d   :  { %2530 = vpow2.f32 %v2183_v2 }
 0x934   :  { %v896_v58 = vpop.f32.mrb[12].mxu0 }
 0x935   :  { %v897_v59 = vadd.f32 %v2829_v56, %v896_v58  ;;  %v2364_v60 = vpop.f32.mrb[13].mxu0 }
 0x936   :  { %v899_v61 = vpop.f32.mrb[14].mxu0 }
 0x937   :  { %957 = vrot.lane.b32.xlu0 %v897_v59, %s2633_s29  ;;  %v2365_v62 = vpop.f32.mrb[15].mxu0  ;;  %v949_v5 = vadd.f32 %v897_v59, %v852_v4  ;;  %v2531_v7 = vpop.eup %2530 }
 0x938   :  { %v971_v11 = vadd.f32 1.0, %v2531_v7 }
 0x939   :  { %v2182_v10 = vmul.f32 -1.442695, %v949_v5 }
 0x93b   :  { %2532 = vpow2.f32 %v2182_v10  ;;  %v1032_v10 = vld [vmem:[#allocation3 + $0x18] sm:$0xff] }
 0x93c   :  { %2534 = vrcp.f32 %v971_v11 }
 0x945   :  { %v2533_v14 = vpop.eup %2532 }
 0x946   :  { %v2535_v15 = vpop.eup %2534  ;;  %v953_v16 = vadd.f32 1.0, %v2533_v14  ;;  %v1030_v14 = vld [vmem:[#allocation2 + $0x20] sm:$0xff] }
 0x947   :  { %v993_v9 = vsub.f32 1.0, %v2535_v15  ;;  %v999_v44 = vmul.f32 %v2535_v15, %v2959_v37 }
 0x948   :  { %2536 = vrcp.f32 %v953_v16 }
 0x952   :  { %v2537_v21 = vpop.eup %2536 }
 0x953   :  { %v985_v42 = vsub.f32 1.0, %v2537_v21  ;;  %v991_v54 = vmul.f32 %v2537_v21, %v2974_v30 }
 0x99b   :  { %v976_v17 = vpop.permute.xlu1 %975 }
 0x99c   :  { %v978_v18 = vmul.f32 %v2535_v15, %v976_v17 }
 0x99e   :  { %980 = vrot.lane.b32.xlu1 %v978_v18, %s2633_s29 }
 0x9a2   :  { %1011 = vperm.xlu1 %2477, %v1009_v19  }
 0x9a6   :  { %1005 = vperm.xlu1 %2477, %v1003_v20  }
 0x9a9   :  { %v958_v22 = vpop.permute.xlu0 %957 }
 0x9aa   :  { %v960_v23 = vmul.f32 %v2537_v21, %v958_v22 }
 0x9ac   :  { %962 = vrot.lane.b32.xlu0 %v960_v23, %s2633_s29 }
 0xa10   :  { %v981_v24 = vpop.permute.xlu1 %980 }
 0xa11   :  { %v983_v25 = vadd.f32 %v981_v24, %v854_v63 }
 0xa13   :  { %2538 = vtanh.f32 %v983_v25 }
 0xa1d   :  { %v2539_v27 = vpop.eup %2538 }
 0xa1e   :  { %v963_v32 = vpop.permute.xlu0 %962  ;;  %995 = vrot.lane.b32.xlu0 %v2539_v27, %s2634_s0 }
 0xa1f   :  { %v965_v34 = vadd.f32 %v963_v32, %v852_v4 }
 0xa21   :  { %2540 = vtanh.f32 %v965_v34  ;;  %v3005_v43 = vpop.permute.xlu1 %1011 }
 0xa22   :  { %vm1013_vm3 = vcmp.eq.s32.totalorder %v3005_v43, 1 }
 0xa25   :  { %v3020_v53 = vpop.permute.xlu1 %1005 }
 0xa26   :  { %vm1007_vm4 = vcmp.eq.s32.totalorder %v3020_v53, 1 }
 0xa2b   :  { %v2541_v38 = vpop.eup %2540 }
 0xa2c   :  { %987 = vrot.lane.b32.xlu0 %v2541_v38, %s2634_s0 }
 0xa90   :  { %v996_v3 = vpop.permute.xlu0 %995 }
 0xa91   :  { %v998_v46 = vmul.f32 %v996_v3, %v993_v9 }
 0xa93   :  { %v3008_v47 = vadd.f32 %v999_v44, %v998_v46 }
 0xa95   :  { %v3015_v49 = vsel %vm1013_vm3, %v3008_v47, %v2959_v37  ;;  %v1022_v40 = vsel %vm1013_vm3, %v3008_v47, 0.0 }
 0xa96   :  { %v1080_v50 = vpack.c.bf16 %v3015_v49, %v3015_v49 }
 0xa98   :  { %1082 = vrot.lane.b32.xlu1 %v1080_v50, %s2634_s0 }
 0xa9e   :  { %v988_v51 = vpop.permute.xlu0 %987 }
 0xa9f   :  { %v990_v55 = vmul.f32 %v988_v51, %v985_v42 }
 0xaa1   :  { %v3023_v57 = vadd.f32 %v991_v54, %v990_v55 }
 0xaa3   :  { %v3030_v37 = vsel %vm1007_vm4, %v3023_v57, %v2974_v30  ;;  %v1015_v26 = vsel %vm1007_vm4, %v3023_v57, 0.0 }
 0xaa4   :  { %v1033_v58 = vpack.c.bf16 %v3030_v37, %v3030_v37 }
 0xaa6   :  { %1035 = vrot.lane.b32.xlu0 %v1033_v58, %s2634_s0 }
 0xb0a   :  { %v1083_v59 = vpop.permute.xlu1 %1082 }
 0xb0b   :  { %2387 = vmatmul.mubr.msk.bf16.vlgmr.msra.gmra.mrb[32].mxu1 %vm102_vm1, %v1083_v59 }
 0xb0c   :  { %2399 = vmatpush3.bf16.msra.mxu1 %v2775_v12  ;;  %2402 = vmatprep.mubr.msk.bf16.mxu1 %vm2631_vm0, %v2630_v1 }
 0xb0d   :  { %2400 = vmatprep.subr.bf16.mxu1 %v2630_v1 }
 0xb10   :  { %2401 = vmatpush3.bf16.msra.mxu1 %v2783_v13 }
 0xb11   :  { %2414 = vmatprep.subr.bf16.mxu1 %v2630_v1 }
 0xb18   :  { %v1036_v30 = vpop.permute.xlu0 %1035 }
 0xb19   :  { %2379 = vmatmul.mubr.msk.bf16.vlgmr.msra.gmra.mrb[16].mxu0 %vm102_vm1, %v1036_v30 }
 0xb1a   :  { %2391 = vmatpush3.bf16.msra.mxu0 %v2737_v6  ;;  %2394 = vmatprep.mubr.msk.bf16.mxu0 %vm2631_vm0, %v2630_v1 }
 0xb1b   :  { %2392 = vmatprep.subr.bf16.mxu0 %v2630_v1 }
 0xb1e   :  { %2393 = vmatpush3.bf16.msra.mxu0 %v2746_v8 }
 0xb1f   :  { %2406 = vmatprep.subr.bf16.mxu0 %v2630_v1 }
 0xbde   :  { %v1121_v60 = vpop.f32.mrb[32].mxu1 }
 0xbdf   :  { %v1122_v61 = vadd.f32 %v2823_v52, %v1121_v60  ;;  %v2388_v62 = vpop.f32.mrb[33].mxu1 }
 0xbe0   :  { %v1124_v63 = vpop.f32.mrb[34].mxu1 }
 0xbe1   :  { %1153 = vrot.lane.b32.xlu1 %v1122_v61, %s2633_s29  ;;  %v2389_v0 = vpop.f32.mrb[35].mxu1  ;;  %v1145_v8 = vadd.f32 %v1122_v61, %v1032_v10 }
 0xbe3   :  { %v2187_v11 = vmul.f32 -1.442695, %v1145_v8 }
 0xbe5   :  { %2542 = vpow2.f32 %v2187_v11 }
 0xbec   :  { %v1074_v2 = vpop.f32.mrb[16].mxu0 }
 0xbed   :  { %v1075_v6 = vadd.f32 %v2829_v56, %v1074_v2  ;;  %v2380_v4 = vpop.f32.mrb[17].mxu0  ;;  %v3092_v2 = vld [vmem:[%s3438_s7] sm:$0xff]  }
 0xbee   :  { %v1077_v5 = vpop.f32.mrb[18].mxu0 }
 0xbef   :  { %1135 = vrot.lane.b32.xlu0 %v1075_v6, %s2633_s29  ;;  %v2381_v7 = vpop.f32.mrb[19].mxu0  ;;  %v1127_v15 = vadd.f32 %v1075_v6, %v1030_v14  ;;  %v2543_v16 = vpop.eup %2542 }
 0xbf0   :  { %v1149_v18 = vadd.f32 1.0, %v2543_v16  ;;  %v1198_v16 = vld [vmem:[#allocation3 + $0x10] sm:$0xff] }
 0xbf1   :  { %v2186_v17 = vmul.f32 -1.442695, %v1127_v15 }
 0xbf3   :  { %2544 = vpow2.f32 %v2186_v17 }
 0xbf4   :  { %2546 = vrcp.f32 %v1149_v18 }
 0xbfd   :  { %v2545_v19 = vpop.eup %2544 }
 0xbfe   :  { %v2547_v20 = vpop.eup %2546  ;;  %v1131_v21 = vadd.f32 1.0, %v2545_v19  ;;  %v1196_v19 = vld [vmem:[#allocation2 + $0x28] sm:$0xff] }
 0xbff   :  { %v1171_v46 = vsub.f32 1.0, %v2547_v20  ;;  %v1177_v42 = vmul.f32 %v2547_v20, %v3015_v49 }
 0xc00   :  { %2548 = vrcp.f32 %v1131_v21 }
 0xc0a   :  { %v2549_v24 = vpop.eup %2548 }
 0xc0b   :  { %v1163_v59 = vsub.f32 1.0, %v2549_v24  ;;  %v1169_v60 = vmul.f32 %v2549_v24, %v3030_v37 }
 0xc53   :  { %v1154_v22 = vpop.permute.xlu1 %1153 }
 0xc54   :  { %v1156_v23 = vmul.f32 %v2547_v20, %v1154_v22 }
 0xc56   :  { %1158 = vrot.lane.b32.xlu1 %v1156_v23, %s2633_s29 }
 0xc61   :  { %v1136_v25 = vpop.permute.xlu0 %1135 }
 0xc62   :  { %v1138_v27 = vmul.f32 %v2549_v24, %v1136_v25 }
 0xc64   :  { %1140 = vrot.lane.b32.xlu0 %v1138_v27, %s2633_s29 }
 0xcc8   :  { %v1159_v32 = vpop.permute.xlu1 %1158 }
 0xcc9   :  { %v1161_v34 = vadd.f32 %v1159_v32, %v1032_v10 }
 0xccb   :  { %2550 = vtanh.f32 %v1161_v34 }
 0xcd5   :  { %v2551_v38 = vpop.eup %2550 }
 0xcd6   :  { %v1141_v9 = vpop.permute.xlu0 %1140  ;;  %1173 = vrot.lane.b32.xlu1 %v2551_v38, %s2634_s0 }
 0xcd7   :  { %v1143_v3 = vadd.f32 %v1141_v9, %v1030_v14 }
 0xcd9   :  { %2552 = vtanh.f32 %v1143_v3 }
 0xce3   :  { %v2553_v44 = vpop.eup %2552 }
 0xce4   :  { %1165 = vrot.lane.b32.xlu0 %v2553_v44, %s2634_s0 }
 0xd48   :  { %v1174_v50 = vpop.permute.xlu1 %1173 }
 0xd49   :  { %v1176_v51 = vmul.f32 %v1174_v50, %v1171_v46 }
 0xd4b   :  { %v3058_v54 = vadd.f32 %v1177_v42, %v1176_v51 }
 0xd4d   :  { %v3064_v55 = vsel %vm1007_vm4, %v3058_v54, %v3015_v49 }
 0xd4e   :  { %v1246_v58 = vpack.c.bf16 %v3064_v55, %v3064_v55 }
 0xd50   :  { %1248 = vrot.lane.b32.xlu1 %v1246_v58, %s2634_s0 }
 0xd56   :  { %v1166_v30 = vpop.permute.xlu0 %1165 }
 0xd57   :  { %v1168_v61 = vmul.f32 %v1166_v30, %v1163_v59 }
 0xd59   :  { %v3070_v62 = vadd.f32 %v1169_v60, %v1168_v61 }
 0xd5b   :  { %v3076_v63 = vsel %vm1013_vm3, %v3070_v62, %v3030_v37 }
 0xd5c   :  { %v1199_v49 = vpack.c.bf16 %v3076_v63, %v3076_v63 }
 0xd5e   :  { %1201 = vrot.lane.b32.xlu0 %v1199_v49, %s2634_s0 }
 0xdc2   :  { %v1249_v0 = vpop.permute.xlu1 %1248 }
 0xdc3   :  { %2403 = vmatmul.mubr.msk.bf16.vlgmr.msra.gmra.mrb[36].mxu1 %vm102_vm1, %v1249_v0 }
 0xdc4   :  { %2415 = vmatpush3.bf16.msra.mxu1 %v2775_v12  ;;  %2418 = vmatprep.mubr.msk.bf16.mxu1 %vm2631_vm0, %v2630_v1  ;;  %v3101_v12 = vld [vmem:[%s3438_s7 + $0x8] sm:$0xff]  }
 0xdc5   :  { %2416 = vmatprep.subr.bf16.mxu1 %v2630_v1 }
 0xdc8   :  { %2417 = vmatpush3.bf16.msra.mxu1 %v2783_v13 }
 0xdc9   :  { %2430 = vmatprep.subr.bf16.mxu1 %v2630_v1 }
 0xdd0   :  { %v1202_v37 = vpop.permute.xlu0 %1201 }
 0xdd1   :  { %2395 = vmatmul.mubr.msk.bf16.vlgmr.msra.gmra.mrb[20].mxu0 %vm102_vm1, %v1202_v37 }
 0xdd2   :  { %2407 = vmatpush3.bf16.msra.mxu0 %v3092_v2  ;;  %2410 = vmatprep.mubr.msk.bf16.mxu0 %vm2631_vm0, %v2630_v1 }
 0xdd3   :  { %2408 = vmatprep.subr.bf16.mxu0 %v2630_v1 }
 0xdd6   :  { %2409 = vmatpush3.bf16.msra.mxu0 %v3101_v12 }
 0xdd7   :  { %2422 = vmatprep.subr.bf16.mxu0 %v2630_v1 }
 0xe96   :  { %v1287_v13 = vpop.f32.mrb[36].mxu1 }
 0xe97   :  { %v1288_v6 = vadd.f32 %v2823_v52, %v1287_v13  ;;  %v2404_v4 = vpop.f32.mrb[37].mxu1 }
 0xe98   :  { %v1290_v5 = vpop.f32.mrb[38].mxu1 }
 0xe99   :  { %1319 = vrot.lane.b32.xlu1 %v1288_v6, %s2633_s29  ;;  %v2405_v7 = vpop.f32.mrb[39].mxu1  ;;  %v1311_v17 = vadd.f32 %v1288_v6, %v1198_v16 }
 0xe9b   :  { %v2191_v18 = vmul.f32 -1.442695, %v1311_v17 }
 0xe9d   :  { %2554 = vpow2.f32 %v2191_v18 }
 0xea4   :  { %v1240_v10 = vpop.f32.mrb[20].mxu0 }
 0xea5   :  { %v1241_v8 = vadd.f32 %v2829_v56, %v1240_v10  ;;  %v2396_v11 = vpop.f32.mrb[21].mxu0 }
 0xea6   :  { %v1243_v14 = vpop.f32.mrb[22].mxu0  ;;  %v2626_v11 = vld [vmem:[%s3439_s8] sm:$0xff]  }
 0xea7   :  { %1301 = vrot.lane.b32.xlu0 %v1241_v8, %s2633_s29  ;;  %v2397_v15 = vpop.f32.mrb[23].mxu0  ;;  %v1293_v20 = vadd.f32 %v1241_v8, %v1196_v19  ;;  %v2555_v21 = vpop.eup %2554 }
 0xea8   :  { %v1315_v23 = vadd.f32 1.0, %v2555_v21 }
 0xea9   :  { %v2190_v22 = vmul.f32 -1.442695, %v1293_v20 }
 0xeab   :  { %2556 = vpow2.f32 %v2190_v22 }
 0xeac   :  { %2558 = vrcp.f32 %v1315_v23 }
 0xeb5   :  { %v2557_v24 = vpop.eup %2556 }
 0xeb6   :  { %v2559_v25 = vpop.eup %2558  ;;  %v1297_v27 = vadd.f32 1.0, %v2557_v24  ;;  %v1364_v24 = vld [vmem:[#allocation3 + $0x8] sm:$0xff] }
 0xeb7   :  { %v1337_v59 = vsub.f32 1.0, %v2559_v25  ;;  %v1343_v60 = vmul.f32 %v2559_v25, %v3064_v55 }
 0xeb8   :  { %2560 = vrcp.f32 %v1297_v27 }
 0xec2   :  { %v2561_v38 = vpop.eup %2560 }
 0xec3   :  { %v1329_v13 = vsub.f32 1.0, %v2561_v38  ;;  %v1335_v4 = vmul.f32 %v2561_v38, %v3076_v63 }
 0xf0b   :  { %v1320_v32 = vpop.permute.xlu1 %1319 }
 0xf0c   :  { %v1322_v34 = vmul.f32 %v2559_v25, %v1320_v32 }
 0xf0e   :  { %1324 = vrot.lane.b32.xlu1 %v1322_v34, %s2633_s29 }
 0xf19   :  { %v1302_v9 = vpop.permute.xlu0 %1301 }
 0xf1a   :  { %v1304_v3 = vmul.f32 %v2561_v38, %v1302_v9 }
 0xf1c   :  { %1306 = vrot.lane.b32.xlu0 %v1304_v3, %s2633_s29 }
 0xf80   :  { %v1325_v44 = vpop.permute.xlu1 %1324 }
 0xf81   :  { %v1327_v46 = vadd.f32 %v1325_v44, %v1198_v16 }
 0xf83   :  { %2562 = vtanh.f32 %v1327_v46 }
 0xf8d   :  { %v2563_v50 = vpop.eup %2562 }
 0xf8e   :  { %v1307_v42 = vpop.permute.xlu0 %1306  ;;  %1339 = vrot.lane.b32.xlu1 %v2563_v50, %s2634_s0 }
 0xf8f   :  { %v1309_v51 = vadd.f32 %v1307_v42, %v1196_v19 }
 0xf91   :  { %2564 = vtanh.f32 %v1309_v51 }
 0xf9b   :  { %v2565_v58 = vpop.eup %2564 }
 0xf9c   :  { %1331 = vrot.lane.b32.xlu0 %v2565_v58, %s2634_s0 }
0x1000   :  { %v1340_v30 = vpop.permute.xlu1 %1339 }
0x1001   :  { %v1342_v61 = vmul.f32 %v1340_v30, %v1337_v59 }
0x1003   :  { %v3114_v49 = vadd.f32 %v1343_v60, %v1342_v61 }
0x1005   :  { %v3120_v0 = vsel %vm829_vm14, %v3114_v49, %v3064_v55 }
0x1006   :  { %v1412_v37 = vpack.c.bf16 %v3120_v0, %v3120_v0 }
0x1008   :  { %1414 = vrot.lane.b32.xlu1 %v1412_v37, %s2634_s0 }
0x100e   :  { %v1332_v6 = vpop.permute.xlu0 %1331 }
0x100f   :  { %v1334_v5 = vmul.f32 %v1332_v6, %v1329_v13 }
0x1011   :  { %v3126_v7 = vadd.f32 %v1335_v4, %v1334_v5 }
0x1013   :  { %v3132_v10 = vsel %vm835_vm13, %v3126_v7, %v3076_v63  ;;  %v2627_v63 = vld [vmem:[%s3439_s8 + $0x8] sm:$0xff]  }
0x1014   :  { %v1365_v55 = vpack.c.bf16 %v3132_v10, %v3132_v10 }
0x1016   :  { %1367 = vrot.lane.b32.xlu0 %v1365_v55, %s2634_s0 }
0x107a   :  { %v1415_v8 = vpop.permute.xlu1 %1414 }
0x107b   :  { %2419 = vmatmul.mubr.msk.bf16.vlgmr.msra.gmra.mrb[40].mxu1 %vm102_vm1, %v1415_v8 }
0x107c   :  { %2431 = vmatpush3.bf16.msra.mxu1 %v2626_v11  ;;  %2434 = vmatprep.mubr.msk.bf16.mxu1 %vm2631_vm0, %v2630_v1 }
0x107d   :  { %2432 = vmatprep.subr.bf16.mxu1 %v2630_v1 }
0x1080   :  { %2433 = vmatpush3.bf16.msra.mxu1 %v2627_v63 }
0x1088   :  { %v1368_v14 = vpop.permute.xlu0 %1367 }
0x1089   :  { %2411 = vmatmul.mubr.msk.bf16.vlgmr.msra.gmra.mrb[24].mxu0 %vm102_vm1, %v1368_v14 }
0x108a   :  { %2423 = vmatpush3.bf16.msra.mxu0 %v3092_v2  ;;  %2426 = vmatprep.mubr.msk.bf16.mxu0 %vm2631_vm0, %v2630_v1  ;;  %vm1937_vm0 = vcmask 523264  }
0x108b   :  { %2424 = vmatprep.subr.bf16.mxu0 %v2630_v1 }
0x108e   :  { %2425 = vmatpush3.bf16.msra.mxu0 %v3101_v12  ;;  %v1362_v12 = vld [vmem:[#allocation2 + $0x30] sm:$0xff] }
0x114e   :  { %v1453_v15 = vpop.f32.mrb[40].mxu1 }
0x114f   :  { %v1454_v16 = vadd.f32 %v2823_v52, %v1453_v15  ;;  %v2420_v17 = vpop.f32.mrb[41].mxu1 }
0x1150   :  { %v1456_v18 = vpop.f32.mrb[42].mxu1 }
0x1151   :  { %1485 = vrot.lane.b32.xlu1 %v1454_v16, %s2633_s29  ;;  %v2421_v19 = vpop.f32.mrb[43].mxu1  ;;  %v1477_v1 = vadd.f32 %v1454_v16, %v1364_v24 }
0x1153   :  { %v2195_v25 = vmul.f32 -1.442695, %v1477_v1  ;;  %v2629_v1 = vld [vmem:[%s3443_s9] ss:$0 sm:$0xff] }
0x1155   :  { %2566 = vpow2.f32 %v2195_v25 }
0x115c   :  { %v1406_v20 = vpop.f32.mrb[24].mxu0 }
0x115d   :  { %v1407_v21 = vadd.f32 %v2829_v56, %v1406_v20  ;;  %v2412_v22 = vpop.f32.mrb[25].mxu0 }
0x115e   :  { %v1409_v2 = vpop.f32.mrb[26].mxu0 }
0x115f   :  { %1467 = vrot.lane.b32.xlu0 %v1407_v21, %s2633_s29  ;;  %v2413_v23 = vpop.f32.mrb[27].mxu0  ;;  %v1459_v27 = vadd.f32 %v1407_v21, %v1362_v12  ;;  %v2567_v52 = vpop.eup %2566  ;;  %v2628_v21 = vld [vmem:[%s3442_s10] ss:$0 sm:$0xff] }
0x1160   :  { %v1481_v34 = vadd.f32 1.0, %v2567_v52 }
0x1161   :  { %v2194_v32 = vmul.f32 -1.442695, %v1459_v27 }
0x1163   :  { %2568 = vpow2.f32 %v2194_v32  ;;  %v1529_v32 = vld [vmem:[#allocation3] sm:$0xff] }
0x1164   :  { %2570 = vrcp.f32 %v1481_v34 }
0x116d   :  { %v2569_v38 = vpop.eup %2568 }
0x116e   :  { %v2571_v9 = vpop.eup %2570  ;;  %v1463_v3 = vadd.f32 1.0, %v2569_v38 }
0x116f   :  { %v1503_v37 = vsub.f32 1.0, %v2571_v9  ;;  %v1509_v6 = vmul.f32 %v2571_v9, %v3120_v0 }
0x1170   :  { %2572 = vrcp.f32 %v1463_v3 }
0x117a   :  { %v2573_v46 = vpop.eup %2572 }
0x117b   :  { %v1495_v11 = vsub.f32 1.0, %v2573_v46  ;;  %v1501_v14 = vmul.f32 %v2573_v46, %v3132_v10 }
0x11c3   :  { %v1486_v56 = vpop.permute.xlu1 %1485 }
0x11c4   :  { %v1488_v44 = vmul.f32 %v2571_v9, %v1486_v56  ;;  %v1528_v9 = vld [vmem:[#allocation2 + $0x38] sm:$0xff] }
0x11c6   :  { %1490 = vrot.lane.b32.xlu1 %v1488_v44, %s2633_s29 }
0x11d1   :  { %v1468_v50 = vpop.permute.xlu0 %1467 }
0x11d2   :  { %v1470_v42 = vmul.f32 %v2573_v46, %v1468_v50 }
0x11d4   :  { %1472 = vrot.lane.b32.xlu0 %v1470_v42, %s2633_s29 }
0x1238   :  { %v1491_v51 = vpop.permute.xlu1 %1490 }
0x1239   :  { %v1493_v58 = vadd.f32 %v1491_v51, %v1364_v24 }
0x123b   :  { %2574 = vtanh.f32 %v1493_v58 }
0x1245   :  { %v2575_v59 = vpop.eup %2574 }
0x1246   :  { %v1473_v30 = vpop.permute.xlu0 %1472  ;;  %1505 = vrot.lane.b32.xlu1 %v2575_v59, %s2634_s0 }
0x1247   :  { %v1475_v60 = vadd.f32 %v1473_v30, %v1362_v12 }
0x1249   :  { %2576 = vtanh.f32 %v1475_v60 }
0x1253   :  { %v2577_v61 = vpop.eup %2576 }
0x1254   :  { %1497 = vrot.lane.b32.xlu0 %v2577_v61, %s2634_s0 }
0x12b8   :  { %v1506_v13 = vpop.permute.xlu1 %1505 }
0x12b9   :  { %v1508_v4 = vmul.f32 %v1506_v13, %v1503_v37 }
0x12bb   :  { %v1510_v5 = vadd.f32 %v1509_v6, %v1508_v4 }
0x12bd   :  { %v3165_v55 = vsel %vm651_vm10, %v1510_v5, %v3120_v0 }
0x12be   :  { %v1577_v8 = vpack.c.bf16 %v3165_v55, %v3165_v55 }
0x12c0   :  { %1579 = vrot.lane.b32.xlu1 %v1577_v8, %s2634_s0 }
0x12c6   :  { %v1498_v63 = vpop.permute.xlu0 %1497 }
0x12c7   :  { %v1500_v15 = vmul.f32 %v1498_v63, %v1495_v11  ;;  %v1520_v11 = vsel %vm651_vm10, %v1510_v5, 0.0  ;;  %v1188_v63 = vsel %vm1007_vm4, %v3058_v54, 0.0  ;;  %v837_v54 = vsel %vm829_vm14, %v2967_v48, 0.0 }
0x12c9   :  { %v3171_v16 = vadd.f32 %v1501_v14, %v1500_v15  ;;  %v844_v14 = vsel %vm835_vm13, %v2952_v35, 0.0  ;;  %v1181_v35 = vsel %vm1013_vm3, %v3070_v62, 0.0  ;;  %v2491_v62 = vld [vmem:[%s3445_s12 + $0x8] sm:$0xff]  }
0x12cb   :  { %v3177_v17 = vsel %vm657_vm9, %v3171_v16, %v3132_v10  ;;  %v1513_v5 = vsel %vm657_vm9, %v3171_v16, 0.0  ;;  %vm1986_vm9 = vcmask 7168  }
0x12cc   :  { %v1530_v0 = vpack.c.bf16 %v3177_v17, %v3177_v17 }
0x12ce   :  { %1532 = vrot.lane.b32.xlu0 %v1530_v0, %s2634_s0 }
0x1332   :  { %v1580_v18 = vpop.permute.xlu1 %1579 }
0x1333   :  { %2435 = vmatmul.mubr.msk.bf16.vlgmr.msra.gmra.mrb[44].mxu1 %vm102_vm1, %v1580_v18 }
0x1340   :  { %v1533_v19 = vpop.permute.xlu0 %1532 }
0x1341   :  { %2427 = vmatmul.mubr.msk.bf16.vlgmr.msra.gmra.mrb[28].mxu0 %vm102_vm1, %v1533_v19 }
0x1406   :  { %v1618_v20 = vpop.f32.mrb[44].mxu1 }
0x1407   :  { %v1619_v22 = vadd.f32 %v2628_v21, %v1618_v20  ;;  %v2436_v2 = vpop.f32.mrb[45].mxu1 }
0x1408   :  { %v1621_v10 = vpop.f32.mrb[46].mxu1 }
0x1409   :  { %1650 = vrot.lane.b32.xlu1 %v1619_v22, %s2633_s29  ;;  %v2437_v23 = vpop.f32.mrb[47].mxu1  ;;  %v1642_v34 = vadd.f32 %v1619_v22, %v1529_v32  ;;  %v1354_v22 = vsel %vm829_vm14, %v3114_v49, 0.0 }
0x140a   :  { %v659_v23 = vsel %vm651_vm10, %v2911_v39, 0.0 }
0x140b   :  { %v2199_v38 = vmul.f32 -1.442695, %v1642_v34 }
0x140d   :  { %2578 = vpow2.f32 %v2199_v38 }
0x1414   :  { %v1571_v24 = vpop.f32.mrb[28].mxu0 }
0x1415   :  { %v1572_v25 = vadd.f32 %v2629_v1, %v1571_v24  ;;  %v2428_v12 = vpop.f32.mrb[29].mxu0 }
0x1416   :  { %v1574_v27 = vpop.f32.mrb[30].mxu0 }
0x1417   :  { %1632 = vrot.lane.b32.xlu0 %v1572_v25, %s2633_s29  ;;  %v2429_v52 = vpop.f32.mrb[31].mxu0  ;;  %v1624_v3 = vadd.f32 %v1572_v25, %v1528_v9  ;;  %v2579_v56 = vpop.eup %2578  ;;  %v1347_v25 = vsel %vm835_vm13, %v3126_v7, 0.0 }
0x1418   :  { %v1646_v46 = vadd.f32 1.0, %v2579_v56 }
0x1419   :  { %v2198_v44 = vmul.f32 -1.442695, %v1624_v3 }
0x141b   :  { %2580 = vpow2.f32 %v2198_v44 }
0x141c   :  { %2582 = vrcp.f32 %v1646_v46 }
0x1425   :  { %v2581_v50 = vpop.eup %2580 }
0x1426   :  { %v2583_v42 = vpop.eup %2582  ;;  %v1628_v51 = vadd.f32 1.0, %v2581_v50 }
0x1427   :  { %v1674_v0 = vmul.f32 %v2583_v42, %v3165_v55  ;;  %v2492_v55 = vld [vmem:[%s3446_s11] sm:$0xff]  }
0x1428   :  { %2584 = vrcp.f32 %v1628_v51 }
0x1432   :  { %v3193_v30 = vpop.eup %2584 }
0x1433   :  { %v1660_v47 = vsub.f32 1.0, %v3193_v30  ;;  %v1666_v29 = vmul.f32 %v3193_v30, %v3177_v17 }
0x147b   :  { %v1651_v58 = vpop.permute.xlu1 %1650 }
0x147c   :  { %v1653_v59 = vmul.f32 %v2583_v42, %v1651_v58 }
0x147e   :  { %1655 = vrot.lane.b32.xlu1 %v1653_v59, %s2633_s29 }
0x1489   :  { %v1633_v60 = vpop.permute.xlu0 %1632 }
0x148a   :  { %v1635_v61 = vmul.f32 %v3193_v30, %v1633_v60 }
0x148c   :  { %1637 = vrot.lane.b32.xlu0 %v1635_v61, %s2633_s29 }
0x14f0   :  { %v1656_v37 = vpop.permute.xlu1 %1655 }
0x14f1   :  { %v1658_v13 = vadd.f32 %v1656_v37, %v1529_v32 }
0x14f3   :  { %2586 = vtanh.f32 %v1658_v13 }
0x14fd   :  { %v2587_v6 = vpop.eup %2586 }
0x14fe   :  { %v1638_v4 = vpop.permute.xlu0 %1637  ;;  %1670 = vrot.lane.b32.xlu1 %v2587_v6, %s2634_s0 }
0x14ff   :  { %v1640_v8 = vadd.f32 %v1638_v4, %v1528_v9  ;;  %v2493_v9 = vld [vmem:[%s3446_s11 + $0x8] sm:$0xff]  }
0x1501   :  { %2588 = vtanh.f32 %v1640_v8 }
0x1502   :  { %1522 = vrot.lane.b32.xlu1 %v1520_v11, %s2634_s0 }
0x1506   :  { %1190 = vrot.lane.b32.xlu1 %v1188_v63, %s2634_s0 }
0x150a   :  { %846 = vrot.lane.b32.xlu1 %v844_v14, %s2634_s0 }
0x150b   :  { %v2589_v15 = vpop.eup %2588 }
0x150c   :  { %1662 = vrot.lane.b32.xlu0 %v2589_v15, %s2634_s0 }
0x150e   :  { %490 = vrot.lane.b32.xlu1 %v2852_v33, %s2634_s0  ;;  %v2490_v33 = vld [vmem:[%s3445_s12] sm:$0xff]  }
0x150f   :  { %2438 = vmatprep.subr.bf16.mxu0 %v2490_v33 }
0x1510   :  { %2439 = vmatpush3.bf16.msra.mxu0 %v2490_v33 }
0x1511   :  { %2440 = vmatprep.subr.bf16.mxu0 %v2491_v62 }
0x1512   :  { %485 = vrot.lane.b32.xlu1 %v2862_v41, %s2634_s0  ;;  %v1668_v41 = vsub.f32 1.0, %v2583_v42 }
0x1514   :  { %2441 = vmatpush3.bf16.msra.mxu0 %v2491_v62 }
0x1515   :  { %2450 = vmatprep.subr.bf16.mxu0 %v2492_v55 }
0x1516   :  { %839 = vrot.lane.b32.xlu1 %v837_v54, %s2634_s0 }
0x151a   :  { %1183 = vrot.lane.b32.xlu1 %v1181_v35, %s2634_s0  ;;  %v2212_v35 = vld [vmem:[%s3447_s13] ss:$0 sm:$0xff] }
0x151e   :  { %1515 = vrot.lane.b32.xlu1 %v1513_v5, %s2634_s0 }
0x1570   :  { %v1671_v48 = vpop.permute.xlu1 %1670 }
0x1571   :  { %v1673_v18 = vmul.f32 %v1671_v48, %v1668_v41 }
0x1573   :  { %v1675_v19 = vadd.f32 %v1674_v0, %v1673_v18 }
0x1574   :  { %v1523_v16 = vpop.permute.xlu1 %1522 }
0x1575   :  { %1526 = vst.msk [vmem:[#allocation5 + $0x8] sm:$0xff] %vm102_vm1, %v1523_v16  ;;  %v1683_v20 = vsel %vm476_vm6, %v1675_v19, 0.0 }
0x1576   :  { %1685 = vrot.lane.b32.xlu0 %v1683_v20, %s2634_s0 }
0x1578   :  { %v1191_v21 = vpop.permute.xlu1 %1190 }
0x1579   :  { %1194 = vst.msk [vmem:[#allocation5 + $0x18] sm:$0xff] %vm102_vm1, %v1191_v21 }
0x157a   :  { %1356 = vrot.lane.b32.xlu0 %v1354_v22, %s2634_s0 }
0x157c   :  { %v847_v2 = vpop.permute.xlu1 %846  ;;  %v3281_v28 = vld [vmem:[#allocation5 + $0x8] sm:$0xff] }
0x157d   :  { %850 = vst.msk [vmem:[#allocation5 + $0x28] sm:$0xff] %vm102_vm1, %v847_v2 }
0x157e   :  { %1024 = vrot.lane.b32.xlu0 %v1022_v40, %s2634_s0  ;;  %v1663_v43 = vpop.permute.xlu0 %1662 }
0x157f   :  { %v1665_v1 = vmul.f32 %v1663_v43, %v1660_v47 }
0x1580   :  { %v491_v10 = vpop.permute.xlu1 %490  ;;  %v3289_v34 = vld [vmem:[#allocation5 + $0x18] sm:$0xff] }
0x1581   :  { %494 = vst.msk [vmem:[#allocation5 + $0x38] sm:$0xff] %vm102_vm1, %v491_v10  ;;  %v1667_v39 = vadd.f32 %v1666_v29, %v1665_v1  ;;  %v2213_v10 = vld [vmem:[%s3448_s14] ss:$0 sm:$0xff] }
0x1582   :  { %668 = vrot.lane.b32.xlu0 %v666_v45, %s2634_s0 }
0x1583   :  { %v1676_v53 = vsel %vm482_vm5, %v1667_v39, 0.0 }
0x1584   :  { %v486_v49 = vpop.permute.xlu1 %485  ;;  %v3300_v44 = vld [vmem:[#allocation5 + $0x28] sm:$0xff] }
0x1585   :  { %488 = vst.msk [vmem:[#allocation4] sm:$0xff] %vm102_vm1, %v486_v49 }
0x1586   :  { %661 = vrot.lane.b32.xlu0 %v659_v23, %s2634_s0 }
0x1588   :  { %v840_v24 = vpop.permute.xlu1 %839  ;;  %v3308_v51 = vld [vmem:[#allocation5 + $0x38] sm:$0xff] }
0x1589   :  { %843 = vst.msk [vmem:[#allocation4 + $0x10] sm:$0xff] %vm102_vm1, %v840_v24 }
0x158a   :  { %1017 = vrot.lane.b32.xlu0 %v1015_v26, %s2634_s0 }
0x158c   :  { %v1184_v36 = vpop.permute.xlu1 %1183  ;;  %v3314_v30 = vld [vmem:[#allocation4] sm:$0xff] }
0x158d   :  { %1187 = vst.msk [vmem:[#allocation4 + $0x20] sm:$0xff] %vm102_vm1, %v1184_v36 }
0x158e   :  { %1349 = vrot.lane.b32.xlu0 %v1347_v25, %s2634_s0 }
0x1590   :  { %v1516_v12 = vpop.permute.xlu1 %1515  ;;  %v3322_v13 = vld [vmem:[#allocation4 + $0x10] sm:$0xff] }
0x1591   :  { %1519 = vst.msk [vmem:[#allocation4 + $0x30] sm:$0xff] %vm102_vm1, %v1516_v12 }
0x1592   :  { %1678 = vrot.lane.b32.xlu0 %v1676_v53, %s2634_s0 }
0x1594   :  { %v3330_v8 = vld [vmem:[#allocation4 + $0x20] sm:$0xff] }
0x1598   :  { %v3337_v14 = vld [vmem:[#allocation4 + $0x30] sm:$0xff] }
0x15e8   :  { %v1686_v57 = vpop.permute.xlu0 %1685 }
0x15e9   :  { %1688 = vst.msk [vmem:[#allocation5] sm:$0xff] %vm102_vm1, %v1686_v57 }
0x15ec   :  { %v1357_v17 = vpop.permute.xlu0 %1356 }
0x15ed   :  { %1360 = vst.msk [vmem:[#allocation5 + $0x10] sm:$0xff] %vm102_vm1, %v1357_v17 }
0x15f0   :  { %v1025_v27 = vpop.permute.xlu0 %1024  ;;  %v3279_v52 = vld [vmem:[#allocation5] sm:$0xff] }
0x15f1   :  { %1028 = vst.msk [vmem:[#allocation5 + $0x20] sm:$0xff] %vm102_vm1, %v1025_v27  ;;  %v1709_v7 = vpack.c.bf16 %v3281_v28, %v3279_v52 }
0x15f3   :  { %2442 = vmatprep.mubr.msk.bf16.mxu0 %vm102_vm1, %v1709_v7 }
0x15f4   :  { %v669_v31 = vpop.permute.xlu0 %668  ;;  %v3287_v32 = vld [vmem:[#allocation5 + $0x10] sm:$0xff] }
0x15f5   :  { %672 = vst.msk [vmem:[#allocation5 + $0x30] sm:$0xff] %vm102_vm1, %v669_v31  ;;  %v1710_v38 = vpack.c.bf16 %v3289_v34, %v3287_v32 }
0x15f7   :  { %2443 = vmatmul.mubr.msk.bf16.vlgmr.msra.gmra.mrb[32].mxu0 %vm102_vm1, %v1710_v38 }
0x15f8   :  { %v662_v3 = vpop.permute.xlu0 %661  ;;  %2451 = vmatpush3.bf16.msra.mxu0 %v2492_v55  ;;  %v3298_v56 = vld [vmem:[#allocation5 + $0x20] sm:$0xff] }
0x15f9   :  { %665 = vst.msk [vmem:[#allocation4 + $0x8] sm:$0xff] %vm102_vm1, %v662_v3  ;;  %v1711_v46 = vpack.c.bf16 %v3300_v44, %v3298_v56  ;;  %2452 = vmatprep.subr.bf16.mxu0 %v2493_v9 }
0x15fb   :  { %2446 = vmatprep.mubr.msk.bf16.mxu0 %vm102_vm1, %v1711_v46 }
0x15fc   :  { %v1018_v50 = vpop.permute.xlu0 %1017  ;;  %v3306_v42 = vld [vmem:[#allocation5 + $0x30] sm:$0xff]  ;;  %2453 = vmatpush3.bf16.msra.mxu0 %v2493_v9 }
0x15fd   :  { %1021 = vst.msk [vmem:[#allocation4 + $0x18] sm:$0xff] %vm102_vm1, %v1018_v50  ;;  %v1712_v58 = vpack.c.bf16 %v3308_v51, %v3306_v42 }
0x15ff   :  { %2447 = vmatmul.mubr.msk.bf16.gmra.mrb[36].mxu0 %vm102_vm1, %v1712_v58 }
0x1600   :  { %v1350_v59 = vpop.permute.xlu0 %1349  ;;  %v3316_v60 = vld [vmem:[#allocation4 + $0x8] sm:$0xff] }
0x1601   :  { %1353 = vst.msk [vmem:[#allocation4 + $0x28] sm:$0xff] %vm102_vm1, %v1350_v59  ;;  %v1705_v61 = vpack.c.bf16 %v3316_v60, %v3314_v30 }
0x1603   :  { %2454 = vmatprep.mubr.msk.bf16.mxu0 %vm102_vm1, %v1705_v61 }
0x1604   :  { %v1679_v37 = vpop.permute.xlu0 %1678  ;;  %v3324_v6 = vld [vmem:[#allocation4 + $0x18] sm:$0xff] }
0x1605   :  { %1682 = vst.msk [vmem:[#allocation4 + $0x38] sm:$0xff] %vm102_vm1, %v1679_v37  ;;  %v1706_v4 = vpack.c.bf16 %v3324_v6, %v3322_v13 }
0x1607   :  { %2455 = vmatmul.mubr.msk.bf16.vlgmr.msra.gmra.mrb[32].mxu0 %vm102_vm1, %v1706_v4  ;;  %v1963_v4 = vld [vmem:[%s3449_s1 + $0x8] sm:$0xff] }
0x1608   :  { %v3332_v11 = vld [vmem:[#allocation4 + $0x28] sm:$0xff]  ;;  %vm1971_vm5 = vcmp.ne.s32.totalorder %v1963_v4, 0 }
0x1609   :  { %v1707_v63 = vpack.c.bf16 %v3332_v11, %v3330_v8 }
0x160b   :  { %2458 = vmatprep.mubr.msk.bf16.mxu0 %vm102_vm1, %v1707_v63  ;;  %v1966_v63 = vld [vmem:[%s3449_s1 + $0x20] sm:$0xff] }
0x160c   :  { %v3339_v15 = vld [vmem:[#allocation4 + $0x38] sm:$0xff]  ;;  %vm1974_vm6 = vcmp.ne.s32.totalorder %v1966_v63, 0 }
0x160d   :  { %v1708_v54 = vpack.c.bf16 %v3339_v15, %v3337_v14 }
0x160f   :  { %2459 = vmatmul.mubr.msk.bf16.gmra.mrb[36].mxu0 %vm102_vm1, %v1708_v54  ;;  %v1967_v54 = vld [vmem:[%s3449_s1 + $0x28] sm:$0xff] }
0x1610   :  { %vm1975_vm7 = vcmp.ne.s32.totalorder %v1967_v54, 0 }
0x16da   :  { %v2456_v5 = vpop.f32.mrb[32].mxu0 }
0x16db   :  { %v1908_v33 = vadd.f32 %v2456_v5, %v2212_v35  ;;  %v1868_v41 = vpop.f32.mrb[33].mxu0 }
0x16dc   :  { %v1906_v48 = vadd.f32 %v2212_v35, %v1868_v41  ;;  %v2457_v0 = vpop.f32.mrb[34].mxu0  ;;  %v1965_v41 = vld [vmem:[%s3449_s1 + $0x18] sm:$0xff] }
0x16dd   :  { %2590 = vtanh.f32 %v1908_v33  ;;  %v1909_v18 = vadd.f32 %v2457_v0, %v2212_v35  ;;  %v1871_v62 = vpop.f32.mrb[35].mxu0  ;;  %v1962_v33 = vld [vmem:[%s3449_s1] sm:$0xff]  ;;  %vm1973_vm11 = vcmp.ne.s32.totalorder %v1965_v41, 0 }
0x16de   :  { %2592 = vtanh.f32 %v1906_v48  ;;  %v1907_v19 = vadd.f32 %v2212_v35, %v1871_v62  ;;  %v1968_v48 = vld [vmem:[%s3449_s1 + $0x30] sm:$0xff]  ;;  %vm1970_vm10 = vcmp.ne.s32.totalorder %v1962_v33, 0 }
0x16df   :  { %2594 = vtanh.f32 %v1909_v18  ;;  %v1969_v18 = vld [vmem:[%s3449_s1 + $0x38] sm:$0xff]  ;;  %vm1976_vm12 = vcmp.ne.s32.totalorder %v1968_v48, 0 }
0x16e0   :  { %2596 = vtanh.f32 %v1907_v19  ;;  %vm1977_vm13 = vcmp.ne.s32.totalorder %v1969_v18, 0 }
0x16e2   :  { %v2460_v16 = vpop.f32.mrb[36].mxu0 }
0x16e3   :  { %v1912_v20 = vadd.f32 %v2460_v16, %v2212_v35  ;;  %v1884_v21 = vpop.f32.mrb[37].mxu0 }
0x16e4   :  { %v1910_v55 = vadd.f32 %v2212_v35, %v1884_v21  ;;  %v2461_v22 = vpop.f32.mrb[38].mxu0 }
0x16e5   :  { %2598 = vtanh.f32 %v1912_v20  ;;  %v1913_v2 = vadd.f32 %v2461_v22, %v2212_v35  ;;  %v1887_v40 = vpop.f32.mrb[39].mxu0 }
0x16e6   :  { %2600 = vtanh.f32 %v1910_v55  ;;  %v1911_v45 = vadd.f32 %v2212_v35, %v1887_v40  ;;  %v1964_v35 = vld [vmem:[%s3449_s1 + $0x10] sm:$0xff]  ;;  %s2635_s1 = smov 32  }
0x16e7   :  { %v2591_v49 = vpop.eup %2590  ;;  %2602 = vtanh.f32 %v1913_v2  ;;  %vm1972_vm8 = vcmp.ne.s32.totalorder %v1964_v35, 0 }
0x16e8   :  { %v2593_v23 = vpop.eup %2592  ;;  %2604 = vtanh.f32 %v1911_v45  ;;  %v1931_v43 = vmul.f32 %v2591_v49, %v2213_v10 }
0x16e9   :  { %v2595_v47 = vpop.eup %2594  ;;  %v1929_v24 = vmul.f32 %v2593_v23, %v2213_v10 }
0x16ea   :  { %v2597_v1 = vpop.eup %2596  ;;  %v1944_v26 = vsel %vm1937_vm0, %v1931_v43, 0.0  ;;  %v1932_v39 = vmul.f32 %v2595_v47, %v2213_v10 }
0x16eb   :  { %1945 = vadd.xlane.f32.xlu0 %v1944_v26  ;;  %v1938_v29 = vsel %vm1937_vm0, %v1929_v24, 0.0  ;;  %v1930_v36 = vmul.f32 %v2597_v1, %v2213_v10 }
0x16ec   :  { %1939 = vadd.xlane.f32.xlu1 %v1938_v29  ;;  %v1947_v53 = vsel %vm1937_vm0, %v1932_v39, 0.0 }
0x16ed   :  { %v1941_v25 = vsel %vm1937_vm0, %v1930_v36, 0.0 }
0x16ef   :  { %v2599_v12 = vpop.eup %2598  ;;  %1942 = vadd.xlane.f32.xlu0 %v1941_v25 }
0x16f0   :  { %v2601_v57 = vpop.eup %2600  ;;  %1948 = vadd.xlane.f32.xlu1 %v1947_v53  ;;  %v1935_v9 = vmul.f32 %v2599_v12, %v2213_v10 }
0x16f1   :  { %v2603_v17 = vpop.eup %2602  ;;  %v1933_v27 = vmul.f32 %v2601_v57, %v2213_v10 }
0x16f2   :  { %v2605_v7 = vpop.eup %2604  ;;  %v1936_v46 = vmul.f32 %v2603_v17, %v2213_v10  ;;  %v1956_v50 = vsel %vm1937_vm0, %v1935_v9, 0.0 }
0x16f3   :  { %v1950_v31 = vsel %vm1937_vm0, %v1933_v27, 0.0  ;;  %v1934_v38 = vmul.f32 %v2605_v7, %v2213_v10 }
0x16f4   :  { %1951 = vadd.xlane.f32.xlu0 %v1950_v31  ;;  %v1959_v58 = vsel %vm1937_vm0, %v1936_v46, 0.0 }
0x16f5   :  { %v1953_v3 = vsel %vm1937_vm0, %v1934_v38, 0.0 }
0x16f6   :  { %1954 = vadd.xlane.f32.xlu1 %v1953_v3 }
0x16f8   :  { %1957 = vadd.xlane.f32.xlu0 %v1956_v50 }
0x16fa   :  { %1960 = vadd.xlane.f32.xlu1 %v1959_v58 }
0x1778   :  { %v1946_v59 = vpop.xlane.xlu0 %1945 }
0x1779   :  { %v1940_v61 = vpop.xlane.xlu1 %1939  ;;  %v1980_v21 = vsel %vm1972_vm8, %v1946_v59, -1e+09 }
0x177a   :  { %v1978_v2 = vsel %vm1970_vm10, %v1940_v61, -1e+09  ;;  %v1989_v1 = vsel %vm1986_vm9, %v1980_v21, -inf }
0x177b   :  { %v1987_v26 = vsel %vm1986_vm9, %v1978_v2, -inf }
0x177c   :  { %v1943_v37 = vpop.xlane.xlu0 %1942 }
0x177d   :  { %v1949_v5 = vpop.xlane.xlu1 %1948  ;;  %v1979_v19 = vsel %vm1971_vm5, %v1943_v37, -1e+09 }
0x177e   :  { %v1981_v40 = vsel %vm1973_vm11, %v1949_v5, -1e+09  ;;  %v1988_v45 = vsel %vm1986_vm9, %v1979_v19, -inf }
0x177f   :  { %v1990_v29 = vsel %vm1986_vm9, %v1981_v40, -inf }
0x1781   :  { %v1952_v0 = vpop.xlane.xlu0 %1951 }
0x1782   :  { %v1982_v16 = vsel %vm1974_vm6, %v1952_v0, -1e+09 }
0x1783   :  { %v1955_v62 = vpop.xlane.xlu1 %1954  ;;  %v1991_v49 = vsel %vm1986_vm9, %v1982_v16, -inf }
0x1784   :  { %v1983_v20 = vsel %vm1975_vm7, %v1955_v62, -1e+09  ;;  %v1992_v39 = vmax.f32 %v1987_v26, %v1991_v49 }
0x1785   :  { %v1993_v55 = vsel %vm1986_vm9, %v1983_v20, -inf  ;;  %v1958_v22 = vpop.xlane.xlu0 %1957 }
0x1786   :  { %v1984_v10 = vsel %vm1976_vm12, %v1958_v22, -1e+09  ;;  %v1994_v47 = vmax.f32 %v1988_v45, %v1993_v55 }
0x1787   :  { %v1995_v23 = vsel %vm1986_vm9, %v1984_v10, -inf  ;;  %v1961_v43 = vpop.xlane.xlu1 %1960 }
0x1788   :  { %v1985_v24 = vsel %vm1977_vm13, %v1961_v43, -1e+09  ;;  %v1996_v25 = vmax.f32 %v1989_v1, %v1995_v23  ;;  %v1999_v53 = vmax.f32 %v1992_v39, %v1994_v47 }
0x1789   :  { %v1997_v36 = vsel %vm1986_vm9, %v1985_v24, -inf }
0x178a   :  { %v1998_v12 = vmax.f32 %v1990_v29, %v1997_v36 }
0x178c   :  { %v2000_v57 = vmax.f32 %v1996_v25, %v1998_v12 }
0x178e   :  { %v2001_v17 = vmax.f32 %v1999_v53, %v2000_v57 }
0x1790   :  { %v2002_v27 = vsub.f32 %v1978_v2, %v2001_v17  ;;  %v2003_v7 = vsub.f32 %v1979_v19, %v2001_v17  ;;  %v2004_v31 = vsub.f32 %v1980_v21, %v2001_v17  ;;  %v2005_v38 = vsub.f32 %v1981_v40, %v2001_v17 }
0x1791   :  { %v2006_v9 = vsub.f32 %v1982_v16, %v2001_v17  ;;  %v2007_v58 = vsub.f32 %v1983_v20, %v2001_v17  ;;  %v2008_v61 = vsub.f32 %v1984_v10, %v2001_v17  ;;  %v2009_v4 = vsub.f32 %v1985_v24, %v2001_v17 }
0x1792   :  { %v2010_v3 = vmul.f32 1.442695, %v2002_v27  ;;  %v2012_v46 = vmul.f32 1.442695, %v2003_v7  ;;  %v2014_v50 = vmul.f32 1.442695, %v2004_v31 }
0x1793   :  { %v2016_v59 = vmul.f32 1.442695, %v2005_v38  ;;  %v2018_v37 = vmul.f32 1.442695, %v2006_v9  ;;  %v2020_v63 = vmul.f32 1.442695, %v2007_v58 }
0x1794   :  { %2606 = vpow2.f32 %v2010_v3  ;;  %v2022_v54 = vmul.f32 1.442695, %v2008_v61  ;;  %v2024_v35 = vmul.f32 1.442695, %v2009_v4 }
0x1795   :  { %2608 = vpow2.f32 %v2012_v46 }
0x1796   :  { %2610 = vpow2.f32 %v2014_v50 }
0x1797   :  { %2612 = vpow2.f32 %v2016_v59 }
0x1798   :  { %2614 = vpow2.f32 %v2018_v37 }
0x1799   :  { %2616 = vpow2.f32 %v2020_v63 }
0x179a   :  { %2618 = vpow2.f32 %v2022_v54 }
0x179b   :  { %2620 = vpow2.f32 %v2024_v35 }
0x179e   :  { %v2607_v5 = vpop.eup %2606 }
0x179f   :  { %v2609_v33 = vpop.eup %2608  ;;  %v2026_v41 = vsel %vm1986_vm9, %v2607_v5, 0.0 }
0x17a0   :  { %v2611_v48 = vpop.eup %2610  ;;  %v2027_v0 = vsel %vm1986_vm9, %v2609_v33, 0.0 }
0x17a1   :  { %v2613_v18 = vpop.eup %2612  ;;  %v2028_v62 = vadd.f32 %v2027_v0, %v2026_v41  ;;  %v2029_v19 = vsel %vm1986_vm9, %v2611_v48, 0.0 }
0x17a2   :  { %v2615_v16 = vpop.eup %2614  ;;  %v2031_v21 = vsel %vm1986_vm9, %v2613_v18, 0.0 }
0x17a3   :  { %v2030_v20 = vadd.f32 %v2029_v19, %v2028_v62  ;;  %v2617_v55 = vpop.eup %2616  ;;  %v2033_v2 = vsel %vm1986_vm9, %v2615_v16, 0.0 }
0x17a4   :  { %v2619_v40 = vpop.eup %2618  ;;  %v2035_v45 = vsel %vm1986_vm9, %v2617_v55, 0.0 }
0x17a5   :  { %v2032_v22 = vadd.f32 %v2031_v21, %v2030_v20  ;;  %v2621_v49 = vpop.eup %2620  ;;  %v2037_v43 = vsel %vm1986_vm9, %v2619_v40, 0.0 }
0x17a6   :  { %v2039_v24 = vsel %vm1986_vm9, %v2621_v49, 0.0 }
0x17a7   :  { %v2034_v10 = vadd.f32 %v2033_v2, %v2032_v22 }
0x17a9   :  { %v2036_v23 = vadd.f32 %v2035_v45, %v2034_v10 }
0x17ab   :  { %v2038_v47 = vadd.f32 %v2037_v43, %v2036_v23 }
0x17ad   :  { %v2040_v1 = vadd.f32 %v2039_v24, %v2038_v47 }
0x17af   :  { %2622 = vrcp.f32 %v2040_v1 }
0x17b9   :  { %v2623_v26 = vpop.eup %2622 }
0x17ba   :  { %v2043_v29 = vmul.f32 %v2623_v26, %v2609_v33  ;;  %v2042_v36 = vmul.f32 %v2623_v26, %v2607_v5  ;;  %v2044_v39 = vmul.f32 %v2623_v26, %v2611_v48  ;;  %v2045_v25 = vmul.f32 %v2623_v26, %v2613_v18 }
0x17bb   :  { %v2046_v12 = vmul.f32 %v2623_v26, %v2615_v16  ;;  %v2047_v53 = vmul.f32 %v2623_v26, %v2617_v55  ;;  %v2048_v57 = vmul.f32 %v2623_v26, %v2619_v40  ;;  %v2049_v17 = vmul.f32 %v2623_v26, %v2621_v49 }
0x17bc   :  { %2057 = vperm.xlu1 %2477, %v2043_v29   ;;  %2052 = vperm.xlu0 %2476, %v2042_v36  }
0x17c0   :  { %2062 = vperm.xlu1 %2477, %v2044_v39   ;;  %2067 = vperm.xlu0 %2476, %v2045_v25  }
0x17c4   :  { %2072 = vperm.xlu1 %2477, %v2046_v12   ;;  %2077 = vperm.xlu0 %2476, %v2047_v53  }
0x17c8   :  { %2082 = vperm.xlu1 %2477, %v2048_v57   ;;  %2087 = vperm.xlu0 %2476, %v2049_v17  }
0x183b   :  { %v2058_v27 = vpop.permute.xlu1 %2057  ;;  %v2053_v7 = vpop.permute.xlu0 %2052 }
0x183c   :  { %v2091_v31 = vmul.f32 %v2058_v27, %v3316_v60  ;;  %v2114_v38 = vmul.f32 %v2058_v27, %v3281_v28  ;;  %v2090_v9 = vmul.f32 %v2053_v7, %v3314_v30  ;;  %v2113_v3 = vmul.f32 %v2053_v7, %v3279_v52 }
0x183e   :  { %v2099_v46 = vsel %vm102_vm1, %v2091_v31, 0.0  ;;  %v2122_v50 = vsel %vm102_vm1, %v2114_v38, 0.0  ;;  %v2098_v58 = vsel %vm102_vm1, %v2090_v9, 0.0  ;;  %v2121_v59 = vsel %vm102_vm1, %v2113_v3, 0.0 }
0x183f   :  { %v2100_v61 = vadd.f32 %v2099_v46, %v2098_v58  ;;  %v2063_v37 = vpop.permute.xlu1 %2062  ;;  %v2068_v4 = vpop.permute.xlu0 %2067  ;;  %v2123_v52 = vadd.f32 %v2122_v50, %v2121_v59 }
0x1840   :  { %v2092_v63 = vmul.f32 %v2063_v37, %v3322_v13  ;;  %v2115_v60 = vmul.f32 %v2063_v37, %v3287_v32  ;;  %v2093_v28 = vmul.f32 %v2068_v4, %v3324_v6  ;;  %v2116_v30 = vmul.f32 %v2068_v4, %v3289_v34 }
0x1842   :  { %v2101_v54 = vsel %vm102_vm1, %v2092_v63, 0.0  ;;  %v2124_v35 = vsel %vm102_vm1, %v2115_v60, 0.0  ;;  %v2103_v41 = vsel %vm102_vm1, %v2093_v28, 0.0  ;;  %v2126_v48 = vsel %vm102_vm1, %v2116_v30, 0.0 }
0x1843   :  { %v2102_v5 = vadd.f32 %v2101_v54, %v2100_v61  ;;  %v2125_v33 = vadd.f32 %v2124_v35, %v2123_v52  ;;  %v2073_v0 = vpop.permute.xlu1 %2072  ;;  %v2078_v18 = vpop.permute.xlu0 %2077 }
0x1844   :  { %v2094_v13 = vmul.f32 %v2073_v0, %v3330_v8  ;;  %v2117_v32 = vmul.f32 %v2073_v0, %v3298_v56  ;;  %v2095_v6 = vmul.f32 %v2078_v18, %v3332_v11  ;;  %v2118_v34 = vmul.f32 %v2078_v18, %v3300_v44 }
0x1845   :  { %v2104_v62 = vadd.f32 %v2103_v41, %v2102_v5  ;;  %v2127_v19 = vadd.f32 %v2126_v48, %v2125_v33 }
0x1846   :  { %v2105_v16 = vsel %vm102_vm1, %v2094_v13, 0.0  ;;  %v2128_v20 = vsel %vm102_vm1, %v2117_v32, 0.0  ;;  %v2107_v22 = vsel %vm102_vm1, %v2095_v6, 0.0  ;;  %v2130_v2 = vsel %vm102_vm1, %v2118_v34, 0.0 }
0x1847   :  { %v2106_v21 = vadd.f32 %v2105_v16, %v2104_v62  ;;  %v2129_v55 = vadd.f32 %v2128_v20, %v2127_v19  ;;  %v2083_v40 = vpop.permute.xlu1 %2082  ;;  %v2088_v8 = vpop.permute.xlu0 %2087 }
0x1848   :  { %v2096_v56 = vmul.f32 %v2083_v40, %v3337_v14  ;;  %v2119_v11 = vmul.f32 %v2083_v40, %v3306_v42  ;;  %v2097_v44 = vmul.f32 %v2088_v8, %v3339_v15  ;;  %v2120_v10 = vmul.f32 %v2088_v8, %v3308_v51 }
0x1849   :  { %v2108_v45 = vadd.f32 %v2107_v22, %v2106_v21  ;;  %v2131_v49 = vadd.f32 %v2130_v2, %v2129_v55 }
0x184a   :  { %v2109_v23 = vsel %vm102_vm1, %v2096_v56, 0.0  ;;  %v2132_v43 = vsel %vm102_vm1, %v2119_v11, 0.0  ;;  %v2111_v1 = vsel %vm102_vm1, %v2097_v44, 0.0  ;;  %v2134_v26 = vsel %vm102_vm1, %v2120_v10, 0.0 }
0x184b   :  { %v2110_v47 = vadd.f32 %v2109_v23, %v2108_v45  ;;  %v2133_v24 = vadd.f32 %v2132_v43, %v2131_v49 }
0x184d   :  { %v2112_v29 = vadd.f32 %v2111_v1, %v2110_v47  ;;  %v2135_v14 = vadd.f32 %v2134_v26, %v2133_v24 }
0x184f   :  { %2137 = vrot.lane.b32.xlu1 %v2135_v14, %s2635_s1 }
0x18c1   :  { %v2138_v42 = vpop.permute.xlu1 %2137 }
0x18c2   :  { %v2140_v15 = vsel %vm102_vm1, %v2112_v29, %v2138_v42 }
0x18c3   :  { %2141 = vst.msk [vmem:[%s3450_s15] sm:$0xff] %vm1937_vm0, %v2140_v15 }

</bundles_post_ra>
